<compile_context>
chip_gen: v7x
topology: tpu7x:2x2x1
jax: 0.10.0
libtpu: 0.0.40
codegen_flags: <defaults>
</compile_context>

<pallas_src>
import jax
import jax.numpy as jnp
import numpy as np
from jax import lax
from jax.experimental import pallas as pl
from jax.experimental.pallas import tpu as pltpu

# ----------------------------- configuration --------------------------------
B, DIM, H, W = 2, 32, 8, 8           # batch, channels, spatial
N_GROUP = 2                           # n_group of DecoderResidualBlock
GC = N_GROUP * DIM                    # trunk channels
HW = H * W
NL = B * HW                           # flattened (b, y, x) -> 128 lanes
RED = 16                              # SELayer reduction
HID = DIM // RED                      # SE hidden width
K = 5                                 # grouped conv kernel size
PAD = 2                               # grouped conv padding
EPS = 1e-5                            # BatchNorm eps
CENTER = (K * K) // 2                 # tap with dy = dx = 0


def _sigmoid(v):
    # numerically robust sigmoid via tanh (single EUP op, no inf intermediates)
    return 0.5 * (jnp.tanh(0.5 * v) + 1.0)


def _swish(v):
    return v * _sigmoid(v)


# ------------------------------- the kernel ---------------------------------
def decoder_resblock_kernel(
    x_ref,      # (B, DIM, HW)             f32 input (NCHW with HW flattened)
    w1_ref,     # (N_GROUP, DIM, DIM)      1x1 conv, BN1 folded
    b1_ref,     # (N_GROUP, DIM, 1)        f32
    w2_ref,     # (N_GROUP, K*K, DIM, DIM) grouped 5x5 conv, BN2 folded, per tap
    b2_ref,     # (N_GROUP, DIM, 1)        f32
    w3_ref,     # (N_GROUP, DIM, DIM)      1x1 conv, BN3 folded
    b3_ref,     # (DIM, 1)                 f32
    se1_ref,    # (DIM, HID)               SE fc1 weight (transposed), f32
    se2_ref,    # (DIM, HID)               SE fc2 weight, f32
    mask_ref,   # (K*K, NL)                precomputed boundary masks, f32
    out_ref,    # (B, DIM, HW)             f32
):
    md = w1_ref.dtype   # matmul operand dtype (f32 or bf16); accumulation is f32

    # ---- in-kernel relayout to the lane-dense (C, B*H*W) layout (128 lanes) --
    x = jnp.concatenate([x_ref[b] for b in range(B)], axis=1)     # (DIM, NL)
    xm = x.astype(md)
    masks = mask_ref[...]                                         # (K*K, NL)

    h3 = jnp.zeros((DIM, NL), jnp.float32)
    for g in range(N_GROUP):
        # ---- 1x1 conv (+ folded BN) -> Swish ---------------------------------
        h1g = _swish(
            jnp.dot(w1_ref[g], xm, preferred_element_type=jnp.float32)
            + b1_ref[g])                                          # (DIM, NL) f32

        # ---- grouped 5x5 conv, padding=2: per-tap accumulation ----------------
        # Output lane n = b*HW + y*W + x; tap (ky, kx) needs lane n + dy*W + dx
        # of h1g, realized as a lane roll + precomputed boundary-mask multiply.
        # No im2col buffer; each masked tap feeds the MXU from vregs.
        acc = jnp.dot(w2_ref[g, CENTER], h1g.astype(md),
                      preferred_element_type=jnp.float32)         # center tap
        for t in range(K * K):
            if t == CENTER:
                continue
            dy, dx = t // K - PAD, t % K - PAD
            shift = (-(dy * W + dx)) % NL
            tap = pltpu.roll(h1g, shift, axis=1) * masks[t:t + 1, :]
            acc = acc + jnp.dot(w2_ref[g, t], tap.astype(md),
                                preferred_element_type=jnp.float32)
        h2g = _swish(acc + b2_ref[g])                             # (DIM, NL) f32

        # ---- second 1x1 conv (+ folded BN), accumulated over groups ----------
        h3 = h3 + jnp.dot(w3_ref[g], h2g.astype(md),
                          preferred_element_type=jnp.float32)
    h3 = h3 + b3_ref[...]                                         # (DIM, NL)

    # ---- SELayer + residual, per batch (HID=2: VPU mul + XLU reduce, no MXU) --
    for b in range(B):
        h3b = h3[:, b * HW:(b + 1) * HW]                          # (DIM, HW)
        pooled = jnp.sum(h3b, axis=1, keepdims=True) * (1.0 / HW)  # (DIM, 1)
        hid = jnp.maximum(
            jnp.sum(se1_ref[...] * pooled, axis=0, keepdims=True), 0.0)  # (1, HID)
        zb = _sigmoid(jnp.sum(se2_ref[...] * hid, axis=1, keepdims=True))  # (DIM, 1)
        out_ref[b] = x_ref[b] + h3b * zb


# ----------------------------- wrapper / glue --------------------------------
def _fold_bn(gamma, beta, mean, var):
    s = gamma / jnp.sqrt(var + EPS)
    return s, beta - mean * s


def prepare_params(p, mm_dtype=jnp.float32):
    """One-time parameter preprocessing (outside the per-call path): BN folding,
    per-group/per-tap weight layout (no structural zeros), precomputed boundary
    masks, optional bf16 cast of the matmul operands."""
    s1, t1 = _fold_bn(p["g1"], p["be1"], p["m1"], p["v1"])
    s2, t2 = _fold_bn(p["g2"], p["be2"], p["m2"], p["v2"])
    s3, t3 = _fold_bn(p["g3"], p["be3"], p["m3"], p["v3"])

    # conv1 (1x1): (GC, DIM) -> per-group (N_GROUP, DIM, DIM)
    w1 = (p["w1"][:, :, 0, 0] * s1[:, None]).reshape(N_GROUP, DIM, DIM)
    b1 = (p["b1"] * s1 + t1).reshape(N_GROUP, DIM, 1)

    # conv2 (grouped 5x5): dense per-group/per-tap (N_GROUP, K*K, DIM, DIM)
    w2f = (p["w2"] * s2[:, None, None, None]).reshape(N_GROUP, DIM, DIM, K, K)
    w2 = jnp.transpose(w2f, (0, 3, 4, 1, 2)).reshape(N_GROUP, K * K, DIM, DIM)
    b2 = (p["b2"] * s2 + t2).reshape(N_GROUP, DIM, 1)

    # conv3 (1x1): (DIM, GC) -> per-group (N_GROUP, DIM, DIM)
    w3f = p["w3"][:, :, 0, 0] * s3[:, None]
    w3 = jnp.transpose(w3f.reshape(DIM, N_GROUP, DIM), (1, 0, 2))
    b3 = (p["b3"] * s3 + t3).reshape(DIM, 1)

    # SE Linear weights: both stored as (DIM, HID), stay f32 (VPU/XLU path)
    se1 = jnp.transpose(p["sew1"], (1, 0)).astype(jnp.float32)
    se2 = p["sew2"].astype(jnp.float32)

    # precomputed boundary-validity masks, one (NL,) row per tap
    n = np.arange(NL)
    yy, xx = (n % HW) // W, n % W
    mask = np.zeros((K * K, NL), np.float32)
    for t in range(K * K):
        dy, dx = t // K - PAD, t % K - PAD
        mask[t] = ((yy + dy >= 0) & (yy + dy < H) &
                   (xx + dx >= 0) & (xx + dx < W)).astype(np.float32)

    f32 = jnp.float32
    return dict(
        w1=w1.astype(mm_dtype), b1=b1.astype(f32),
        w2=w2.astype(mm_dtype), b2=b2.astype(f32),
        w3=w3.astype(mm_dtype), b3=b3.astype(f32),
        se1=se1, se2=se2, mask=jnp.asarray(mask))


@jax.jit
def decoder_residual_block(x_nchw, q):
    """Per-call path: only free reshapes outside the kernel; the NCHW <->
    lane-dense relayout happens inside the kernel (no extra XLA transposes)."""
    x = x_nchw.reshape(B, DIM, HW)

    vmem = pl.BlockSpec(memory_space=pltpu.MemorySpace.VMEM)
    out = pl.pallas_call(
        decoder_resblock_kernel,
        out_shape=jax.ShapeDtypeStruct((B, DIM, HW), jnp.float32),
        in_specs=[vmem] * 10,
        out_specs=vmem,
    )(x, q["w1"], q["b1"], q["w2"], q["b2"], q["w3"], q["b3"],
      q["se1"], q["se2"], q["mask"])

    return out.reshape(B, DIM, H, W)


# ------------------------- pure-JAX reference (NCHW) --------------------------
def reference(x, p):
    def bn(h, g, b, m, v):
        sh = lambda a: a[None, :, None, None]
        return (h - sh(m)) / jnp.sqrt(sh(v) + EPS) * sh(g) + sh(b)

    dn = ("NCHW", "OIHW", "NCHW")
    hp = lax.Precision.HIGHEST

    h = lax.conv_general_dilated(x, p["w1"], (1, 1), "VALID",
                                 dimension_numbers=dn, precision=hp)
    h = h + p["b1"][None, :, None, None]
    h = _swish(bn(h, p["g1"], p["be1"], p["m1"], p["v1"]))

    h = lax.conv_general_dilated(h, p["w2"], (1, 1), [(PAD, PAD), (PAD, PAD)],
                                 dimension_numbers=dn,
                                 feature_group_count=N_GROUP, precision=hp)
    h = h + p["b2"][None, :, None, None]
    h = _swish(bn(h, p["g2"], p["be2"], p["m2"], p["v2"]))

    h = lax.conv_general_dilated(h, p["w3"], (1, 1), "VALID",
                                 dimension_numbers=dn, precision=hp)
    h = h + p["b3"][None, :, None, None]
    h = bn(h, p["g3"], p["be3"], p["m3"], p["v3"])

    # SELayer
    y = jnp.mean(h, axis=(2, 3))                                  # (B, DIM)
    y = jnp.maximum(y @ p["sew1"].T, 0.0)
    y = _sigmoid(y @ p["sew2"].T)
    return x + h * y[:, :, None, None]


# ---------------------------------- main -------------------------------------
if __name__ == "__main__":
    key = jax.random.PRNGKey(0)
    ks = jax.random.split(key, 24)
    nrm = lambda k, s, sc=0.1: sc * jax.random.normal(k, s, jnp.float32)
    uni = lambda k, s: 1.0 + 0.1 * jax.random.uniform(k, s, jnp.float32)

    params = {
        # conv1: 1x1, dim -> n_group*dim
        "w1": nrm(ks[0], (GC, DIM, 1, 1)), "b1": nrm(ks[1], (GC,)),
        "g1": 1.0 + nrm(ks[2], (GC,)), "be1": nrm(ks[3], (GC,)),
        "m1": nrm(ks[4], (GC,)), "v1": uni(ks[5], (GC,)),
        # conv2: 5x5 grouped
        "w2": nrm(ks[6], (GC, DIM, K, K)), "b2": nrm(ks[7], (GC,)),
        "g2": 1.0 + nrm(ks[8], (GC,)), "be2": nrm(ks[9], (GC,)),
        "m2": nrm(ks[10], (GC,)), "v2": uni(ks[11], (GC,)),
        # conv3: 1x1, n_group*dim -> dim
        "w3": nrm(ks[12], (DIM, GC, 1, 1)), "b3": nrm(ks[13], (DIM,)),
        "g3": 1.0 + nrm(ks[14], (DIM,)), "be3": nrm(ks[15], (DIM,)),
        "m3": nrm(ks[16], (DIM,)), "v3": uni(ks[17], (DIM,)),
        # SELayer fc (no bias), PyTorch Linear weight layout (out, in)
        "sew1": nrm(ks[18], (HID, DIM)),
        "sew2": nrm(ks[19], (DIM, HID)),
    }

    x = jax.random.normal(ks[20], (B, DIM, H, W), jnp.float32)
    ref = jax.block_until_ready(reference(x, params))

    # f32 MXU-operand path (exact-semantics check; recommended for v5e)
    out_f32 = jax.block_until_ready(
        decoder_residual_block(x, prepare_params(params, jnp.float32)))
    assert out_f32.shape == (B, DIM, H, W)
    assert jnp.allclose(out_f32, ref, rtol=2e-3, atol=2e-3), (
        float(jnp.max(jnp.abs(out_f32 - ref))))

    # bf16 MXU-operand path (f32 accumulation) for the bf16-native v6e/v7x MXUs;
    # validated at a bf16-appropriate tolerance.
    out_bf16 = jax.block_until_ready(
        decoder_residual_block(x, prepare_params(params, jnp.bfloat16)))
    assert jnp.allclose(out_bf16, ref, rtol=2e-2, atol=2e-2), (
        float(jnp.max(jnp.abs(out_bf16 - ref))))

    print("KERNEL_OK")
</pallas_src>

<mosaic_0001>
module attributes {stable_mosaic.version = 11 : i64} {
  func.func @decoder_resblock_kernel(%arg0: memref<2x32x64xf32, #tpu.memory_space<vmem>>, %arg1: memref<2x32x32xf32, #tpu.memory_space<vmem>>, %arg2: memref<2x32x1xf32, #tpu.memory_space<vmem>>, %arg3: memref<2x25x32x32xf32, #tpu.memory_space<vmem>>, %arg4: memref<2x32x1xf32, #tpu.memory_space<vmem>>, %arg5: memref<2x32x32xf32, #tpu.memory_space<vmem>>, %arg6: memref<32x1xf32, #tpu.memory_space<vmem>>, %arg7: memref<32x2xf32, #tpu.memory_space<vmem>>, %arg8: memref<32x2xf32, #tpu.memory_space<vmem>>, %arg9: memref<25x128xf32, #tpu.memory_space<vmem>>, %arg10: memref<2x32x64xf32, #tpu.memory_space<vmem>>) attributes {dimension_semantics = [], scalar_prefetch = 0 : i64, scratch_operands = 0 : i64, tpu.core_type = #tpu.core_type<tc>} {
    %c0 = arith.constant 0 : index
    %c0_0 = arith.constant 0 : index
    %c0_1 = arith.constant 0 : index
    %0 = vector.load %arg0[%c0, %c0_0, %c0_1] : memref<2x32x64xf32, #tpu.memory_space<vmem>>, vector<1x32x64xf32>
    %1 = vector.shape_cast %0 : vector<1x32x64xf32> to vector<32x64xf32>
    %c1 = arith.constant 1 : index
    %c0_2 = arith.constant 0 : index
    %c0_3 = arith.constant 0 : index
    %2 = vector.load %arg0[%c1, %c0_2, %c0_3] : memref<2x32x64xf32, #tpu.memory_space<vmem>>, vector<1x32x64xf32>
    %3 = vector.shape_cast %2 : vector<1x32x64xf32> to vector<32x64xf32>
    %4 = tpu.concatenate %1, %3 in 1 : vector<32x64xf32>, vector<32x64xf32> -> vector<32x128xf32>
    %c0_4 = arith.constant 0 : index
    %c0_5 = arith.constant 0 : index
    %5 = vector.load %arg9[%c0_4, %c0_5] : memref<25x128xf32, #tpu.memory_space<vmem>>, vector<25x128xf32>
    %cst = arith.constant 0.000000e+00 : f32
    %6 = vector.broadcast %cst : f32 to vector<32x128xf32>
    %c0_6 = arith.constant 0 : index
    %c0_7 = arith.constant 0 : index
    %c0_8 = arith.constant 0 : index
    %7 = vector.load %arg1[%c0_6, %c0_7, %c0_8] : memref<2x32x32xf32, #tpu.memory_space<vmem>>, vector<1x32x32xf32>
    %8 = vector.shape_cast %7 : vector<1x32x32xf32> to vector<32x32xf32>
    %cst_9 = arith.constant dense<0.000000e+00> : vector<32x128xf32>
    %9 = tpu.matmul %8, %4, %cst_9 {dimension_numbers = #tpu.dot_dimension_numbers<[1], [0], [0], [1], [0, 0, 1, 1], [], []>} : vector<32x32xf32>, vector<32x128xf32>, vector<32x128xf32> -> vector<32x128xf32>
    %c0_10 = arith.constant 0 : index
    %c0_11 = arith.constant 0 : index
    %c0_12 = arith.constant 0 : index
    %10 = vector.load %arg2[%c0_10, %c0_11, %c0_12] : memref<2x32x1xf32, #tpu.memory_space<vmem>>, vector<1x32x1xf32>
    %11 = vector.shape_cast %10 : vector<1x32x1xf32> to vector<32x1xf32>
    %12 = vector.broadcast %11 : vector<32x1xf32> to vector<32x128xf32>
    %13 = arith.addf %9, %12 : vector<32x128xf32>
    %cst_13 = arith.constant 5.000000e-01 : f32
    %14 = vector.broadcast %cst_13 : f32 to vector<32x128xf32>
    %15 = arith.mulf %14, %13 : vector<32x128xf32>
    %16 = math.tanh %15 : vector<32x128xf32>
    %cst_14 = arith.constant 1.000000e+00 : f32
    %17 = vector.broadcast %cst_14 : f32 to vector<32x128xf32>
    %18 = arith.addf %16, %17 : vector<32x128xf32>
    %cst_15 = arith.constant 5.000000e-01 : f32
    %19 = vector.broadcast %cst_15 : f32 to vector<32x128xf32>
    %20 = arith.mulf %19, %18 : vector<32x128xf32>
    %21 = arith.mulf %13, %20 : vector<32x128xf32>
    %c0_16 = arith.constant 0 : index
    %c12 = arith.constant 12 : index
    %c0_17 = arith.constant 0 : index
    %c0_18 = arith.constant 0 : index
    %22 = vector.load %arg3[%c0_16, %c12, %c0_17, %c0_18] : memref<2x25x32x32xf32, #tpu.memory_space<vmem>>, vector<1x1x32x32xf32>
    %23 = vector.shape_cast %22 : vector<1x1x32x32xf32> to vector<32x32xf32>
    %cst_19 = arith.constant dense<0.000000e+00> : vector<32x128xf32>
    %24 = tpu.matmul %23, %21, %cst_19 {dimension_numbers = #tpu.dot_dimension_numbers<[1], [0], [0], [1], [0, 0, 1, 1], [], []>} : vector<32x32xf32>, vector<32x128xf32>, vector<32x128xf32> -> vector<32x128xf32>
    %c18_i32 = arith.constant 18 : i32
    %25 = tpu.dynamic_rotate %21 by %c18_i32 dim 1 : vector<32x128xf32>, i32 -> vector<32x128xf32>
    %26 = vector.extract_strided_slice %5 {offsets = [0, 0], sizes = [1, 128], strides = [1, 1]} : vector<25x128xf32> to vector<1x128xf32>
    %27 = vector.broadcast %26 : vector<1x128xf32> to vector<32x128xf32>
    %28 = arith.mulf %25, %27 : vector<32x128xf32>
    %c0_20 = arith.constant 0 : index
    %c0_21 = arith.constant 0 : index
    %c0_22 = arith.constant 0 : index
    %c0_23 = arith.constant 0 : index
    %29 = vector.load %arg3[%c0_20, %c0_21, %c0_22, %c0_23] : memref<2x25x32x32xf32, #tpu.memory_space<vmem>>, vector<1x1x32x32xf32>
    %30 = vector.shape_cast %29 : vector<1x1x32x32xf32> to vector<32x32xf32>
    %cst_24 = arith.constant dense<0.000000e+00> : vector<32x128xf32>
    %31 = tpu.matmul %30, %28, %cst_24 {dimension_numbers = #tpu.dot_dimension_numbers<[1], [0], [0], [1], [0, 0, 1, 1], [], []>} : vector<32x32xf32>, vector<32x128xf32>, vector<32x128xf32> -> vector<32x128xf32>
    %32 = arith.addf %24, %31 : vector<32x128xf32>
    %c17_i32 = arith.constant 17 : i32
    %33 = tpu.dynamic_rotate %21 by %c17_i32 dim 1 : vector<32x128xf32>, i32 -> vector<32x128xf32>
    %34 = vector.extract_strided_slice %5 {offsets = [1, 0], sizes = [1, 128], strides = [1, 1]} : vector<25x128xf32> to vector<1x128xf32>
    %35 = vector.broadcast %34 : vector<1x128xf32> to vector<32x128xf32>
    %36 = arith.mulf %33, %35 : vector<32x128xf32>
    %c0_25 = arith.constant 0 : index
    %c1_26 = arith.constant 1 : index
    %c0_27 = arith.constant 0 : index
    %c0_28 = arith.constant 0 : index
    %37 = vector.load %arg3[%c0_25, %c1_26, %c0_27, %c0_28] : memref<2x25x32x32xf32, #tpu.memory_space<vmem>>, vector<1x1x32x32xf32>
    %38 = vector.shape_cast %37 : vector<1x1x32x32xf32> to vector<32x32xf32>
    %cst_29 = arith.constant dense<0.000000e+00> : vector<32x128xf32>
    %39 = tpu.matmul %38, %36, %cst_29 {dimension_numbers = #tpu.dot_dimension_numbers<[1], [0], [0], [1], [0, 0, 1, 1], [], []>} : vector<32x32xf32>, vector<32x128xf32>, vector<32x128xf32> -> vector<32x128xf32>
    %40 = arith.addf %32, %39 : vector<32x128xf32>
    %c16_i32 = arith.constant 16 : i32
    %41 = tpu.dynamic_rotate %21 by %c16_i32 dim 1 : vector<32x128xf32>, i32 -> vector<32x128xf32>
    %42 = vector.extract_strided_slice %5 {offsets = [2, 0], sizes = [1, 128], strides = [1, 1]} : vector<25x128xf32> to vector<1x128xf32>
    %43 = vector.broadcast %42 : vector<1x128xf32> to vector<32x128xf32>
    %44 = arith.mulf %41, %43 : vector<32x128xf32>
    %c0_30 = arith.constant 0 : index
    %c2 = arith.constant 2 : index
    %c0_31 = arith.constant 0 : index
    %c0_32 = arith.constant 0 : index
    %45 = vector.load %arg3[%c0_30, %c2, %c0_31, %c0_32] : memref<2x25x32x32xf32, #tpu.memory_space<vmem>>, vector<1x1x32x32xf32>
    %46 = vector.shape_cast %45 : vector<1x1x32x32xf32> to vector<32x32xf32>
    %cst_33 = arith.constant dense<0.000000e+00> : vector<32x128xf32>
    %47 = tpu.matmul %46, %44, %cst_33 {dimension_numbers = #tpu.dot_dimension_numbers<[1], [0], [0], [1], [0, 0, 1, 1], [], []>} : vector<32x32xf32>, vector<32x128xf32>, vector<32x128xf32> -> vector<32x128xf32>
    %48 = arith.addf %40, %47 : vector<32x128xf32>
    %c15_i32 = arith.constant 15 : i32
    %49 = tpu.dynamic_rotate %21 by %c15_i32 dim 1 : vector<32x128xf32>, i32 -> vector<32x128xf32>
    %50 = vector.extract_strided_slice %5 {offsets = [3, 0], sizes = [1, 128], strides = [1, 1]} : vector<25x128xf32> to vector<1x128xf32>
    %51 = vector.broadcast %50 : vector<1x128xf32> to vector<32x128xf32>
    %52 = arith.mulf %49, %51 : vector<32x128xf32>
    %c0_34 = arith.constant 0 : index
    %c3 = arith.constant 3 : index
    %c0_35 = arith.constant 0 : index
    %c0_36 = arith.constant 0 : index
    %53 = vector.load %arg3[%c0_34, %c3, %c0_35, %c0_36] : memref<2x25x32x32xf32, #tpu.memory_space<vmem>>, vector<1x1x32x32xf32>
    %54 = vector.shape_cast %53 : vector<1x1x32x32xf32> to vector<32x32xf32>
    %cst_37 = arith.constant dense<0.000000e+00> : vector<32x128xf32>
    %55 = tpu.matmul %54, %52, %cst_37 {dimension_numbers = #tpu.dot_dimension_numbers<[1], [0], [0], [1], [0, 0, 1, 1], [], []>} : vector<32x32xf32>, vector<32x128xf32>, vector<32x128xf32> -> vector<32x128xf32>
    %56 = arith.addf %48, %55 : vector<32x128xf32>
    %c14_i32 = arith.constant 14 : i32
    %57 = tpu.dynamic_rotate %21 by %c14_i32 dim 1 : vector<32x128xf32>, i32 -> vector<32x128xf32>
    %58 = vector.extract_strided_slice %5 {offsets = [4, 0], sizes = [1, 128], strides = [1, 1]} : vector<25x128xf32> to vector<1x128xf32>
    %59 = vector.broadcast %58 : vector<1x128xf32> to vector<32x128xf32>
    %60 = arith.mulf %57, %59 : vector<32x128xf32>
    %c0_38 = arith.constant 0 : index
    %c4 = arith.constant 4 : index
    %c0_39 = arith.constant 0 : index
    %c0_40 = arith.constant 0 : index
    %61 = vector.load %arg3[%c0_38, %c4, %c0_39, %c0_40] : memref<2x25x32x32xf32, #tpu.memory_space<vmem>>, vector<1x1x32x32xf32>
    %62 = vector.shape_cast %61 : vector<1x1x32x32xf32> to vector<32x32xf32>
    %cst_41 = arith.constant dense<0.000000e+00> : vector<32x128xf32>
    %63 = tpu.matmul %62, %60, %cst_41 {dimension_numbers = #tpu.dot_dimension_numbers<[1], [0], [0], [1], [0, 0, 1, 1], [], []>} : vector<32x32xf32>, vector<32x128xf32>, vector<32x128xf32> -> vector<32x128xf32>
    %64 = arith.addf %56, %63 : vector<32x128xf32>
    %c10_i32 = arith.constant 10 : i32
    %65 = tpu.dynamic_rotate %21 by %c10_i32 dim 1 : vector<32x128xf32>, i32 -> vector<32x128xf32>
    %66 = vector.extract_strided_slice %5 {offsets = [5, 0], sizes = [1, 128], strides = [1, 1]} : vector<25x128xf32> to vector<1x128xf32>
    %67 = vector.broadcast %66 : vector<1x128xf32> to vector<32x128xf32>
    %68 = arith.mulf %65, %67 : vector<32x128xf32>
    %c0_42 = arith.constant 0 : index
    %c5 = arith.constant 5 : index
    %c0_43 = arith.constant 0 : index
    %c0_44 = arith.constant 0 : index
    %69 = vector.load %arg3[%c0_42, %c5, %c0_43, %c0_44] : memref<2x25x32x32xf32, #tpu.memory_space<vmem>>, vector<1x1x32x32xf32>
    %70 = vector.shape_cast %69 : vector<1x1x32x32xf32> to vector<32x32xf32>
    %cst_45 = arith.constant dense<0.000000e+00> : vector<32x128xf32>
    %71 = tpu.matmul %70, %68, %cst_45 {dimension_numbers = #tpu.dot_dimension_numbers<[1], [0], [0], [1], [0, 0, 1, 1], [], []>} : vector<32x32xf32>, vector<32x128xf32>, vector<32x128xf32> -> vector<32x128xf32>
    %72 = arith.addf %64, %71 : vector<32x128xf32>
    %c9_i32 = arith.constant 9 : i32
    %73 = tpu.dynamic_rotate %21 by %c9_i32 dim 1 : vector<32x128xf32>, i32 -> vector<32x128xf32>
    %74 = vector.extract_strided_slice %5 {offsets = [6, 0], sizes = [1, 128], strides = [1, 1]} : vector<25x128xf32> to vector<1x128xf32>
    %75 = vector.broadcast %74 : vector<1x128xf32> to vector<32x128xf32>
    %76 = arith.mulf %73, %75 : vector<32x128xf32>
    %c0_46 = arith.constant 0 : index
    %c6 = arith.constant 6 : index
    %c0_47 = arith.constant 0 : index
    %c0_48 = arith.constant 0 : index
    %77 = vector.load %arg3[%c0_46, %c6, %c0_47, %c0_48] : memref<2x25x32x32xf32, #tpu.memory_space<vmem>>, vector<1x1x32x32xf32>
    %78 = vector.shape_cast %77 : vector<1x1x32x32xf32> to vector<32x32xf32>
    %cst_49 = arith.constant dense<0.000000e+00> : vector<32x128xf32>
    %79 = tpu.matmul %78, %76, %cst_49 {dimension_numbers = #tpu.dot_dimension_numbers<[1], [0], [0], [1], [0, 0, 1, 1], [], []>} : vector<32x32xf32>, vector<32x128xf32>, vector<32x128xf32> -> vector<32x128xf32>
    %80 = arith.addf %72, %79 : vector<32x128xf32>
    %c8_i32 = arith.constant 8 : i32
    %81 = tpu.dynamic_rotate %21 by %c8_i32 dim 1 : vector<32x128xf32>, i32 -> vector<32x128xf32>
    %82 = vector.extract_strided_slice %5 {offsets = [7, 0], sizes = [1, 128], strides = [1, 1]} : vector<25x128xf32> to vector<1x128xf32>
    %83 = vector.broadcast %82 : vector<1x128xf32> to vector<32x128xf32>
    %84 = arith.mulf %81, %83 : vector<32x128xf32>
    %c0_50 = arith.constant 0 : index
    %c7 = arith.constant 7 : index
    %c0_51 = arith.constant 0 : index
    %c0_52 = arith.constant 0 : index
    %85 = vector.load %arg3[%c0_50, %c7, %c0_51, %c0_52] : memref<2x25x32x32xf32, #tpu.memory_space<vmem>>, vector<1x1x32x32xf32>
    %86 = vector.shape_cast %85 : vector<1x1x32x32xf32> to vector<32x32xf32>
    %cst_53 = arith.constant dense<0.000000e+00> : vector<32x128xf32>
    %87 = tpu.matmul %86, %84, %cst_53 {dimension_numbers = #tpu.dot_dimension_numbers<[1], [0], [0], [1], [0, 0, 1, 1], [], []>} : vector<32x32xf32>, vector<32x128xf32>, vector<32x128xf32> -> vector<32x128xf32>
    %88 = arith.addf %80, %87 : vector<32x128xf32>
    %c7_i32 = arith.constant 7 : i32
    %89 = tpu.dynamic_rotate %21 by %c7_i32 dim 1 : vector<32x128xf32>, i32 -> vector<32x128xf32>
    %90 = vector.extract_strided_slice %5 {offsets = [8, 0], sizes = [1, 128], strides = [1, 1]} : vector<25x128xf32> to vector<1x128xf32>
    %91 = vector.broadcast %90 : vector<1x128xf32> to vector<32x128xf32>
    %92 = arith.mulf %89, %91 : vector<32x128xf32>
    %c0_54 = arith.constant 0 : index
    %c8 = arith.constant 8 : index
    %c0_55 = arith.constant 0 : index
    %c0_56 = arith.constant 0 : index
    %93 = vector.load %arg3[%c0_54, %c8, %c0_55, %c0_56] : memref<2x25x32x32xf32, #tpu.memory_space<vmem>>, vector<1x1x32x32xf32>
    %94 = vector.shape_cast %93 : vector<1x1x32x32xf32> to vector<32x32xf32>
    %cst_57 = arith.constant dense<0.000000e+00> : vector<32x128xf32>
    %95 = tpu.matmul %94, %92, %cst_57 {dimension_numbers = #tpu.dot_dimension_numbers<[1], [0], [0], [1], [0, 0, 1, 1], [], []>} : vector<32x32xf32>, vector<32x128xf32>, vector<32x128xf32> -> vector<32x128xf32>
    %96 = arith.addf %88, %95 : vector<32x128xf32>
    %c6_i32 = arith.constant 6 : i32
    %97 = tpu.dynamic_rotate %21 by %c6_i32 dim 1 : vector<32x128xf32>, i32 -> vector<32x128xf32>
    %98 = vector.extract_strided_slice %5 {offsets = [9, 0], sizes = [1, 128], strides = [1, 1]} : vector<25x128xf32> to vector<1x128xf32>
    %99 = vector.broadcast %98 : vector<1x128xf32> to vector<32x128xf32>
    %100 = arith.mulf %97, %99 : vector<32x128xf32>
    %c0_58 = arith.constant 0 : index
    %c9 = arith.constant 9 : index
    %c0_59 = arith.constant 0 : index
    %c0_60 = arith.constant 0 : index
    %101 = vector.load %arg3[%c0_58, %c9, %c0_59, %c0_60] : memref<2x25x32x32xf32, #tpu.memory_space<vmem>>, vector<1x1x32x32xf32>
    %102 = vector.shape_cast %101 : vector<1x1x32x32xf32> to vector<32x32xf32>
    %cst_61 = arith.constant dense<0.000000e+00> : vector<32x128xf32>
    %103 = tpu.matmul %102, %100, %cst_61 {dimension_numbers = #tpu.dot_dimension_numbers<[1], [0], [0], [1], [0, 0, 1, 1], [], []>} : vector<32x32xf32>, vector<32x128xf32>, vector<32x128xf32> -> vector<32x128xf32>
    %104 = arith.addf %96, %103 : vector<32x128xf32>
    %c2_i32 = arith.constant 2 : i32
    %105 = tpu.dynamic_rotate %21 by %c2_i32 dim 1 : vector<32x128xf32>, i32 -> vector<32x128xf32>
    %106 = vector.extract_strided_slice %5 {offsets = [10, 0], sizes = [1, 128], strides = [1, 1]} : vector<25x128xf32> to vector<1x128xf32>
    %107 = vector.broadcast %106 : vector<1x128xf32> to vector<32x128xf32>
    %108 = arith.mulf %105, %107 : vector<32x128xf32>
    %c0_62 = arith.constant 0 : index
    %c10 = arith.constant 10 : index
    %c0_63 = arith.constant 0 : index
    %c0_64 = arith.constant 0 : index
    %109 = vector.load %arg3[%c0_62, %c10, %c0_63, %c0_64] : memref<2x25x32x32xf32, #tpu.memory_space<vmem>>, vector<1x1x32x32xf32>
    %110 = vector.shape_cast %109 : vector<1x1x32x32xf32> to vector<32x32xf32>
    %cst_65 = arith.constant dense<0.000000e+00> : vector<32x128xf32>
    %111 = tpu.matmul %110, %108, %cst_65 {dimension_numbers = #tpu.dot_dimension_numbers<[1], [0], [0], [1], [0, 0, 1, 1], [], []>} : vector<32x32xf32>, vector<32x128xf32>, vector<32x128xf32> -> vector<32x128xf32>
    %112 = arith.addf %104, %111 : vector<32x128xf32>
    %c1_i32 = arith.constant 1 : i32
    %113 = tpu.dynamic_rotate %21 by %c1_i32 dim 1 : vector<32x128xf32>, i32 -> vector<32x128xf32>
    %114 = vector.extract_strided_slice %5 {offsets = [11, 0], sizes = [1, 128], strides = [1, 1]} : vector<25x128xf32> to vector<1x128xf32>
    %115 = vector.broadcast %114 : vector<1x128xf32> to vector<32x128xf32>
    %116 = arith.mulf %113, %115 : vector<32x128xf32>
    %c0_66 = arith.constant 0 : index
    %c11 = arith.constant 11 : index
    %c0_67 = arith.constant 0 : index
    %c0_68 = arith.constant 0 : index
    %117 = vector.load %arg3[%c0_66, %c11, %c0_67, %c0_68] : memref<2x25x32x32xf32, #tpu.memory_space<vmem>>, vector<1x1x32x32xf32>
    %118 = vector.shape_cast %117 : vector<1x1x32x32xf32> to vector<32x32xf32>
    %cst_69 = arith.constant dense<0.000000e+00> : vector<32x128xf32>
    %119 = tpu.matmul %118, %116, %cst_69 {dimension_numbers = #tpu.dot_dimension_numbers<[1], [0], [0], [1], [0, 0, 1, 1], [], []>} : vector<32x32xf32>, vector<32x128xf32>, vector<32x128xf32> -> vector<32x128xf32>
    %120 = arith.addf %112, %119 : vector<32x128xf32>
    %c127_i32 = arith.constant 127 : i32
    %121 = tpu.dynamic_rotate %21 by %c127_i32 dim 1 : vector<32x128xf32>, i32 -> vector<32x128xf32>
    %122 = vector.extract_strided_slice %5 {offsets = [13, 0], sizes = [1, 128], strides = [1, 1]} : vector<25x128xf32> to vector<1x128xf32>
    %123 = vector.broadcast %122 : vector<1x128xf32> to vector<32x128xf32>
    %124 = arith.mulf %121, %123 : vector<32x128xf32>
    %c0_70 = arith.constant 0 : index
    %c13 = arith.constant 13 : index
    %c0_71 = arith.constant 0 : index
    %c0_72 = arith.constant 0 : index
    %125 = vector.load %arg3[%c0_70, %c13, %c0_71, %c0_72] : memref<2x25x32x32xf32, #tpu.memory_space<vmem>>, vector<1x1x32x32xf32>
    %126 = vector.shape_cast %125 : vector<1x1x32x32xf32> to vector<32x32xf32>
    %cst_73 = arith.constant dense<0.000000e+00> : vector<32x128xf32>
    %127 = tpu.matmul %126, %124, %cst_73 {dimension_numbers = #tpu.dot_dimension_numbers<[1], [0], [0], [1], [0, 0, 1, 1], [], []>} : vector<32x32xf32>, vector<32x128xf32>, vector<32x128xf32> -> vector<32x128xf32>
    %128 = arith.addf %120, %127 : vector<32x128xf32>
    %c126_i32 = arith.constant 126 : i32
    %129 = tpu.dynamic_rotate %21 by %c126_i32 dim 1 : vector<32x128xf32>, i32 -> vector<32x128xf32>
    %130 = vector.extract_strided_slice %5 {offsets = [14, 0], sizes = [1, 128], strides = [1, 1]} : vector<25x128xf32> to vector<1x128xf32>
    %131 = vector.broadcast %130 : vector<1x128xf32> to vector<32x128xf32>
    %132 = arith.mulf %129, %131 : vector<32x128xf32>
    %c0_74 = arith.constant 0 : index
    %c14 = arith.constant 14 : index
    %c0_75 = arith.constant 0 : index
    %c0_76 = arith.constant 0 : index
    %133 = vector.load %arg3[%c0_74, %c14, %c0_75, %c0_76] : memref<2x25x32x32xf32, #tpu.memory_space<vmem>>, vector<1x1x32x32xf32>
    %134 = vector.shape_cast %133 : vector<1x1x32x32xf32> to vector<32x32xf32>
    %cst_77 = arith.constant dense<0.000000e+00> : vector<32x128xf32>
    %135 = tpu.matmul %134, %132, %cst_77 {dimension_numbers = #tpu.dot_dimension_numbers<[1], [0], [0], [1], [0, 0, 1, 1], [], []>} : vector<32x32xf32>, vector<32x128xf32>, vector<32x128xf32> -> vector<32x128xf32>
    %136 = arith.addf %128, %135 : vector<32x128xf32>
    %c122_i32 = arith.constant 122 : i32
    %137 = tpu.dynamic_rotate %21 by %c122_i32 dim 1 : vector<32x128xf32>, i32 -> vector<32x128xf32>
    %138 = vector.extract_strided_slice %5 {offsets = [15, 0], sizes = [1, 128], strides = [1, 1]} : vector<25x128xf32> to vector<1x128xf32>
    %139 = vector.broadcast %138 : vector<1x128xf32> to vector<32x128xf32>
    %140 = arith.mulf %137, %139 : vector<32x128xf32>
    %c0_78 = arith.constant 0 : index
    %c15 = arith.constant 15 : index
    %c0_79 = arith.constant 0 : index
    %c0_80 = arith.constant 0 : index
    %141 = vector.load %arg3[%c0_78, %c15, %c0_79, %c0_80] : memref<2x25x32x32xf32, #tpu.memory_space<vmem>>, vector<1x1x32x32xf32>
    %142 = vector.shape_cast %141 : vector<1x1x32x32xf32> to vector<32x32xf32>
    %cst_81 = arith.constant dense<0.000000e+00> : vector<32x128xf32>
    %143 = tpu.matmul %142, %140, %cst_81 {dimension_numbers = #tpu.dot_dimension_numbers<[1], [0], [0], [1], [0, 0, 1, 1], [], []>} : vector<32x32xf32>, vector<32x128xf32>, vector<32x128xf32> -> vector<32x128xf32>
    %144 = arith.addf %136, %143 : vector<32x128xf32>
    %c121_i32 = arith.constant 121 : i32
    %145 = tpu.dynamic_rotate %21 by %c121_i32 dim 1 : vector<32x128xf32>, i32 -> vector<32x128xf32>
    %146 = vector.extract_strided_slice %5 {offsets = [16, 0], sizes = [1, 128], strides = [1, 1]} : vector<25x128xf32> to vector<1x128xf32>
    %147 = vector.broadcast %146 : vector<1x128xf32> to vector<32x128xf32>
    %148 = arith.mulf %145, %147 : vector<32x128xf32>
    %c0_82 = arith.constant 0 : index
    %c16 = arith.constant 16 : index
    %c0_83 = arith.constant 0 : index
    %c0_84 = arith.constant 0 : index
    %149 = vector.load %arg3[%c0_82, %c16, %c0_83, %c0_84] : memref<2x25x32x32xf32, #tpu.memory_space<vmem>>, vector<1x1x32x32xf32>
    %150 = vector.shape_cast %149 : vector<1x1x32x32xf32> to vector<32x32xf32>
    %cst_85 = arith.constant dense<0.000000e+00> : vector<32x128xf32>
    %151 = tpu.matmul %150, %148, %cst_85 {dimension_numbers = #tpu.dot_dimension_numbers<[1], [0], [0], [1], [0, 0, 1, 1], [], []>} : vector<32x32xf32>, vector<32x128xf32>, vector<32x128xf32> -> vector<32x128xf32>
    %152 = arith.addf %144, %151 : vector<32x128xf32>
    %c120_i32 = arith.constant 120 : i32
    %153 = tpu.dynamic_rotate %21 by %c120_i32 dim 1 : vector<32x128xf32>, i32 -> vector<32x128xf32>
    %154 = vector.extract_strided_slice %5 {offsets = [17, 0], sizes = [1, 128], strides = [1, 1]} : vector<25x128xf32> to vector<1x128xf32>
    %155 = vector.broadcast %154 : vector<1x128xf32> to vector<32x128xf32>
    %156 = arith.mulf %153, %155 : vector<32x128xf32>
    %c0_86 = arith.constant 0 : index
    %c17 = arith.constant 17 : index
    %c0_87 = arith.constant 0 : index
    %c0_88 = arith.constant 0 : index
    %157 = vector.load %arg3[%c0_86, %c17, %c0_87, %c0_88] : memref<2x25x32x32xf32, #tpu.memory_space<vmem>>, vector<1x1x32x32xf32>
    %158 = vector.shape_cast %157 : vector<1x1x32x32xf32> to vector<32x32xf32>
    %cst_89 = arith.constant dense<0.000000e+00> : vector<32x128xf32>
    %159 = tpu.matmul %158, %156, %cst_89 {dimension_numbers = #tpu.dot_dimension_numbers<[1], [0], [0], [1], [0, 0, 1, 1], [], []>} : vector<32x32xf32>, vector<32x128xf32>, vector<32x128xf32> -> vector<32x128xf32>
    %160 = arith.addf %152, %159 : vector<32x128xf32>
    %c119_i32 = arith.constant 119 : i32
    %161 = tpu.dynamic_rotate %21 by %c119_i32 dim 1 : vector<32x128xf32>, i32 -> vector<32x128xf32>
    %162 = vector.extract_strided_slice %5 {offsets = [18, 0], sizes = [1, 128], strides = [1, 1]} : vector<25x128xf32> to vector<1x128xf32>
    %163 = vector.broadcast %162 : vector<1x128xf32> to vector<32x128xf32>
    %164 = arith.mulf %161, %163 : vector<32x128xf32>
    %c0_90 = arith.constant 0 : index
    %c18 = arith.constant 18 : index
    %c0_91 = arith.constant 0 : index
    %c0_92 = arith.constant 0 : index
    %165 = vector.load %arg3[%c0_90, %c18, %c0_91, %c0_92] : memref<2x25x32x32xf32, #tpu.memory_space<vmem>>, vector<1x1x32x32xf32>
    %166 = vector.shape_cast %165 : vector<1x1x32x32xf32> to vector<32x32xf32>
    %cst_93 = arith.constant dense<0.000000e+00> : vector<32x128xf32>
    %167 = tpu.matmul %166, %164, %cst_93 {dimension_numbers = #tpu.dot_dimension_numbers<[1], [0], [0], [1], [0, 0, 1, 1], [], []>} : vector<32x32xf32>, vector<32x128xf32>, vector<32x128xf32> -> vector<32x128xf32>
    %168 = arith.addf %160, %167 : vector<32x128xf32>
    %c118_i32 = arith.constant 118 : i32
    %169 = tpu.dynamic_rotate %21 by %c118_i32 dim 1 : vector<32x128xf32>, i32 -> vector<32x128xf32>
    %170 = vector.extract_strided_slice %5 {offsets = [19, 0], sizes = [1, 128], strides = [1, 1]} : vector<25x128xf32> to vector<1x128xf32>
    %171 = vector.broadcast %170 : vector<1x128xf32> to vector<32x128xf32>
    %172 = arith.mulf %169, %171 : vector<32x128xf32>
    %c0_94 = arith.constant 0 : index
    %c19 = arith.constant 19 : index
    %c0_95 = arith.constant 0 : index
    %c0_96 = arith.constant 0 : index
    %173 = vector.load %arg3[%c0_94, %c19, %c0_95, %c0_96] : memref<2x25x32x32xf32, #tpu.memory_space<vmem>>, vector<1x1x32x32xf32>
    %174 = vector.shape_cast %173 : vector<1x1x32x32xf32> to vector<32x32xf32>
    %cst_97 = arith.constant dense<0.000000e+00> : vector<32x128xf32>
    %175 = tpu.matmul %174, %172, %cst_97 {dimension_numbers = #tpu.dot_dimension_numbers<[1], [0], [0], [1], [0, 0, 1, 1], [], []>} : vector<32x32xf32>, vector<32x128xf32>, vector<32x128xf32> -> vector<32x128xf32>
    %176 = arith.addf %168, %175 : vector<32x128xf32>
    %c114_i32 = arith.constant 114 : i32
    %177 = tpu.dynamic_rotate %21 by %c114_i32 dim 1 : vector<32x128xf32>, i32 -> vector<32x128xf32>
    %178 = vector.extract_strided_slice %5 {offsets = [20, 0], sizes = [1, 128], strides = [1, 1]} : vector<25x128xf32> to vector<1x128xf32>
    %179 = vector.broadcast %178 : vector<1x128xf32> to vector<32x128xf32>
    %180 = arith.mulf %177, %179 : vector<32x128xf32>
    %c0_98 = arith.constant 0 : index
    %c20 = arith.constant 20 : index
    %c0_99 = arith.constant 0 : index
    %c0_100 = arith.constant 0 : index
    %181 = vector.load %arg3[%c0_98, %c20, %c0_99, %c0_100] : memref<2x25x32x32xf32, #tpu.memory_space<vmem>>, vector<1x1x32x32xf32>
    %182 = vector.shape_cast %181 : vector<1x1x32x32xf32> to vector<32x32xf32>
    %cst_101 = arith.constant dense<0.000000e+00> : vector<32x128xf32>
    %183 = tpu.matmul %182, %180, %cst_101 {dimension_numbers = #tpu.dot_dimension_numbers<[1], [0], [0], [1], [0, 0, 1, 1], [], []>} : vector<32x32xf32>, vector<32x128xf32>, vector<32x128xf32> -> vector<32x128xf32>
    %184 = arith.addf %176, %183 : vector<32x128xf32>
    %c113_i32 = arith.constant 113 : i32
    %185 = tpu.dynamic_rotate %21 by %c113_i32 dim 1 : vector<32x128xf32>, i32 -> vector<32x128xf32>
    %186 = vector.extract_strided_slice %5 {offsets = [21, 0], sizes = [1, 128], strides = [1, 1]} : vector<25x128xf32> to vector<1x128xf32>
    %187 = vector.broadcast %186 : vector<1x128xf32> to vector<32x128xf32>
    %188 = arith.mulf %185, %187 : vector<32x128xf32>
    %c0_102 = arith.constant 0 : index
    %c21 = arith.constant 21 : index
    %c0_103 = arith.constant 0 : index
    %c0_104 = arith.constant 0 : index
    %189 = vector.load %arg3[%c0_102, %c21, %c0_103, %c0_104] : memref<2x25x32x32xf32, #tpu.memory_space<vmem>>, vector<1x1x32x32xf32>
    %190 = vector.shape_cast %189 : vector<1x1x32x32xf32> to vector<32x32xf32>
    %cst_105 = arith.constant dense<0.000000e+00> : vector<32x128xf32>
    %191 = tpu.matmul %190, %188, %cst_105 {dimension_numbers = #tpu.dot_dimension_numbers<[1], [0], [0], [1], [0, 0, 1, 1], [], []>} : vector<32x32xf32>, vector<32x128xf32>, vector<32x128xf32> -> vector<32x128xf32>
    %192 = arith.addf %184, %191 : vector<32x128xf32>
    %c112_i32 = arith.constant 112 : i32
    %193 = tpu.dynamic_rotate %21 by %c112_i32 dim 1 : vector<32x128xf32>, i32 -> vector<32x128xf32>
    %194 = vector.extract_strided_slice %5 {offsets = [22, 0], sizes = [1, 128], strides = [1, 1]} : vector<25x128xf32> to vector<1x128xf32>
    %195 = vector.broadcast %194 : vector<1x128xf32> to vector<32x128xf32>
    %196 = arith.mulf %193, %195 : vector<32x128xf32>
    %c0_106 = arith.constant 0 : index
    %c22 = arith.constant 22 : index
    %c0_107 = arith.constant 0 : index
    %c0_108 = arith.constant 0 : index
    %197 = vector.load %arg3[%c0_106, %c22, %c0_107, %c0_108] : memref<2x25x32x32xf32, #tpu.memory_space<vmem>>, vector<1x1x32x32xf32>
    %198 = vector.shape_cast %197 : vector<1x1x32x32xf32> to vector<32x32xf32>
    %cst_109 = arith.constant dense<0.000000e+00> : vector<32x128xf32>
    %199 = tpu.matmul %198, %196, %cst_109 {dimension_numbers = #tpu.dot_dimension_numbers<[1], [0], [0], [1], [0, 0, 1, 1], [], []>} : vector<32x32xf32>, vector<32x128xf32>, vector<32x128xf32> -> vector<32x128xf32>
    %200 = arith.addf %192, %199 : vector<32x128xf32>
    %c111_i32 = arith.constant 111 : i32
    %201 = tpu.dynamic_rotate %21 by %c111_i32 dim 1 : vector<32x128xf32>, i32 -> vector<32x128xf32>
    %202 = vector.extract_strided_slice %5 {offsets = [23, 0], sizes = [1, 128], strides = [1, 1]} : vector<25x128xf32> to vector<1x128xf32>
    %203 = vector.broadcast %202 : vector<1x128xf32> to vector<32x128xf32>
    %204 = arith.mulf %201, %203 : vector<32x128xf32>
    %c0_110 = arith.constant 0 : index
    %c23 = arith.constant 23 : index
    %c0_111 = arith.constant 0 : index
    %c0_112 = arith.constant 0 : index
    %205 = vector.load %arg3[%c0_110, %c23, %c0_111, %c0_112] : memref<2x25x32x32xf32, #tpu.memory_space<vmem>>, vector<1x1x32x32xf32>
    %206 = vector.shape_cast %205 : vector<1x1x32x32xf32> to vector<32x32xf32>
    %cst_113 = arith.constant dense<0.000000e+00> : vector<32x128xf32>
    %207 = tpu.matmul %206, %204, %cst_113 {dimension_numbers = #tpu.dot_dimension_numbers<[1], [0], [0], [1], [0, 0, 1, 1], [], []>} : vector<32x32xf32>, vector<32x128xf32>, vector<32x128xf32> -> vector<32x128xf32>
    %208 = arith.addf %200, %207 : vector<32x128xf32>
    %c110_i32 = arith.constant 110 : i32
    %209 = tpu.dynamic_rotate %21 by %c110_i32 dim 1 : vector<32x128xf32>, i32 -> vector<32x128xf32>
    %210 = vector.extract_strided_slice %5 {offsets = [24, 0], sizes = [1, 128], strides = [1, 1]} : vector<25x128xf32> to vector<1x128xf32>
    %211 = vector.broadcast %210 : vector<1x128xf32> to vector<32x128xf32>
    %212 = arith.mulf %209, %211 : vector<32x128xf32>
    %c0_114 = arith.constant 0 : index
    %c24 = arith.constant 24 : index
    %c0_115 = arith.constant 0 : index
    %c0_116 = arith.constant 0 : index
    %213 = vector.load %arg3[%c0_114, %c24, %c0_115, %c0_116] : memref<2x25x32x32xf32, #tpu.memory_space<vmem>>, vector<1x1x32x32xf32>
    %214 = vector.shape_cast %213 : vector<1x1x32x32xf32> to vector<32x32xf32>
    %cst_117 = arith.constant dense<0.000000e+00> : vector<32x128xf32>
    %215 = tpu.matmul %214, %212, %cst_117 {dimension_numbers = #tpu.dot_dimension_numbers<[1], [0], [0], [1], [0, 0, 1, 1], [], []>} : vector<32x32xf32>, vector<32x128xf32>, vector<32x128xf32> -> vector<32x128xf32>
    %216 = arith.addf %208, %215 : vector<32x128xf32>
    %c0_118 = arith.constant 0 : index
    %c0_119 = arith.constant 0 : index
    %c0_120 = arith.constant 0 : index
    %217 = vector.load %arg4[%c0_118, %c0_119, %c0_120] : memref<2x32x1xf32, #tpu.memory_space<vmem>>, vector<1x32x1xf32>
    %218 = vector.shape_cast %217 : vector<1x32x1xf32> to vector<32x1xf32>
    %219 = vector.broadcast %218 : vector<32x1xf32> to vector<32x128xf32>
    %220 = arith.addf %216, %219 : vector<32x128xf32>
    %cst_121 = arith.constant 5.000000e-01 : f32
    %221 = vector.broadcast %cst_121 : f32 to vector<32x128xf32>
    %222 = arith.mulf %221, %220 : vector<32x128xf32>
    %223 = math.tanh %222 : vector<32x128xf32>
    %cst_122 = arith.constant 1.000000e+00 : f32
    %224 = vector.broadcast %cst_122 : f32 to vector<32x128xf32>
    %225 = arith.addf %223, %224 : vector<32x128xf32>
    %cst_123 = arith.constant 5.000000e-01 : f32
    %226 = vector.broadcast %cst_123 : f32 to vector<32x128xf32>
    %227 = arith.mulf %226, %225 : vector<32x128xf32>
    %228 = arith.mulf %220, %227 : vector<32x128xf32>
    %c0_124 = arith.constant 0 : index
    %c0_125 = arith.constant 0 : index
    %c0_126 = arith.constant 0 : index
    %229 = vector.load %arg5[%c0_124, %c0_125, %c0_126] : memref<2x32x32xf32, #tpu.memory_space<vmem>>, vector<1x32x32xf32>
    %230 = vector.shape_cast %229 : vector<1x32x32xf32> to vector<32x32xf32>
    %cst_127 = arith.constant dense<0.000000e+00> : vector<32x128xf32>
    %231 = tpu.matmul %230, %228, %cst_127 {dimension_numbers = #tpu.dot_dimension_numbers<[1], [0], [0], [1], [0, 0, 1, 1], [], []>} : vector<32x32xf32>, vector<32x128xf32>, vector<32x128xf32> -> vector<32x128xf32>
    %232 = arith.addf %6, %231 : vector<32x128xf32>
    %c1_128 = arith.constant 1 : index
    %c0_129 = arith.constant 0 : index
    %c0_130 = arith.constant 0 : index
    %233 = vector.load %arg1[%c1_128, %c0_129, %c0_130] : memref<2x32x32xf32, #tpu.memory_space<vmem>>, vector<1x32x32xf32>
    %234 = vector.shape_cast %233 : vector<1x32x32xf32> to vector<32x32xf32>
    %cst_131 = arith.constant dense<0.000000e+00> : vector<32x128xf32>
    %235 = tpu.matmul %234, %4, %cst_131 {dimension_numbers = #tpu.dot_dimension_numbers<[1], [0], [0], [1], [0, 0, 1, 1], [], []>} : vector<32x32xf32>, vector<32x128xf32>, vector<32x128xf32> -> vector<32x128xf32>
    %c1_132 = arith.constant 1 : index
    %c0_133 = arith.constant 0 : index
    %c0_134 = arith.constant 0 : index
    %236 = vector.load %arg2[%c1_132, %c0_133, %c0_134] : memref<2x32x1xf32, #tpu.memory_space<vmem>>, vector<1x32x1xf32>
    %237 = vector.shape_cast %236 : vector<1x32x1xf32> to vector<32x1xf32>
    %238 = vector.broadcast %237 : vector<32x1xf32> to vector<32x128xf32>
    %239 = arith.addf %235, %238 : vector<32x128xf32>
    %cst_135 = arith.constant 5.000000e-01 : f32
    %240 = vector.broadcast %cst_135 : f32 to vector<32x128xf32>
    %241 = arith.mulf %240, %239 : vector<32x128xf32>
    %242 = math.tanh %241 : vector<32x128xf32>
    %cst_136 = arith.constant 1.000000e+00 : f32
    %243 = vector.broadcast %cst_136 : f32 to vector<32x128xf32>
    %244 = arith.addf %242, %243 : vector<32x128xf32>
    %cst_137 = arith.constant 5.000000e-01 : f32
    %245 = vector.broadcast %cst_137 : f32 to vector<32x128xf32>
    %246 = arith.mulf %245, %244 : vector<32x128xf32>
    %247 = arith.mulf %239, %246 : vector<32x128xf32>
    %c1_138 = arith.constant 1 : index
    %c12_139 = arith.constant 12 : index
    %c0_140 = arith.constant 0 : index
    %c0_141 = arith.constant 0 : index
    %248 = vector.load %arg3[%c1_138, %c12_139, %c0_140, %c0_141] : memref<2x25x32x32xf32, #tpu.memory_space<vmem>>, vector<1x1x32x32xf32>
    %249 = vector.shape_cast %248 : vector<1x1x32x32xf32> to vector<32x32xf32>
    %cst_142 = arith.constant dense<0.000000e+00> : vector<32x128xf32>
    %250 = tpu.matmul %249, %247, %cst_142 {dimension_numbers = #tpu.dot_dimension_numbers<[1], [0], [0], [1], [0, 0, 1, 1], [], []>} : vector<32x32xf32>, vector<32x128xf32>, vector<32x128xf32> -> vector<32x128xf32>
    %c18_i32_143 = arith.constant 18 : i32
    %251 = tpu.dynamic_rotate %247 by %c18_i32_143 dim 1 : vector<32x128xf32>, i32 -> vector<32x128xf32>
    %252 = vector.extract_strided_slice %5 {offsets = [0, 0], sizes = [1, 128], strides = [1, 1]} : vector<25x128xf32> to vector<1x128xf32>
    %253 = vector.broadcast %252 : vector<1x128xf32> to vector<32x128xf32>
    %254 = arith.mulf %251, %253 : vector<32x128xf32>
    %c1_144 = arith.constant 1 : index
    %c0_145 = arith.constant 0 : index
    %c0_146 = arith.constant 0 : index
    %c0_147 = arith.constant 0 : index
    %255 = vector.load %arg3[%c1_144, %c0_145, %c0_146, %c0_147] : memref<2x25x32x32xf32, #tpu.memory_space<vmem>>, vector<1x1x32x32xf32>
    %256 = vector.shape_cast %255 : vector<1x1x32x32xf32> to vector<32x32xf32>
    %cst_148 = arith.constant dense<0.000000e+00> : vector<32x128xf32>
    %257 = tpu.matmul %256, %254, %cst_148 {dimension_numbers = #tpu.dot_dimension_numbers<[1], [0], [0], [1], [0, 0, 1, 1], [], []>} : vector<32x32xf32>, vector<32x128xf32>, vector<32x128xf32> -> vector<32x128xf32>
    %258 = arith.addf %250, %257 : vector<32x128xf32>
    %c17_i32_149 = arith.constant 17 : i32
    %259 = tpu.dynamic_rotate %247 by %c17_i32_149 dim 1 : vector<32x128xf32>, i32 -> vector<32x128xf32>
    %260 = vector.extract_strided_slice %5 {offsets = [1, 0], sizes = [1, 128], strides = [1, 1]} : vector<25x128xf32> to vector<1x128xf32>
    %261 = vector.broadcast %260 : vector<1x128xf32> to vector<32x128xf32>
    %262 = arith.mulf %259, %261 : vector<32x128xf32>
    %c1_150 = arith.constant 1 : index
    %c1_151 = arith.constant 1 : index
    %c0_152 = arith.constant 0 : index
    %c0_153 = arith.constant 0 : index
    %263 = vector.load %arg3[%c1_150, %c1_151, %c0_152, %c0_153] : memref<2x25x32x32xf32, #tpu.memory_space<vmem>>, vector<1x1x32x32xf32>
    %264 = vector.shape_cast %263 : vector<1x1x32x32xf32> to vector<32x32xf32>
    %cst_154 = arith.constant dense<0.000000e+00> : vector<32x128xf32>
    %265 = tpu.matmul %264, %262, %cst_154 {dimension_numbers = #tpu.dot_dimension_numbers<[1], [0], [0], [1], [0, 0, 1, 1], [], []>} : vector<32x32xf32>, vector<32x128xf32>, vector<32x128xf32> -> vector<32x128xf32>
    %266 = arith.addf %258, %265 : vector<32x128xf32>
    %c16_i32_155 = arith.constant 16 : i32
    %267 = tpu.dynamic_rotate %247 by %c16_i32_155 dim 1 : vector<32x128xf32>, i32 -> vector<32x128xf32>
    %268 = vector.extract_strided_slice %5 {offsets = [2, 0], sizes = [1, 128], strides = [1, 1]} : vector<25x128xf32> to vector<1x128xf32>
    %269 = vector.broadcast %268 : vector<1x128xf32> to vector<32x128xf32>
    %270 = arith.mulf %267, %269 : vector<32x128xf32>
    %c1_156 = arith.constant 1 : index
    %c2_157 = arith.constant 2 : index
    %c0_158 = arith.constant 0 : index
    %c0_159 = arith.constant 0 : index
    %271 = vector.load %arg3[%c1_156, %c2_157, %c0_158, %c0_159] : memref<2x25x32x32xf32, #tpu.memory_space<vmem>>, vector<1x1x32x32xf32>
    %272 = vector.shape_cast %271 : vector<1x1x32x32xf32> to vector<32x32xf32>
    %cst_160 = arith.constant dense<0.000000e+00> : vector<32x128xf32>
    %273 = tpu.matmul %272, %270, %cst_160 {dimension_numbers = #tpu.dot_dimension_numbers<[1], [0], [0], [1], [0, 0, 1, 1], [], []>} : vector<32x32xf32>, vector<32x128xf32>, vector<32x128xf32> -> vector<32x128xf32>
    %274 = arith.addf %266, %273 : vector<32x128xf32>
    %c15_i32_161 = arith.constant 15 : i32
    %275 = tpu.dynamic_rotate %247 by %c15_i32_161 dim 1 : vector<32x128xf32>, i32 -> vector<32x128xf32>
    %276 = vector.extract_strided_slice %5 {offsets = [3, 0], sizes = [1, 128], strides = [1, 1]} : vector<25x128xf32> to vector<1x128xf32>
    %277 = vector.broadcast %276 : vector<1x128xf32> to vector<32x128xf32>
    %278 = arith.mulf %275, %277 : vector<32x128xf32>
    %c1_162 = arith.constant 1 : index
    %c3_163 = arith.constant 3 : index
    %c0_164 = arith.constant 0 : index
    %c0_165 = arith.constant 0 : index
    %279 = vector.load %arg3[%c1_162, %c3_163, %c0_164, %c0_165] : memref<2x25x32x32xf32, #tpu.memory_space<vmem>>, vector<1x1x32x32xf32>
    %280 = vector.shape_cast %279 : vector<1x1x32x32xf32> to vector<32x32xf32>
    %cst_166 = arith.constant dense<0.000000e+00> : vector<32x128xf32>
    %281 = tpu.matmul %280, %278, %cst_166 {dimension_numbers = #tpu.dot_dimension_numbers<[1], [0], [0], [1], [0, 0, 1, 1], [], []>} : vector<32x32xf32>, vector<32x128xf32>, vector<32x128xf32> -> vector<32x128xf32>
    %282 = arith.addf %274, %281 : vector<32x128xf32>
    %c14_i32_167 = arith.constant 14 : i32
    %283 = tpu.dynamic_rotate %247 by %c14_i32_167 dim 1 : vector<32x128xf32>, i32 -> vector<32x128xf32>
    %284 = vector.extract_strided_slice %5 {offsets = [4, 0], sizes = [1, 128], strides = [1, 1]} : vector<25x128xf32> to vector<1x128xf32>
    %285 = vector.broadcast %284 : vector<1x128xf32> to vector<32x128xf32>
    %286 = arith.mulf %283, %285 : vector<32x128xf32>
    %c1_168 = arith.constant 1 : index
    %c4_169 = arith.constant 4 : index
    %c0_170 = arith.constant 0 : index
    %c0_171 = arith.constant 0 : index
    %287 = vector.load %arg3[%c1_168, %c4_169, %c0_170, %c0_171] : memref<2x25x32x32xf32, #tpu.memory_space<vmem>>, vector<1x1x32x32xf32>
    %288 = vector.shape_cast %287 : vector<1x1x32x32xf32> to vector<32x32xf32>
    %cst_172 = arith.constant dense<0.000000e+00> : vector<32x128xf32>
    %289 = tpu.matmul %288, %286, %cst_172 {dimension_numbers = #tpu.dot_dimension_numbers<[1], [0], [0], [1], [0, 0, 1, 1], [], []>} : vector<32x32xf32>, vector<32x128xf32>, vector<32x128xf32> -> vector<32x128xf32>
    %290 = arith.addf %282, %289 : vector<32x128xf32>
    %c10_i32_173 = arith.constant 10 : i32
    %291 = tpu.dynamic_rotate %247 by %c10_i32_173 dim 1 : vector<32x128xf32>, i32 -> vector<32x128xf32>
    %292 = vector.extract_strided_slice %5 {offsets = [5, 0], sizes = [1, 128], strides = [1, 1]} : vector<25x128xf32> to vector<1x128xf32>
    %293 = vector.broadcast %292 : vector<1x128xf32> to vector<32x128xf32>
    %294 = arith.mulf %291, %293 : vector<32x128xf32>
    %c1_174 = arith.constant 1 : index
    %c5_175 = arith.constant 5 : index
    %c0_176 = arith.constant 0 : index
    %c0_177 = arith.constant 0 : index
    %295 = vector.load %arg3[%c1_174, %c5_175, %c0_176, %c0_177] : memref<2x25x32x32xf32, #tpu.memory_space<vmem>>, vector<1x1x32x32xf32>
    %296 = vector.shape_cast %295 : vector<1x1x32x32xf32> to vector<32x32xf32>
    %cst_178 = arith.constant dense<0.000000e+00> : vector<32x128xf32>
    %297 = tpu.matmul %296, %294, %cst_178 {dimension_numbers = #tpu.dot_dimension_numbers<[1], [0], [0], [1], [0, 0, 1, 1], [], []>} : vector<32x32xf32>, vector<32x128xf32>, vector<32x128xf32> -> vector<32x128xf32>
    %298 = arith.addf %290, %297 : vector<32x128xf32>
    %c9_i32_179 = arith.constant 9 : i32
    %299 = tpu.dynamic_rotate %247 by %c9_i32_179 dim 1 : vector<32x128xf32>, i32 -> vector<32x128xf32>
    %300 = vector.extract_strided_slice %5 {offsets = [6, 0], sizes = [1, 128], strides = [1, 1]} : vector<25x128xf32> to vector<1x128xf32>
    %301 = vector.broadcast %300 : vector<1x128xf32> to vector<32x128xf32>
    %302 = arith.mulf %299, %301 : vector<32x128xf32>
    %c1_180 = arith.constant 1 : index
    %c6_181 = arith.constant 6 : index
    %c0_182 = arith.constant 0 : index
    %c0_183 = arith.constant 0 : index
    %303 = vector.load %arg3[%c1_180, %c6_181, %c0_182, %c0_183] : memref<2x25x32x32xf32, #tpu.memory_space<vmem>>, vector<1x1x32x32xf32>
    %304 = vector.shape_cast %303 : vector<1x1x32x32xf32> to vector<32x32xf32>
    %cst_184 = arith.constant dense<0.000000e+00> : vector<32x128xf32>
    %305 = tpu.matmul %304, %302, %cst_184 {dimension_numbers = #tpu.dot_dimension_numbers<[1], [0], [0], [1], [0, 0, 1, 1], [], []>} : vector<32x32xf32>, vector<32x128xf32>, vector<32x128xf32> -> vector<32x128xf32>
    %306 = arith.addf %298, %305 : vector<32x128xf32>
    %c8_i32_185 = arith.constant 8 : i32
    %307 = tpu.dynamic_rotate %247 by %c8_i32_185 dim 1 : vector<32x128xf32>, i32 -> vector<32x128xf32>
    %308 = vector.extract_strided_slice %5 {offsets = [7, 0], sizes = [1, 128], strides = [1, 1]} : vector<25x128xf32> to vector<1x128xf32>
    %309 = vector.broadcast %308 : vector<1x128xf32> to vector<32x128xf32>
    %310 = arith.mulf %307, %309 : vector<32x128xf32>
    %c1_186 = arith.constant 1 : index
    %c7_187 = arith.constant 7 : index
    %c0_188 = arith.constant 0 : index
    %c0_189 = arith.constant 0 : index
    %311 = vector.load %arg3[%c1_186, %c7_187, %c0_188, %c0_189] : memref<2x25x32x32xf32, #tpu.memory_space<vmem>>, vector<1x1x32x32xf32>
    %312 = vector.shape_cast %311 : vector<1x1x32x32xf32> to vector<32x32xf32>
    %cst_190 = arith.constant dense<0.000000e+00> : vector<32x128xf32>
    %313 = tpu.matmul %312, %310, %cst_190 {dimension_numbers = #tpu.dot_dimension_numbers<[1], [0], [0], [1], [0, 0, 1, 1], [], []>} : vector<32x32xf32>, vector<32x128xf32>, vector<32x128xf32> -> vector<32x128xf32>
    %314 = arith.addf %306, %313 : vector<32x128xf32>
    %c7_i32_191 = arith.constant 7 : i32
    %315 = tpu.dynamic_rotate %247 by %c7_i32_191 dim 1 : vector<32x128xf32>, i32 -> vector<32x128xf32>
    %316 = vector.extract_strided_slice %5 {offsets = [8, 0], sizes = [1, 128], strides = [1, 1]} : vector<25x128xf32> to vector<1x128xf32>
    %317 = vector.broadcast %316 : vector<1x128xf32> to vector<32x128xf32>
    %318 = arith.mulf %315, %317 : vector<32x128xf32>
    %c1_192 = arith.constant 1 : index
    %c8_193 = arith.constant 8 : index
    %c0_194 = arith.constant 0 : index
    %c0_195 = arith.constant 0 : index
    %319 = vector.load %arg3[%c1_192, %c8_193, %c0_194, %c0_195] : memref<2x25x32x32xf32, #tpu.memory_space<vmem>>, vector<1x1x32x32xf32>
    %320 = vector.shape_cast %319 : vector<1x1x32x32xf32> to vector<32x32xf32>
    %cst_196 = arith.constant dense<0.000000e+00> : vector<32x128xf32>
    %321 = tpu.matmul %320, %318, %cst_196 {dimension_numbers = #tpu.dot_dimension_numbers<[1], [0], [0], [1], [0, 0, 1, 1], [], []>} : vector<32x32xf32>, vector<32x128xf32>, vector<32x128xf32> -> vector<32x128xf32>
    %322 = arith.addf %314, %321 : vector<32x128xf32>
    %c6_i32_197 = arith.constant 6 : i32
    %323 = tpu.dynamic_rotate %247 by %c6_i32_197 dim 1 : vector<32x128xf32>, i32 -> vector<32x128xf32>
    %324 = vector.extract_strided_slice %5 {offsets = [9, 0], sizes = [1, 128], strides = [1, 1]} : vector<25x128xf32> to vector<1x128xf32>
    %325 = vector.broadcast %324 : vector<1x128xf32> to vector<32x128xf32>
    %326 = arith.mulf %323, %325 : vector<32x128xf32>
    %c1_198 = arith.constant 1 : index
    %c9_199 = arith.constant 9 : index
    %c0_200 = arith.constant 0 : index
    %c0_201 = arith.constant 0 : index
    %327 = vector.load %arg3[%c1_198, %c9_199, %c0_200, %c0_201] : memref<2x25x32x32xf32, #tpu.memory_space<vmem>>, vector<1x1x32x32xf32>
    %328 = vector.shape_cast %327 : vector<1x1x32x32xf32> to vector<32x32xf32>
    %cst_202 = arith.constant dense<0.000000e+00> : vector<32x128xf32>
    %329 = tpu.matmul %328, %326, %cst_202 {dimension_numbers = #tpu.dot_dimension_numbers<[1], [0], [0], [1], [0, 0, 1, 1], [], []>} : vector<32x32xf32>, vector<32x128xf32>, vector<32x128xf32> -> vector<32x128xf32>
    %330 = arith.addf %322, %329 : vector<32x128xf32>
    %c2_i32_203 = arith.constant 2 : i32
    %331 = tpu.dynamic_rotate %247 by %c2_i32_203 dim 1 : vector<32x128xf32>, i32 -> vector<32x128xf32>
    %332 = vector.extract_strided_slice %5 {offsets = [10, 0], sizes = [1, 128], strides = [1, 1]} : vector<25x128xf32> to vector<1x128xf32>
    %333 = vector.broadcast %332 : vector<1x128xf32> to vector<32x128xf32>
    %334 = arith.mulf %331, %333 : vector<32x128xf32>
    %c1_204 = arith.constant 1 : index
    %c10_205 = arith.constant 10 : index
    %c0_206 = arith.constant 0 : index
    %c0_207 = arith.constant 0 : index
    %335 = vector.load %arg3[%c1_204, %c10_205, %c0_206, %c0_207] : memref<2x25x32x32xf32, #tpu.memory_space<vmem>>, vector<1x1x32x32xf32>
    %336 = vector.shape_cast %335 : vector<1x1x32x32xf32> to vector<32x32xf32>
    %cst_208 = arith.constant dense<0.000000e+00> : vector<32x128xf32>
    %337 = tpu.matmul %336, %334, %cst_208 {dimension_numbers = #tpu.dot_dimension_numbers<[1], [0], [0], [1], [0, 0, 1, 1], [], []>} : vector<32x32xf32>, vector<32x128xf32>, vector<32x128xf32> -> vector<32x128xf32>
    %338 = arith.addf %330, %337 : vector<32x128xf32>
    %c1_i32_209 = arith.constant 1 : i32
    %339 = tpu.dynamic_rotate %247 by %c1_i32_209 dim 1 : vector<32x128xf32>, i32 -> vector<32x128xf32>
    %340 = vector.extract_strided_slice %5 {offsets = [11, 0], sizes = [1, 128], strides = [1, 1]} : vector<25x128xf32> to vector<1x128xf32>
    %341 = vector.broadcast %340 : vector<1x128xf32> to vector<32x128xf32>
    %342 = arith.mulf %339, %341 : vector<32x128xf32>
    %c1_210 = arith.constant 1 : index
    %c11_211 = arith.constant 11 : index
    %c0_212 = arith.constant 0 : index
    %c0_213 = arith.constant 0 : index
    %343 = vector.load %arg3[%c1_210, %c11_211, %c0_212, %c0_213] : memref<2x25x32x32xf32, #tpu.memory_space<vmem>>, vector<1x1x32x32xf32>
    %344 = vector.shape_cast %343 : vector<1x1x32x32xf32> to vector<32x32xf32>
    %cst_214 = arith.constant dense<0.000000e+00> : vector<32x128xf32>
    %345 = tpu.matmul %344, %342, %cst_214 {dimension_numbers = #tpu.dot_dimension_numbers<[1], [0], [0], [1], [0, 0, 1, 1], [], []>} : vector<32x32xf32>, vector<32x128xf32>, vector<32x128xf32> -> vector<32x128xf32>
    %346 = arith.addf %338, %345 : vector<32x128xf32>
    %c127_i32_215 = arith.constant 127 : i32
    %347 = tpu.dynamic_rotate %247 by %c127_i32_215 dim 1 : vector<32x128xf32>, i32 -> vector<32x128xf32>
    %348 = vector.extract_strided_slice %5 {offsets = [13, 0], sizes = [1, 128], strides = [1, 1]} : vector<25x128xf32> to vector<1x128xf32>
    %349 = vector.broadcast %348 : vector<1x128xf32> to vector<32x128xf32>
    %350 = arith.mulf %347, %349 : vector<32x128xf32>
    %c1_216 = arith.constant 1 : index
    %c13_217 = arith.constant 13 : index
    %c0_218 = arith.constant 0 : index
    %c0_219 = arith.constant 0 : index
    %351 = vector.load %arg3[%c1_216, %c13_217, %c0_218, %c0_219] : memref<2x25x32x32xf32, #tpu.memory_space<vmem>>, vector<1x1x32x32xf32>
    %352 = vector.shape_cast %351 : vector<1x1x32x32xf32> to vector<32x32xf32>
    %cst_220 = arith.constant dense<0.000000e+00> : vector<32x128xf32>
    %353 = tpu.matmul %352, %350, %cst_220 {dimension_numbers = #tpu.dot_dimension_numbers<[1], [0], [0], [1], [0, 0, 1, 1], [], []>} : vector<32x32xf32>, vector<32x128xf32>, vector<32x128xf32> -> vector<32x128xf32>
    %354 = arith.addf %346, %353 : vector<32x128xf32>
    %c126_i32_221 = arith.constant 126 : i32
    %355 = tpu.dynamic_rotate %247 by %c126_i32_221 dim 1 : vector<32x128xf32>, i32 -> vector<32x128xf32>
    %356 = vector.extract_strided_slice %5 {offsets = [14, 0], sizes = [1, 128], strides = [1, 1]} : vector<25x128xf32> to vector<1x128xf32>
    %357 = vector.broadcast %356 : vector<1x128xf32> to vector<32x128xf32>
    %358 = arith.mulf %355, %357 : vector<32x128xf32>
    %c1_222 = arith.constant 1 : index
    %c14_223 = arith.constant 14 : index
    %c0_224 = arith.constant 0 : index
    %c0_225 = arith.constant 0 : index
    %359 = vector.load %arg3[%c1_222, %c14_223, %c0_224, %c0_225] : memref<2x25x32x32xf32, #tpu.memory_space<vmem>>, vector<1x1x32x32xf32>
    %360 = vector.shape_cast %359 : vector<1x1x32x32xf32> to vector<32x32xf32>
    %cst_226 = arith.constant dense<0.000000e+00> : vector<32x128xf32>
    %361 = tpu.matmul %360, %358, %cst_226 {dimension_numbers = #tpu.dot_dimension_numbers<[1], [0], [0], [1], [0, 0, 1, 1], [], []>} : vector<32x32xf32>, vector<32x128xf32>, vector<32x128xf32> -> vector<32x128xf32>
    %362 = arith.addf %354, %361 : vector<32x128xf32>
    %c122_i32_227 = arith.constant 122 : i32
    %363 = tpu.dynamic_rotate %247 by %c122_i32_227 dim 1 : vector<32x128xf32>, i32 -> vector<32x128xf32>
    %364 = vector.extract_strided_slice %5 {offsets = [15, 0], sizes = [1, 128], strides = [1, 1]} : vector<25x128xf32> to vector<1x128xf32>
    %365 = vector.broadcast %364 : vector<1x128xf32> to vector<32x128xf32>
    %366 = arith.mulf %363, %365 : vector<32x128xf32>
    %c1_228 = arith.constant 1 : index
    %c15_229 = arith.constant 15 : index
    %c0_230 = arith.constant 0 : index
    %c0_231 = arith.constant 0 : index
    %367 = vector.load %arg3[%c1_228, %c15_229, %c0_230, %c0_231] : memref<2x25x32x32xf32, #tpu.memory_space<vmem>>, vector<1x1x32x32xf32>
    %368 = vector.shape_cast %367 : vector<1x1x32x32xf32> to vector<32x32xf32>
    %cst_232 = arith.constant dense<0.000000e+00> : vector<32x128xf32>
    %369 = tpu.matmul %368, %366, %cst_232 {dimension_numbers = #tpu.dot_dimension_numbers<[1], [0], [0], [1], [0, 0, 1, 1], [], []>} : vector<32x32xf32>, vector<32x128xf32>, vector<32x128xf32> -> vector<32x128xf32>
    %370 = arith.addf %362, %369 : vector<32x128xf32>
    %c121_i32_233 = arith.constant 121 : i32
    %371 = tpu.dynamic_rotate %247 by %c121_i32_233 dim 1 : vector<32x128xf32>, i32 -> vector<32x128xf32>
    %372 = vector.extract_strided_slice %5 {offsets = [16, 0], sizes = [1, 128], strides = [1, 1]} : vector<25x128xf32> to vector<1x128xf32>
    %373 = vector.broadcast %372 : vector<1x128xf32> to vector<32x128xf32>
    %374 = arith.mulf %371, %373 : vector<32x128xf32>
    %c1_234 = arith.constant 1 : index
    %c16_235 = arith.constant 16 : index
    %c0_236 = arith.constant 0 : index
    %c0_237 = arith.constant 0 : index
    %375 = vector.load %arg3[%c1_234, %c16_235, %c0_236, %c0_237] : memref<2x25x32x32xf32, #tpu.memory_space<vmem>>, vector<1x1x32x32xf32>
    %376 = vector.shape_cast %375 : vector<1x1x32x32xf32> to vector<32x32xf32>
    %cst_238 = arith.constant dense<0.000000e+00> : vector<32x128xf32>
    %377 = tpu.matmul %376, %374, %cst_238 {dimension_numbers = #tpu.dot_dimension_numbers<[1], [0], [0], [1], [0, 0, 1, 1], [], []>} : vector<32x32xf32>, vector<32x128xf32>, vector<32x128xf32> -> vector<32x128xf32>
    %378 = arith.addf %370, %377 : vector<32x128xf32>
    %c120_i32_239 = arith.constant 120 : i32
    %379 = tpu.dynamic_rotate %247 by %c120_i32_239 dim 1 : vector<32x128xf32>, i32 -> vector<32x128xf32>
    %380 = vector.extract_strided_slice %5 {offsets = [17, 0], sizes = [1, 128], strides = [1, 1]} : vector<25x128xf32> to vector<1x128xf32>
    %381 = vector.broadcast %380 : vector<1x128xf32> to vector<32x128xf32>
    %382 = arith.mulf %379, %381 : vector<32x128xf32>
    %c1_240 = arith.constant 1 : index
    %c17_241 = arith.constant 17 : index
    %c0_242 = arith.constant 0 : index
    %c0_243 = arith.constant 0 : index
    %383 = vector.load %arg3[%c1_240, %c17_241, %c0_242, %c0_243] : memref<2x25x32x32xf32, #tpu.memory_space<vmem>>, vector<1x1x32x32xf32>
    %384 = vector.shape_cast %383 : vector<1x1x32x32xf32> to vector<32x32xf32>
    %cst_244 = arith.constant dense<0.000000e+00> : vector<32x128xf32>
    %385 = tpu.matmul %384, %382, %cst_244 {dimension_numbers = #tpu.dot_dimension_numbers<[1], [0], [0], [1], [0, 0, 1, 1], [], []>} : vector<32x32xf32>, vector<32x128xf32>, vector<32x128xf32> -> vector<32x128xf32>
    %386 = arith.addf %378, %385 : vector<32x128xf32>
    %c119_i32_245 = arith.constant 119 : i32
    %387 = tpu.dynamic_rotate %247 by %c119_i32_245 dim 1 : vector<32x128xf32>, i32 -> vector<32x128xf32>
    %388 = vector.extract_strided_slice %5 {offsets = [18, 0], sizes = [1, 128], strides = [1, 1]} : vector<25x128xf32> to vector<1x128xf32>
    %389 = vector.broadcast %388 : vector<1x128xf32> to vector<32x128xf32>
    %390 = arith.mulf %387, %389 : vector<32x128xf32>
    %c1_246 = arith.constant 1 : index
    %c18_247 = arith.constant 18 : index
    %c0_248 = arith.constant 0 : index
    %c0_249 = arith.constant 0 : index
    %391 = vector.load %arg3[%c1_246, %c18_247, %c0_248, %c0_249] : memref<2x25x32x32xf32, #tpu.memory_space<vmem>>, vector<1x1x32x32xf32>
    %392 = vector.shape_cast %391 : vector<1x1x32x32xf32> to vector<32x32xf32>
    %cst_250 = arith.constant dense<0.000000e+00> : vector<32x128xf32>
    %393 = tpu.matmul %392, %390, %cst_250 {dimension_numbers = #tpu.dot_dimension_numbers<[1], [0], [0], [1], [0, 0, 1, 1], [], []>} : vector<32x32xf32>, vector<32x128xf32>, vector<32x128xf32> -> vector<32x128xf32>
    %394 = arith.addf %386, %393 : vector<32x128xf32>
    %c118_i32_251 = arith.constant 118 : i32
    %395 = tpu.dynamic_rotate %247 by %c118_i32_251 dim 1 : vector<32x128xf32>, i32 -> vector<32x128xf32>
    %396 = vector.extract_strided_slice %5 {offsets = [19, 0], sizes = [1, 128], strides = [1, 1]} : vector<25x128xf32> to vector<1x128xf32>
    %397 = vector.broadcast %396 : vector<1x128xf32> to vector<32x128xf32>
    %398 = arith.mulf %395, %397 : vector<32x128xf32>
    %c1_252 = arith.constant 1 : index
    %c19_253 = arith.constant 19 : index
    %c0_254 = arith.constant 0 : index
    %c0_255 = arith.constant 0 : index
    %399 = vector.load %arg3[%c1_252, %c19_253, %c0_254, %c0_255] : memref<2x25x32x32xf32, #tpu.memory_space<vmem>>, vector<1x1x32x32xf32>
    %400 = vector.shape_cast %399 : vector<1x1x32x32xf32> to vector<32x32xf32>
    %cst_256 = arith.constant dense<0.000000e+00> : vector<32x128xf32>
    %401 = tpu.matmul %400, %398, %cst_256 {dimension_numbers = #tpu.dot_dimension_numbers<[1], [0], [0], [1], [0, 0, 1, 1], [], []>} : vector<32x32xf32>, vector<32x128xf32>, vector<32x128xf32> -> vector<32x128xf32>
    %402 = arith.addf %394, %401 : vector<32x128xf32>
    %c114_i32_257 = arith.constant 114 : i32
    %403 = tpu.dynamic_rotate %247 by %c114_i32_257 dim 1 : vector<32x128xf32>, i32 -> vector<32x128xf32>
    %404 = vector.extract_strided_slice %5 {offsets = [20, 0], sizes = [1, 128], strides = [1, 1]} : vector<25x128xf32> to vector<1x128xf32>
    %405 = vector.broadcast %404 : vector<1x128xf32> to vector<32x128xf32>
    %406 = arith.mulf %403, %405 : vector<32x128xf32>
    %c1_258 = arith.constant 1 : index
    %c20_259 = arith.constant 20 : index
    %c0_260 = arith.constant 0 : index
    %c0_261 = arith.constant 0 : index
    %407 = vector.load %arg3[%c1_258, %c20_259, %c0_260, %c0_261] : memref<2x25x32x32xf32, #tpu.memory_space<vmem>>, vector<1x1x32x32xf32>
    %408 = vector.shape_cast %407 : vector<1x1x32x32xf32> to vector<32x32xf32>
    %cst_262 = arith.constant dense<0.000000e+00> : vector<32x128xf32>
    %409 = tpu.matmul %408, %406, %cst_262 {dimension_numbers = #tpu.dot_dimension_numbers<[1], [0], [0], [1], [0, 0, 1, 1], [], []>} : vector<32x32xf32>, vector<32x128xf32>, vector<32x128xf32> -> vector<32x128xf32>
    %410 = arith.addf %402, %409 : vector<32x128xf32>
    %c113_i32_263 = arith.constant 113 : i32
    %411 = tpu.dynamic_rotate %247 by %c113_i32_263 dim 1 : vector<32x128xf32>, i32 -> vector<32x128xf32>
    %412 = vector.extract_strided_slice %5 {offsets = [21, 0], sizes = [1, 128], strides = [1, 1]} : vector<25x128xf32> to vector<1x128xf32>
    %413 = vector.broadcast %412 : vector<1x128xf32> to vector<32x128xf32>
    %414 = arith.mulf %411, %413 : vector<32x128xf32>
    %c1_264 = arith.constant 1 : index
    %c21_265 = arith.constant 21 : index
    %c0_266 = arith.constant 0 : index
    %c0_267 = arith.constant 0 : index
    %415 = vector.load %arg3[%c1_264, %c21_265, %c0_266, %c0_267] : memref<2x25x32x32xf32, #tpu.memory_space<vmem>>, vector<1x1x32x32xf32>
    %416 = vector.shape_cast %415 : vector<1x1x32x32xf32> to vector<32x32xf32>
    %cst_268 = arith.constant dense<0.000000e+00> : vector<32x128xf32>
    %417 = tpu.matmul %416, %414, %cst_268 {dimension_numbers = #tpu.dot_dimension_numbers<[1], [0], [0], [1], [0, 0, 1, 1], [], []>} : vector<32x32xf32>, vector<32x128xf32>, vector<32x128xf32> -> vector<32x128xf32>
    %418 = arith.addf %410, %417 : vector<32x128xf32>
    %c112_i32_269 = arith.constant 112 : i32
    %419 = tpu.dynamic_rotate %247 by %c112_i32_269 dim 1 : vector<32x128xf32>, i32 -> vector<32x128xf32>
    %420 = vector.extract_strided_slice %5 {offsets = [22, 0], sizes = [1, 128], strides = [1, 1]} : vector<25x128xf32> to vector<1x128xf32>
    %421 = vector.broadcast %420 : vector<1x128xf32> to vector<32x128xf32>
    %422 = arith.mulf %419, %421 : vector<32x128xf32>
    %c1_270 = arith.constant 1 : index
    %c22_271 = arith.constant 22 : index
    %c0_272 = arith.constant 0 : index
    %c0_273 = arith.constant 0 : index
    %423 = vector.load %arg3[%c1_270, %c22_271, %c0_272, %c0_273] : memref<2x25x32x32xf32, #tpu.memory_space<vmem>>, vector<1x1x32x32xf32>
    %424 = vector.shape_cast %423 : vector<1x1x32x32xf32> to vector<32x32xf32>
    %cst_274 = arith.constant dense<0.000000e+00> : vector<32x128xf32>
    %425 = tpu.matmul %424, %422, %cst_274 {dimension_numbers = #tpu.dot_dimension_numbers<[1], [0], [0], [1], [0, 0, 1, 1], [], []>} : vector<32x32xf32>, vector<32x128xf32>, vector<32x128xf32> -> vector<32x128xf32>
    %426 = arith.addf %418, %425 : vector<32x128xf32>
    %c111_i32_275 = arith.constant 111 : i32
    %427 = tpu.dynamic_rotate %247 by %c111_i32_275 dim 1 : vector<32x128xf32>, i32 -> vector<32x128xf32>
    %428 = vector.extract_strided_slice %5 {offsets = [23, 0], sizes = [1, 128], strides = [1, 1]} : vector<25x128xf32> to vector<1x128xf32>
    %429 = vector.broadcast %428 : vector<1x128xf32> to vector<32x128xf32>
    %430 = arith.mulf %427, %429 : vector<32x128xf32>
    %c1_276 = arith.constant 1 : index
    %c23_277 = arith.constant 23 : index
    %c0_278 = arith.constant 0 : index
    %c0_279 = arith.constant 0 : index
    %431 = vector.load %arg3[%c1_276, %c23_277, %c0_278, %c0_279] : memref<2x25x32x32xf32, #tpu.memory_space<vmem>>, vector<1x1x32x32xf32>
    %432 = vector.shape_cast %431 : vector<1x1x32x32xf32> to vector<32x32xf32>
    %cst_280 = arith.constant dense<0.000000e+00> : vector<32x128xf32>
    %433 = tpu.matmul %432, %430, %cst_280 {dimension_numbers = #tpu.dot_dimension_numbers<[1], [0], [0], [1], [0, 0, 1, 1], [], []>} : vector<32x32xf32>, vector<32x128xf32>, vector<32x128xf32> -> vector<32x128xf32>
    %434 = arith.addf %426, %433 : vector<32x128xf32>
    %c110_i32_281 = arith.constant 110 : i32
    %435 = tpu.dynamic_rotate %247 by %c110_i32_281 dim 1 : vector<32x128xf32>, i32 -> vector<32x128xf32>
    %436 = vector.extract_strided_slice %5 {offsets = [24, 0], sizes = [1, 128], strides = [1, 1]} : vector<25x128xf32> to vector<1x128xf32>
    %437 = vector.broadcast %436 : vector<1x128xf32> to vector<32x128xf32>
    %438 = arith.mulf %435, %437 : vector<32x128xf32>
    %c1_282 = arith.constant 1 : index
    %c24_283 = arith.constant 24 : index
    %c0_284 = arith.constant 0 : index
    %c0_285 = arith.constant 0 : index
    %439 = vector.load %arg3[%c1_282, %c24_283, %c0_284, %c0_285] : memref<2x25x32x32xf32, #tpu.memory_space<vmem>>, vector<1x1x32x32xf32>
    %440 = vector.shape_cast %439 : vector<1x1x32x32xf32> to vector<32x32xf32>
    %cst_286 = arith.constant dense<0.000000e+00> : vector<32x128xf32>
    %441 = tpu.matmul %440, %438, %cst_286 {dimension_numbers = #tpu.dot_dimension_numbers<[1], [0], [0], [1], [0, 0, 1, 1], [], []>} : vector<32x32xf32>, vector<32x128xf32>, vector<32x128xf32> -> vector<32x128xf32>
    %442 = arith.addf %434, %441 : vector<32x128xf32>
    %c1_287 = arith.constant 1 : index
    %c0_288 = arith.constant 0 : index
    %c0_289 = arith.constant 0 : index
    %443 = vector.load %arg4[%c1_287, %c0_288, %c0_289] : memref<2x32x1xf32, #tpu.memory_space<vmem>>, vector<1x32x1xf32>
    %444 = vector.shape_cast %443 : vector<1x32x1xf32> to vector<32x1xf32>
    %445 = vector.broadcast %444 : vector<32x1xf32> to vector<32x128xf32>
    %446 = arith.addf %442, %445 : vector<32x128xf32>
    %cst_290 = arith.constant 5.000000e-01 : f32
    %447 = vector.broadcast %cst_290 : f32 to vector<32x128xf32>
    %448 = arith.mulf %447, %446 : vector<32x128xf32>
    %449 = math.tanh %448 : vector<32x128xf32>
    %cst_291 = arith.constant 1.000000e+00 : f32
    %450 = vector.broadcast %cst_291 : f32 to vector<32x128xf32>
    %451 = arith.addf %449, %450 : vector<32x128xf32>
    %cst_292 = arith.constant 5.000000e-01 : f32
    %452 = vector.broadcast %cst_292 : f32 to vector<32x128xf32>
    %453 = arith.mulf %452, %451 : vector<32x128xf32>
    %454 = arith.mulf %446, %453 : vector<32x128xf32>
    %c1_293 = arith.constant 1 : index
    %c0_294 = arith.constant 0 : index
    %c0_295 = arith.constant 0 : index
    %455 = vector.load %arg5[%c1_293, %c0_294, %c0_295] : memref<2x32x32xf32, #tpu.memory_space<vmem>>, vector<1x32x32xf32>
    %456 = vector.shape_cast %455 : vector<1x32x32xf32> to vector<32x32xf32>
    %cst_296 = arith.constant dense<0.000000e+00> : vector<32x128xf32>
    %457 = tpu.matmul %456, %454, %cst_296 {dimension_numbers = #tpu.dot_dimension_numbers<[1], [0], [0], [1], [0, 0, 1, 1], [], []>} : vector<32x32xf32>, vector<32x128xf32>, vector<32x128xf32> -> vector<32x128xf32>
    %458 = arith.addf %232, %457 : vector<32x128xf32>
    %c0_297 = arith.constant 0 : index
    %c0_298 = arith.constant 0 : index
    %459 = vector.load %arg6[%c0_297, %c0_298] : memref<32x1xf32, #tpu.memory_space<vmem>>, vector<32x1xf32>
    %460 = vector.broadcast %459 : vector<32x1xf32> to vector<32x128xf32>
    %461 = arith.addf %458, %460 : vector<32x128xf32>
    %462 = vector.extract_strided_slice %461 {offsets = [0, 0], sizes = [32, 64], strides = [1, 1]} : vector<32x128xf32> to vector<32x64xf32>
    %cst_299 = arith.constant dense<0.000000e+00> : vector<32xf32>
    %463 = vector.multi_reduction <add>, %462, %cst_299 [1] : vector<32x64xf32> to vector<32xf32>
    %464 = vector.shape_cast %463 : vector<32xf32> to vector<32x1xf32>
    %cst_300 = arith.constant 1.562500e-02 : f32
    %465 = vector.broadcast %cst_300 : f32 to vector<32x1xf32>
    %466 = arith.mulf %464, %465 : vector<32x1xf32>
    %c0_301 = arith.constant 0 : index
    %c0_302 = arith.constant 0 : index
    %467 = vector.load %arg7[%c0_301, %c0_302] : memref<32x2xf32, #tpu.memory_space<vmem>>, vector<32x2xf32>
    %468 = vector.broadcast %466 : vector<32x1xf32> to vector<32x2xf32>
    %469 = arith.mulf %467, %468 : vector<32x2xf32>
    %cst_303 = arith.constant dense<0.000000e+00> : vector<2xf32>
    %470 = vector.multi_reduction <add>, %469, %cst_303 [0] : vector<32x2xf32> to vector<2xf32>
    %471 = vector.shape_cast %470 : vector<2xf32> to vector<1x2xf32>
    %cst_304 = arith.constant 0.000000e+00 : f32
    %472 = vector.broadcast %cst_304 : f32 to vector<1x2xf32>
    %473 = arith.maximumf %471, %472 : vector<1x2xf32>
    %c0_305 = arith.constant 0 : index
    %c0_306 = arith.constant 0 : index
    %474 = vector.load %arg8[%c0_305, %c0_306] : memref<32x2xf32, #tpu.memory_space<vmem>>, vector<32x2xf32>
    %475 = vector.broadcast %473 : vector<1x2xf32> to vector<32x2xf32>
    %476 = arith.mulf %474, %475 : vector<32x2xf32>
    %cst_307 = arith.constant dense<0.000000e+00> : vector<32xf32>
    %477 = vector.multi_reduction <add>, %476, %cst_307 [1] : vector<32x2xf32> to vector<32xf32>
    %478 = vector.shape_cast %477 : vector<32xf32> to vector<32x1xf32>
    %cst_308 = arith.constant 5.000000e-01 : f32
    %479 = vector.broadcast %cst_308 : f32 to vector<32x1xf32>
    %480 = arith.mulf %479, %478 : vector<32x1xf32>
    %481 = math.tanh %480 : vector<32x1xf32>
    %cst_309 = arith.constant 1.000000e+00 : f32
    %482 = vector.broadcast %cst_309 : f32 to vector<32x1xf32>
    %483 = arith.addf %481, %482 : vector<32x1xf32>
    %cst_310 = arith.constant 5.000000e-01 : f32
    %484 = vector.broadcast %cst_310 : f32 to vector<32x1xf32>
    %485 = arith.mulf %484, %483 : vector<32x1xf32>
    %c0_311 = arith.constant 0 : index
    %c0_312 = arith.constant 0 : index
    %c0_313 = arith.constant 0 : index
    %486 = vector.load %arg0[%c0_311, %c0_312, %c0_313] : memref<2x32x64xf32, #tpu.memory_space<vmem>>, vector<1x32x64xf32>
    %487 = vector.shape_cast %486 : vector<1x32x64xf32> to vector<32x64xf32>
    %488 = vector.broadcast %485 : vector<32x1xf32> to vector<32x64xf32>
    %489 = arith.mulf %462, %488 : vector<32x64xf32>
    %490 = arith.addf %487, %489 : vector<32x64xf32>
    %c0_314 = arith.constant 0 : index
    %c0_315 = arith.constant 0 : index
    %c0_316 = arith.constant 0 : index
    %491 = vector.load %arg10[%c0_314, %c0_315, %c0_316] : memref<2x32x64xf32, #tpu.memory_space<vmem>>, vector<1x32x64xf32>
    %492 = vector.shape_cast %491 : vector<1x32x64xf32> to vector<32x64xf32>
    %493 = vector.shape_cast %490 : vector<32x64xf32> to vector<1x32x64xf32>
    tpu.vector_store %arg10[%c0_314, %c0_315, %c0_316], %493 {strides = array<i32>} : memref<2x32x64xf32, #tpu.memory_space<vmem>>, vector<1x32x64xf32>,
    %494 = vector.extract_strided_slice %461 {offsets = [0, 64], sizes = [32, 64], strides = [1, 1]} : vector<32x128xf32> to vector<32x64xf32>
    %cst_317 = arith.constant dense<0.000000e+00> : vector<32xf32>
    %495 = vector.multi_reduction <add>, %494, %cst_317 [1] : vector<32x64xf32> to vector<32xf32>
    %496 = vector.shape_cast %495 : vector<32xf32> to vector<32x1xf32>
    %cst_318 = arith.constant 1.562500e-02 : f32
    %497 = vector.broadcast %cst_318 : f32 to vector<32x1xf32>
    %498 = arith.mulf %496, %497 : vector<32x1xf32>
    %c0_319 = arith.constant 0 : index
    %c0_320 = arith.constant 0 : index
    %499 = vector.load %arg7[%c0_319, %c0_320] : memref<32x2xf32, #tpu.memory_space<vmem>>, vector<32x2xf32>
    %500 = vector.broadcast %498 : vector<32x1xf32> to vector<32x2xf32>
    %501 = arith.mulf %499, %500 : vector<32x2xf32>
    %cst_321 = arith.constant dense<0.000000e+00> : vector<2xf32>
    %502 = vector.multi_reduction <add>, %501, %cst_321 [0] : vector<32x2xf32> to vector<2xf32>
    %503 = vector.shape_cast %502 : vector<2xf32> to vector<1x2xf32>
    %cst_322 = arith.constant 0.000000e+00 : f32
    %504 = vector.broadcast %cst_322 : f32 to vector<1x2xf32>
    %505 = arith.maximumf %503, %504 : vector<1x2xf32>
    %c0_323 = arith.constant 0 : index
    %c0_324 = arith.constant 0 : index
    %506 = vector.load %arg8[%c0_323, %c0_324] : memref<32x2xf32, #tpu.memory_space<vmem>>, vector<32x2xf32>
    %507 = vector.broadcast %505 : vector<1x2xf32> to vector<32x2xf32>
    %508 = arith.mulf %506, %507 : vector<32x2xf32>
    %cst_325 = arith.constant dense<0.000000e+00> : vector<32xf32>
    %509 = vector.multi_reduction <add>, %508, %cst_325 [1] : vector<32x2xf32> to vector<32xf32>
    %510 = vector.shape_cast %509 : vector<32xf32> to vector<32x1xf32>
    %cst_326 = arith.constant 5.000000e-01 : f32
    %511 = vector.broadcast %cst_326 : f32 to vector<32x1xf32>
    %512 = arith.mulf %511, %510 : vector<32x1xf32>
    %513 = math.tanh %512 : vector<32x1xf32>
    %cst_327 = arith.constant 1.000000e+00 : f32
    %514 = vector.broadcast %cst_327 : f32 to vector<32x1xf32>
    %515 = arith.addf %513, %514 : vector<32x1xf32>
    %cst_328 = arith.constant 5.000000e-01 : f32
    %516 = vector.broadcast %cst_328 : f32 to vector<32x1xf32>
    %517 = arith.mulf %516, %515 : vector<32x1xf32>
    %c1_329 = arith.constant 1 : index
    %c0_330 = arith.constant 0 : index
    %c0_331 = arith.constant 0 : index
    %518 = vector.load %arg0[%c1_329, %c0_330, %c0_331] : memref<2x32x64xf32, #tpu.memory_space<vmem>>, vector<1x32x64xf32>
    %519 = vector.shape_cast %518 : vector<1x32x64xf32> to vector<32x64xf32>
    %520 = vector.broadcast %517 : vector<32x1xf32> to vector<32x64xf32>
    %521 = arith.mulf %494, %520 : vector<32x64xf32>
    %522 = arith.addf %519, %521 : vector<32x64xf32>
    %c1_332 = arith.constant 1 : index
    %c0_333 = arith.constant 0 : index
    %c0_334 = arith.constant 0 : index
    %523 = vector.load %arg10[%c1_332, %c0_333, %c0_334] : memref<2x32x64xf32, #tpu.memory_space<vmem>>, vector<1x32x64xf32>
    %524 = vector.shape_cast %523 : vector<1x32x64xf32> to vector<32x64xf32>
    %525 = vector.shape_cast %522 : vector<32x64xf32> to vector<1x32x64xf32>
    tpu.vector_store %arg10[%c1_332, %c0_333, %c0_334], %525 {strides = array<i32>} : memref<2x32x64xf32, #tpu.memory_space<vmem>>, vector<1x32x64xf32>,
    return
  }
}

</mosaic_0001>

<bundles_post_ra>
// kernel: decoder_residual_block.1
= control target key start
LH: loop header
LB: loop body
LE: loop exit
PB: predicated region body
PF: predicated region fallthrough
CT: control target
= control target key end

     0   :  { %15 = vsyncpa [#allocation3], 0  ;;  %s9051_s13 = smov [#allocation2]   ;;  %s10748_s0 = inlined_call_operand.vmem [shape: f32[2,32,64], index: 0, kind: input, shape index: {}]   ;;  %s10749_s1 = inlined_call_operand.vmem [shape: f32[2,32,32], index: 1, kind: input, shape index: {}]   ;;  %s10750_s2 = inlined_call_operand.vmem [shape: f32[2,32,1], index: 2, kind: input, shape index: {}]   ;;  %s10751_s3 = inlined_call_operand.hbm [shape: f32[2,25,32,32], index: 3, kind: input, shape index: {}]   ;;  %s10752_s4 = inlined_call_operand.vmem [shape: f32[2,32,1], index: 4, kind: input, shape index: {}]   ;;  %s10753_s5 = inlined_call_operand.vmem [shape: f32[2,32,32], index: 5, kind: input, shape index: {}]   ;;  %s10754_s6 = inlined_call_operand.vmem [shape: f32[32,1], index: 6, kind: input, shape index: {}]   ;;  %s10755_s7 = inlined_call_operand.vmem [shape: f32[32,2], index: 7, kind: input, shape index: {}]   ;;  %s10756_s8 = inlined_call_operand.vmem [shape: f32[32,2], index: 8, kind: input, shape index: {}]   ;;  %s10757_s9 = inlined_call_operand.vmem [shape: f32[25,128], index: 9, kind: input, shape index: {}]   ;;  %s10758_s10 = inlined_call_operand.vmem [shape: f32[2,32,64], index: 10, kind: output, shape index: {}]  }
   0x1   :  { %s27_s14 = sshll.u32 %s9051_s13, 4  ;;  %s9027_s17 = scalar_lea.hbm %s10751_s3, 25600  ;;  %s28_s14 = int_to_ptr.vmem [resolvable:$true] %s27_s14 }
   0x2   :  { %p9028_p0 = scmp.ne.s32.totalorder %s10751_s3, %s9027_s17  ;;  %p9031_p1 = scmp.lt.u32.totalorder %s9027_s17, %s10751_s3 }
   0x4   :  { %p9033_p2 = pnand %p9031_p1, %p9028_p0 }
   0x6   :  { %9036 = shalt.err (!%p9033_p2)
}
   0x7   :  { %s9037_s22 = scalar_lea.vmem %s28_s14, 25600  ;;  %p9042_p4 = scmp.lt.s32.totalorder %s28_s14, %s28_s14 }
   0x8   :  { %p9038_p3 = scmp.ne.s32.totalorder %s28_s14, %s9037_s22  ;;  %p9043_p5 = scmp.lt.s32.totalorder %s9037_s22, %s9037_s22 }
   0xa   :  { %p9044_p6 = por %p9043_p5, %p9042_p4 }
   0xc   :  { %p9045_p7 = pnand %p9044_p6, %p9038_p3 }
   0xe   :  { %9048 = shalt.err (!%p9045_p7)
}
   0xf   :  { %s9052_s23 = smov 128   ;;  %s9053_s24 = smov 8  }
  0x10   :  { %33 = dma.hbm_to_vmem [thread:$0]  %s10751_s3, 25600, %s28_s14, [#allocation3], %s9052_s23, %s9052_s23, %s9053_s24  }
  0x11   :  { %9049 = dma.done.wait [#allocation3], 25600  }
  0x12   :  { %9050 = vsyncadd [#allocation3], 4294941696  ;;  %v6874_v0 = vld [vmem:[%s10748_s0 + $0x20] sm:$0xff]  ;;  %v6875_v1 = vld [vmem:[%s10748_s0 + $0x28] sm:$0xff]  ;;  %vm111_vm0 = vcmask 261120   ;;  %s9054_s16 = smov 64  }
  0x13   :  { %v6876_v2 = vld [vmem:[%s10748_s0 + $0x30] sm:$0xff]  ;;  %v8963_v3 = vpack.i.bf16 %v6875_v1, %v6874_v0  ;;  %v6877_v4 = vld [vmem:[%s10748_s0 + $0x38] sm:$0xff]  ;;  %v83_v5 = vld [vmem:[%s10749_s1] sm:$0xff]  ;;  %v9055_v8 = vmov 0   ;;  %vm74_vm1 = vcmask 523264   ;;  %s9057_s14 = smov 17  }
  0x14   :  { %v8968_v6 = vpack.i.bf16 %v6877_v4, %v6876_v2  ;;  %7559 = vmatprep.mubr.msk.f32.mxu0 %vm111_vm0, %v83_v5  ;;  %v6987_v7 = vld [vmem:[%s10750_s2 + $0x20] sm:$0xff]  ;;  %8973 = vset.pattern.permute.xlu1 %v9055_v8  ;;  %v6989_v9 = vld [vmem:[%s10750_s2 + $0x30] sm:$0xff]  ;;  %v6988_v10 = vld [vmem:[%s10750_s2 + $0x28] sm:$0xff]  ;;  %s9058_s17 = smov 16   ;;  %s9059_s18 = smov 15   ;;  %vm6683_vm2 = vcmask 15360  }
  0x15   :  { %8964 = vrot.lane.b32.xlu0 %v8963_v3, %s9054_s16  ;;  %3318 = vperm.xlu1 %8973, %v6987_v7   ;;  %v88_v11 = vld [vmem:[%s10750_s2 + $0x8] sm:$0xff]  ;;  %v6990_v12 = vld [vmem:[%s10750_s2 + $0x38] sm:$0xff]  ;;  %v87_v14 = vld [vmem:[%s10750_s2] sm:$0xff]  ;;  %s9061_s19 = smov 10   ;;  %s9062_s20 = smov 9  }
  0x16   :  { %8974 = vset.pattern.permute.xlu0 %v9055_v8  ;;  %v90_v13 = vld [vmem:[%s10750_s2 + $0x18] sm:$0xff]  ;;  %v89_v15 = vld [vmem:[%s10750_s2 + $0x10] sm:$0xff]  ;;  %v49_v17 = vld [vmem:[%s10748_s0] sm:$0xff]  ;;  %s9060_s2 = smov 14   ;;  %s9063_s21 = smov 7  }
  0x17   :  { %v50_v18 = vld [vmem:[%s10748_s0 + $0x8] sm:$0xff]  ;;  %v51_v24 = vld [vmem:[%s10748_s0 + $0x10] sm:$0xff]  ;;  %v52_v25 = vld [vmem:[%s10748_s0 + $0x18] sm:$0xff]  ;;  %s9064_s22 = smov 6   ;;  %s9065_s23 = smov 2  }
  0x18   :  { %v84_v32 = vld [vmem:[%s10749_s1 + $0x8] sm:$0xff]  ;;  %v85_v33 = vld [vmem:[%s10749_s1 + $0x10] sm:$0xff]  ;;  %v86_v34 = vld [vmem:[%s10749_s1 + $0x18] sm:$0xff]  ;;  %s9066_s25 = smov 1   ;;  %s9067_s26 = smov 127  }
  0x19   :  { %8969 = vrot.lane.b32.xlu0 %v8968_v6, %s9054_s16  ;;  %3323 = vperm.xlu1 %8973, %v6988_v10   ;;  %v6983_v35 = vld [vmem:[%s10749_s1 + $0x20] sm:$0xff]  ;;  %v6984_v36 = vld [vmem:[%s10749_s1 + $0x28] sm:$0xff]  ;;  %v6985_v37 = vld [vmem:[%s10749_s1 + $0x30] sm:$0xff]  ;;  %s9068_s27 = smov 126   ;;  %s9069_s28 = smov 122  }
  0x1a   :  { %v6986_v38 = vld [vmem:[%s10749_s1 + $0x38] sm:$0xff]  ;;  %s9056_s1 = smov 18   ;;  %s9070_s11 = smov 121  }
  0x1b   :  { %s9071_s12 = smov 120   ;;  %s9072_s13 = smov 119  }
  0x1d   :  { %3328 = vperm.xlu0 %8974, %v6989_v9   ;;  %3333 = vperm.xlu1 %8973, %v6990_v12  }
  0x21   :  { %98 = vperm.xlu0 %8974, %v88_v11   ;;  %93 = vperm.xlu1 %8973, %v87_v14  }
  0x25   :  { %108 = vperm.xlu0 %8974, %v90_v13   ;;  %103 = vperm.xlu1 %8973, %v89_v15   ;;  %v250_v13 = vld [vmem:[#allocation2] sm:$0xff] }
  0x26   :  { %7573 = vmatprep.mubr.msk.f32.mxu1 %vm111_vm0, %v250_v13 }
  0x87   :  { %v8965_v16 = vpop.permute.xlu0 %8964 }
  0x88   :  { %v8967_v19 = vunpack.i.h.bf16 %v8965_v16  ;;  %v8966_v20 = vunpack.i.l.bf16 %v8965_v16 }
  0x8a   :  { %v75_v21 = vsel %vm74_vm1, %v49_v17, %v8966_v20  ;;  %v76_v22 = vsel %vm74_vm1, %v50_v18, %v8967_v19  ;;  %v242_v20 = vlaneseq }
  0x8b   :  { %v8970_v23 = vpop.permute.xlu0 %8969  ;;  %v8307_v26 = vpack.c.bf16 %v76_v22, %v75_v21 }
  0x8c   :  { %v8972_v27 = vunpack.i.h.bf16 %v8970_v23  ;;  %v8971_v28 = vunpack.i.l.bf16 %v8970_v23  ;;  %v9366_v22 = vshrl.u32 %v242_v20, 7 }
  0x8d   :  { %8308 = vmatprep.subr.bf16.mxu0 %v8307_v26 }
  0x8e   :  { %v77_v29 = vsel %vm74_vm1, %v51_v24, %v8971_v28  ;;  %v78_v30 = vsel %vm74_vm1, %v52_v25, %v8972_v27  ;;  %8310 = vmatpush3.bf16.msra.mxu0 %v8307_v26  ;;  %10772 = vst [vmem:[#allocation5_spill] sm:$0xff] %v9366_v22  ;;  %v9380_v27 = vld [vmem:[%s10757_s9] sm:$0xff]  ;;  %v9520_v20 = vsub.s32 1, %v9366_v22 }
  0x8f   :  { %v8311_v31 = vpack.c.bf16 %v78_v30, %v77_v29 }
  0x90   :  { %10774 = vst [vmem:[#allocation7_spill] sm:$0xff] %v9520_v20 }
  0x91   :  { %8312 = vmatprep.subr.bf16.mxu0 %v8311_v31 }
  0x92   :  { %8314 = vmatpush3.bf16.msra.mxu0 %v8311_v31 }
  0x93   :  { %8516 = vmatprep.subr.bf16.mxu0 %v8307_v26 }
  0x94   :  { %v9233_v39 = vpop.permute.xlu1 %3318 }
  0x95   :  { %7560 = vmatmul.mubr.msk.f32.vlgmr.msra.gmra.mrb[0].mxu0 %vm111_vm0, %v84_v32 }
  0x96   :  { %8518 = vmatpush3.bf16.msra.mxu0 %v8307_v26  ;;  %7562 = vmatprep.mubr.msk.f32.mxu0 %vm111_vm0, %v85_v33  ;;  %v9373_v26 = vsub.s32 0, %v9366_v22 }
  0x97   :  { %8520 = vmatprep.subr.bf16.mxu0 %v8311_v31 }
  0x98   :  { %v9235_v40 = vpop.permute.xlu1 %3323  ;;  %10773 = vst [vmem:[#allocation6_spill] sm:$0xff] %v9373_v26  ;;  %v9386_v30 = vrot.slane %v9380_v27, %v9373_v26 }
  0x99   :  { %7563 = vmatmul.mubr.msk.f32.gmra.mrb[2].mxu0 %vm111_vm0, %v86_v34 }
  0x9a   :  { %8522 = vmatpush3.bf16.msra.mxu0 %v8311_v31  ;;  %7923 = vmatprep.mubr.msk.f32.mxu0 %vm111_vm0, %v6983_v35 }
  0x9c   :  { %v9237_v41 = vpop.permute.xlu0 %3328  ;;  %v9239_v42 = vpop.permute.xlu1 %3333 }
  0x9d   :  { %7924 = vmatmul.mubr.msk.f32.vlgmr.msra.gmra.mrb[4].mxu0 %vm111_vm0, %v6984_v36 }
  0x9e   :  { %7926 = vmatprep.mubr.msk.f32.mxu0 %vm111_vm0, %v6985_v37 }
  0xa0   :  { %v99_v43 = vpop.permute.xlu0 %98  ;;  %v94_v45 = vpop.permute.xlu1 %93 }
  0xa1   :  { %7927 = vmatmul.mubr.msk.f32.gmra.mrb[6].mxu0 %vm111_vm0, %v6986_v38 }
  0xa4   :  { %v109_v1 = vpop.permute.xlu0 %108  ;;  %v104_v2 = vpop.permute.xlu1 %103 }
 0x168   :  { %v7561_v44 = vpop.f32.mrb[0].mxu0 }
 0x169   :  { %v196_v46 = vadd.f32 %v7561_v44, %v99_v43  ;;  %v190_v47 = vpop.f32.mrb[1].mxu0 }
 0x16a   :  { %v191_v48 = vadd.f32 %v190_v47, %v94_v45 }
 0x16b   :  { %v210_v49 = vmul.f32 0.5, %v196_v46 }
 0x16c   :  { %v209_v50 = vmul.f32 0.5, %v191_v48  ;;  %v7564_v51 = vpop.f32.mrb[2].mxu0 }
 0x16d   :  { %8975 = vtanh.f32 %v210_v49  ;;  %v200_v52 = vpop.f32.mrb[3].mxu0  ;;  %v206_v3 = vadd.f32 %v7564_v51, %v109_v1 }
 0x16e   :  { %8977 = vtanh.f32 %v209_v50  ;;  %v201_v4 = vadd.f32 %v200_v52, %v104_v2 }
 0x16f   :  { %v212_v5 = vmul.f32 0.5, %v206_v3 }
 0x170   :  { %v9241_v53 = vpop.f32.mrb[4].mxu0  ;;  %v211_v6 = vmul.f32 0.5, %v201_v4 }
 0x171   :  { %v9243_v54 = vpop.f32.mrb[5].mxu0  ;;  %8979 = vtanh.f32 %v212_v5  ;;  %v3420_v16 = vadd.f32 %v9241_v53, %v9235_v40 }
 0x172   :  { %8981 = vtanh.f32 %v211_v6  ;;  %v3415_v17 = vadd.f32 %v9243_v54, %v9233_v39 }
 0x173   :  { %v3434_v18 = vmul.f32 0.5, %v3420_v16 }
 0x174   :  { %v9245_v55 = vpop.f32.mrb[6].mxu0  ;;  %v3433_v19 = vmul.f32 0.5, %v3415_v17 }
 0x175   :  { %v9247_v56 = vpop.f32.mrb[7].mxu0  ;;  %8983 = vtanh.f32 %v3434_v18 }
 0x176   :  { %8985 = vtanh.f32 %v3433_v19  ;;  %v3471_v19 = vld [vmem:[#allocation2 + $0x320] sm:$0xff] }
 0x177   :  { %v8976_v57 = vpop.eup %8975  ;;  %7937 = vmatprep.mubr.msk.f32.mxu0 %vm111_vm0, %v3471_v19  ;;  %v9574_v19 = vsub.s32 3, %v9366_v22 }
 0x178   :  { %v8978_v58 = vpop.eup %8977  ;;  %v218_v59 = vadd.f32 1.0, %v8976_v57 }
 0x179   :  { %v217_v60 = vadd.f32 1.0, %v8978_v58  ;;  %v3430_v58 = vadd.f32 %v9245_v55, %v9239_v42  ;;  %10776 = vst [vmem:[#allocation9_spill] sm:$0xff] %v9574_v19 }
 0x17a   :  { %v222_v61 = vmul.f32 0.5, %v218_v59  ;;  %v3425_v59 = vadd.f32 %v9247_v56, %v9237_v41 }
 0x17b   :  { %v221_v62 = vmul.f32 0.5, %v217_v60  ;;  %v8980_v7 = vpop.eup %8979 }
 0x17c   :  { %v9249_v63 = vmul.f32 %v222_v61, %v196_v46  ;;  %v8982_v8 = vpop.eup %8981  ;;  %v220_v9 = vadd.f32 1.0, %v8980_v7  ;;  %v3435_v1 = vmul.f32 0.5, %v3425_v59 }
 0x17d   :  { %v9251_v0 = vmul.f32 %v221_v62, %v191_v48  ;;  %v219_v10 = vadd.f32 1.0, %v8982_v8  ;;  %v3436_v62 = vmul.f32 0.5, %v3430_v58 }
 0x17e   :  { %236 = vrot.lane.b32.xlu0 %v9249_v63, %s9056_s1  ;;  %v224_v11 = vmul.f32 0.5, %v220_v9 }
 0x17f   :  { %234 = vrot.lane.b32.xlu1 %v9251_v0, %s9056_s1  ;;  %v223_v12 = vmul.f32 0.5, %v219_v10  ;;  %v8984_v21 = vpop.eup %8983  ;;  %8987 = vtanh.f32 %v3436_v62 }
 0x180   :  { %v9314_v14 = vmul.f32 %v224_v11, %v206_v3  ;;  %v8986_v23 = vpop.eup %8985  ;;  %v3442_v24 = vadd.f32 1.0, %v8984_v21  ;;  %8989 = vtanh.f32 %v3435_v1 }
 0x181   :  { %v9316_v15 = vmul.f32 %v223_v12, %v201_v4  ;;  %v3441_v25 = vadd.f32 1.0, %v8986_v23 }
 0x182   :  { %450 = vrot.lane.b32.xlu0 %v9249_v63, %s9057_s14  ;;  %v3446_v28 = vmul.f32 0.5, %v3442_v24 }
 0x183   :  { %448 = vrot.lane.b32.xlu1 %v9251_v0, %s9057_s14  ;;  %v3445_v29 = vmul.f32 0.5, %v3441_v25 }
 0x184   :  { %v9392_v31 = vmul.f32 %v3446_v28, %v3420_v16 }
 0x185   :  { %v9394_v33 = vmul.f32 %v3445_v29, %v3415_v17 }
 0x186   :  { %572 = vrot.lane.b32.xlu0 %v9249_v63, %s9058_s17 }
 0x187   :  { %570 = vrot.lane.b32.xlu1 %v9251_v0, %s9058_s17 }
 0x189   :  { %v8988_v5 = vpop.eup %8987 }
 0x18a   :  { %694 = vrot.lane.b32.xlu0 %v9249_v63, %s9059_s18  ;;  %v8990_v7 = vpop.eup %8989  ;;  %v3444_v8 = vadd.f32 1.0, %v8988_v5  ;;  %v8327_v5 = vpack.c.bf16 %v9314_v14, %v9316_v15 }
 0x18b   :  { %692 = vrot.lane.b32.xlu1 %v9251_v0, %s9059_s18  ;;  %v3443_v10 = vadd.f32 1.0, %v8990_v7  ;;  %v253_v7 = vld [vmem:[#allocation2 + $0x18] sm:$0xff] }
 0x18c   :  { %v3448_v12 = vmul.f32 0.5, %v3444_v8 }
 0x18d   :  { %v3447_v16 = vmul.f32 0.5, %v3443_v10  ;;  %v230_v10 = vld [vmem:[#allocation2 + $0x180] sm:$0xff] }
 0x18e   :  { %816 = vrot.lane.b32.xlu0 %v9249_v63, %s9060_s2  ;;  %v9528_v23 = vmul.f32 %v3448_v12, %v3430_v58 }
 0x18f   :  { %814 = vrot.lane.b32.xlu1 %v9251_v0, %s9060_s2  ;;  %v9530_v28 = vmul.f32 %v3447_v16, %v3425_v59  ;;  %v252_v59 = vld [vmem:[#allocation2 + $0x10] sm:$0xff] }
 0x192   :  { %938 = vrot.lane.b32.xlu0 %v9249_v63, %s9061_s19 }
 0x193   :  { %936 = vrot.lane.b32.xlu1 %v9251_v0, %s9061_s19 }
 0x196   :  { %1060 = vrot.lane.b32.xlu0 %v9249_v63, %s9062_s20 }
 0x197   :  { %1058 = vrot.lane.b32.xlu1 %v9251_v0, %s9062_s20 }
 0x19a   :  { %1182 = vrot.lane.b32.xlu0 %v9249_v63, %s9053_s24 }
 0x19b   :  { %1180 = vrot.lane.b32.xlu1 %v9251_v0, %s9053_s24 }
 0x19e   :  { %1304 = vrot.lane.b32.xlu0 %v9249_v63, %s9063_s21 }
 0x19f   :  { %1302 = vrot.lane.b32.xlu1 %v9251_v0, %s9063_s21 }
 0x1a2   :  { %1426 = vrot.lane.b32.xlu0 %v9249_v63, %s9064_s22 }
 0x1a3   :  { %1424 = vrot.lane.b32.xlu1 %v9251_v0, %s9064_s22 }
 0x1a6   :  { %1548 = vrot.lane.b32.xlu0 %v9249_v63, %s9065_s23 }
 0x1a7   :  { %1546 = vrot.lane.b32.xlu1 %v9251_v0, %s9065_s23 }
 0x1aa   :  { %1670 = vrot.lane.b32.xlu0 %v9249_v63, %s9066_s25 }
 0x1ab   :  { %1668 = vrot.lane.b32.xlu1 %v9251_v0, %s9066_s25 }
 0x1ae   :  { %1792 = vrot.lane.b32.xlu0 %v9249_v63, %s9067_s26 }
 0x1af   :  { %1790 = vrot.lane.b32.xlu1 %v9251_v0, %s9067_s26 }
 0x1b2   :  { %1914 = vrot.lane.b32.xlu0 %v9249_v63, %s9068_s27 }
 0x1b3   :  { %1912 = vrot.lane.b32.xlu1 %v9251_v0, %s9068_s27 }
 0x1b6   :  { %2036 = vrot.lane.b32.xlu0 %v9249_v63, %s9069_s28 }
 0x1b7   :  { %2034 = vrot.lane.b32.xlu1 %v9251_v0, %s9069_s28 }
 0x1ba   :  { %240 = vrot.lane.b32.xlu0 %v9314_v14, %s9056_s1 }
 0x1bb   :  { %238 = vrot.lane.b32.xlu1 %v9316_v15, %s9056_s1 }
 0x1be   :  { %454 = vrot.lane.b32.xlu0 %v9314_v14, %s9057_s14 }
 0x1bf   :  { %452 = vrot.lane.b32.xlu1 %v9316_v15, %s9057_s14 }
 0x1c2   :  { %576 = vrot.lane.b32.xlu0 %v9314_v14, %s9058_s17 }
 0x1c3   :  { %574 = vrot.lane.b32.xlu1 %v9316_v15, %s9058_s17 }
 0x1c6   :  { %698 = vrot.lane.b32.xlu0 %v9314_v14, %s9059_s18 }
 0x1c7   :  { %696 = vrot.lane.b32.xlu1 %v9316_v15, %s9059_s18 }
 0x1ca   :  { %820 = vrot.lane.b32.xlu0 %v9314_v14, %s9060_s2 }
 0x1cb   :  { %818 = vrot.lane.b32.xlu1 %v9316_v15, %s9060_s2 }
 0x1ce   :  { %942 = vrot.lane.b32.xlu0 %v9314_v14, %s9061_s19 }
 0x1cf   :  { %940 = vrot.lane.b32.xlu1 %v9316_v15, %s9061_s19 }
 0x1d2   :  { %1064 = vrot.lane.b32.xlu0 %v9314_v14, %s9062_s20 }
 0x1d3   :  { %1062 = vrot.lane.b32.xlu1 %v9316_v15, %s9062_s20 }
 0x1d6   :  { %1186 = vrot.lane.b32.xlu0 %v9314_v14, %s9053_s24 }
 0x1d7   :  { %1184 = vrot.lane.b32.xlu1 %v9316_v15, %s9053_s24 }
 0x1da   :  { %1308 = vrot.lane.b32.xlu0 %v9314_v14, %s9063_s21 }
 0x1db   :  { %1306 = vrot.lane.b32.xlu1 %v9316_v15, %s9063_s21 }
 0x1de   :  { %1430 = vrot.lane.b32.xlu0 %v9314_v14, %s9064_s22 }
 0x1df   :  { %1428 = vrot.lane.b32.xlu1 %v9316_v15, %s9064_s22 }
 0x1e2   :  { %1552 = vrot.lane.b32.xlu0 %v9314_v14, %s9065_s23 }
 0x1e3   :  { %1550 = vrot.lane.b32.xlu1 %v9316_v15, %s9065_s23 }
 0x1e6   :  { %1674 = vrot.lane.b32.xlu0 %v9314_v14, %s9066_s25 }
 0x1e7   :  { %1672 = vrot.lane.b32.xlu1 %v9316_v15, %s9066_s25 }
 0x1ea   :  { %1796 = vrot.lane.b32.xlu0 %v9314_v14, %s9067_s26 }
 0x1eb   :  { %1794 = vrot.lane.b32.xlu1 %v9316_v15, %s9067_s26 }
 0x1ee   :  { %1918 = vrot.lane.b32.xlu0 %v9314_v14, %s9068_s27 }
 0x1ef   :  { %1916 = vrot.lane.b32.xlu1 %v9316_v15, %s9068_s27 }
 0x1f0   :  { %v237_v32 = vpop.permute.xlu0 %236 }
 0x1f1   :  { %v247_v34 = vmul.f32 %v9386_v30, %v237_v32  ;;  %v235_v35 = vpop.permute.xlu1 %234  ;;  %v9534_v32 = vrot.slane %v9380_v27, %v9520_v20 }
 0x1f2   :  { %v246_v36 = vmul.f32 %v9386_v30, %v235_v35  ;;  %3460 = vrot.lane.b32.xlu0 %v9392_v31, %s9056_s1  ;;  %v251_v35 = vld [vmem:[#allocation2 + $0x8] sm:$0xff] }
 0x1f3   :  { %3458 = vrot.lane.b32.xlu1 %v9394_v33, %s9056_s1 }
 0x1f4   :  { %v9402_v37 = vpop.permute.xlu0 %450  ;;  %v8315_v38 = vpack.c.bf16 %v247_v34, %v246_v36  ;;  %v8323_v34 = vpack.c.bf16 %v9249_v63, %v9251_v0 }
 0x1f5   :  { %v9404_v39 = vpop.permute.xlu1 %448  ;;  %v461_v62 = vmul.f32 %v9534_v32, %v9402_v37 }
 0x1f6   :  { %3671 = vrot.lane.b32.xlu0 %v9392_v31, %s9057_s14  ;;  %8316 = vmatprep.subr.bf16.mxu1 %v8315_v38  ;;  %v460_v1 = vmul.f32 %v9534_v32, %v9404_v39 }
 0x1f7   :  { %3669 = vrot.lane.b32.xlu1 %v9394_v33, %s9057_s14  ;;  %8318 = vmatpush3.bf16.msra.mxu1 %v8315_v38  ;;  %v9543_v38 = vsub.s32 2, %v9366_v22 }
 0x1f8   :  { %v9410_v40 = vpop.permute.xlu0 %572  ;;  %v8331_v12 = vpack.c.bf16 %v461_v62, %v460_v1  ;;  %v465_v62 = vld [vmem:[#allocation2 + $0x20] sm:$0xff] }
 0x1f9   :  { %v9412_v43 = vpop.permute.xlu1 %570  ;;  %10775 = vst [vmem:[#allocation8_spill] sm:$0xff] %v9543_v38  ;;  %v9561_v37 = vrot.slane %v9380_v27, %v9543_v38 }
 0x1fa   :  { %3789 = vrot.lane.b32.xlu0 %v9392_v31, %s9058_s17 }
 0x1fb   :  { %3787 = vrot.lane.b32.xlu1 %v9394_v33, %s9058_s17 }
 0x1fc   :  { %v9418_v44 = vpop.permute.xlu0 %694 }
 0x1fd   :  { %v9420_v45 = vpop.permute.xlu1 %692 }
 0x1fe   :  { %3907 = vrot.lane.b32.xlu0 %v9392_v31, %s9059_s18 }
 0x1ff   :  { %3905 = vrot.lane.b32.xlu1 %v9394_v33, %s9059_s18 }
 0x200   :  { %v9426_v46 = vpop.permute.xlu0 %816 }
 0x201   :  { %v9428_v47 = vpop.permute.xlu1 %814 }
 0x202   :  { %4025 = vrot.lane.b32.xlu0 %v9392_v31, %s9060_s2 }
 0x203   :  { %4023 = vrot.lane.b32.xlu1 %v9394_v33, %s9060_s2 }
 0x204   :  { %v9434_v48 = vpop.permute.xlu0 %938 }
 0x205   :  { %v9436_v49 = vpop.permute.xlu1 %936 }
 0x206   :  { %4143 = vrot.lane.b32.xlu0 %v9392_v31, %s9061_s19 }
 0x207   :  { %4141 = vrot.lane.b32.xlu1 %v9394_v33, %s9061_s19 }
 0x208   :  { %v9442_v50 = vpop.permute.xlu0 %1060 }
 0x209   :  { %v9444_v51 = vpop.permute.xlu1 %1058 }
 0x20a   :  { %4261 = vrot.lane.b32.xlu0 %v9392_v31, %s9062_s20 }
 0x20b   :  { %4259 = vrot.lane.b32.xlu1 %v9394_v33, %s9062_s20 }
 0x20c   :  { %v9450_v52 = vpop.permute.xlu0 %1182 }
 0x20d   :  { %v9452_v53 = vpop.permute.xlu1 %1180 }
 0x20e   :  { %4379 = vrot.lane.b32.xlu0 %v9392_v31, %s9053_s24 }
 0x20f   :  { %4377 = vrot.lane.b32.xlu1 %v9394_v33, %s9053_s24 }
 0x210   :  { %v9458_v54 = vpop.permute.xlu0 %1304 }
 0x211   :  { %v9460_v57 = vpop.permute.xlu1 %1302 }
 0x212   :  { %4497 = vrot.lane.b32.xlu0 %v9392_v31, %s9063_s21 }
 0x213   :  { %4495 = vrot.lane.b32.xlu1 %v9394_v33, %s9063_s21 }
 0x214   :  { %v9470_v60 = vpop.permute.xlu0 %1426 }
 0x215   :  { %v9472_v61 = vpop.permute.xlu1 %1424 }
 0x216   :  { %4615 = vrot.lane.b32.xlu0 %v9392_v31, %s9064_s22 }
 0x217   :  { %4613 = vrot.lane.b32.xlu1 %v9394_v33, %s9064_s22 }
 0x218   :  { %v9478_v2 = vpop.permute.xlu0 %1548 }
 0x219   :  { %v9480_v42 = vpop.permute.xlu1 %1546 }
 0x21a   :  { %4733 = vrot.lane.b32.xlu0 %v9392_v31, %s9065_s23 }
 0x21b   :  { %4731 = vrot.lane.b32.xlu1 %v9394_v33, %s9065_s23 }
 0x21c   :  { %v9486_v41 = vpop.permute.xlu0 %1670 }
 0x21d   :  { %v9488_v55 = vpop.permute.xlu1 %1668 }
 0x21e   :  { %4851 = vrot.lane.b32.xlu0 %v9392_v31, %s9066_s25 }
 0x21f   :  { %4849 = vrot.lane.b32.xlu1 %v9394_v33, %s9066_s25 }
 0x220   :  { %v9494_v56 = vpop.permute.xlu0 %1792 }
 0x221   :  { %v9496_v3 = vpop.permute.xlu1 %1790 }
 0x222   :  { %4969 = vrot.lane.b32.xlu0 %v9392_v31, %s9067_s26 }
 0x223   :  { %4967 = vrot.lane.b32.xlu1 %v9394_v33, %s9067_s26 }
 0x224   :  { %v9502_v4 = vpop.permute.xlu0 %1914 }
 0x225   :  { %v9504_v6 = vpop.permute.xlu1 %1912 }
 0x226   :  { %5087 = vrot.lane.b32.xlu0 %v9392_v31, %s9068_s27 }
 0x227   :  { %5085 = vrot.lane.b32.xlu1 %v9394_v33, %s9068_s27 }
 0x228   :  { %v9510_v9 = vpop.permute.xlu0 %2036 }
 0x229   :  { %v9512_v11 = vpop.permute.xlu1 %2034 }
 0x22a   :  { %5205 = vrot.lane.b32.xlu0 %v9392_v31, %s9069_s28 }
 0x22b   :  { %5203 = vrot.lane.b32.xlu1 %v9394_v33, %s9069_s28 }
 0x22c   :  { %v241_v13 = vpop.permute.xlu0 %240 }
 0x22d   :  { %v249_v17 = vmul.f32 %v9386_v30, %v241_v13  ;;  %v239_v18 = vpop.permute.xlu1 %238 }
 0x22e   :  { %v248_v21 = vmul.f32 %v9386_v30, %v239_v18  ;;  %5323 = vrot.lane.b32.xlu0 %v9392_v31, %s9070_s11 }
 0x22f   :  { %5321 = vrot.lane.b32.xlu1 %v9394_v33, %s9070_s11 }
 0x230   :  { %v8319_v24 = vpack.c.bf16 %v249_v17, %v248_v21  ;;  %v455_v25 = vpop.permute.xlu0 %454  ;;  %v231_v17 = vld [vmem:[#allocation2 + $0x188] sm:$0xff] }
 0x231   :  { %v453_v29 = vpop.permute.xlu1 %452  ;;  %v463_v13 = vmul.f32 %v9534_v32, %v455_v25  ;;  %v583_v25 = vmul.f32 %v9561_v37, %v9410_v40  ;;  %v9592_v40 = vrot.slane %v9380_v27, %v9574_v19 }
 0x232   :  { %3464 = vrot.lane.b32.xlu0 %v9528_v23, %s9056_s1  ;;  %8320 = vmatprep.subr.bf16.mxu1 %v8319_v24  ;;  %v462_v16 = vmul.f32 %v9534_v32, %v453_v29  ;;  %v582_v29 = vmul.f32 %v9561_v37, %v9412_v43 }
 0x233   :  { %3462 = vrot.lane.b32.xlu1 %v9530_v28, %s9056_s1  ;;  %8322 = vmatpush3.bf16.msra.mxu1 %v8319_v24  ;;  %v232_v24 = vld [vmem:[#allocation2 + $0x190] sm:$0xff]  ;;  %s9073_s1 = smov 118  }
 0x234   :  { %v577_v36 = vpop.permute.xlu0 %576  ;;  %8324 = vmatprep.subr.bf16.mxu1 %v8323_v34  ;;  %v8339_v1 = vpack.c.bf16 %v583_v25, %v582_v29  ;;  %v468_v25 = vld [vmem:[#allocation2 + $0x38] sm:$0xff] }
 0x235   :  { %v575_v58 = vpop.permute.xlu1 %574 }
 0x236   :  { %3675 = vrot.lane.b32.xlu0 %v9528_v23, %s9057_s14  ;;  %7574 = vmatmul.mubr.msk.f32.vlgmr.msra.gmra.mrb[0].mxu1 %vm111_vm0, %v251_v35  ;;  %v233_v35 = vld [vmem:[#allocation2 + $0x198] sm:$0xff] }
 0x237   :  { %2038 = vrot.lane.b32.xlu1 %v9316_v15, %s9069_s28  ;;  %8326 = vmatpush3.bf16.msra.mxu1 %v8323_v34  ;;  %v8335_v34 = vpack.c.bf16 %v463_v13, %v462_v16  ;;  %v10759_v13 = vsub.s32 4, %v9366_v22  ;;  %v705_v16 = vmul.f32 %v9592_v40, %v9418_v44 }
 0x238   :  { %v9556_v8 = vpop.permute.xlu0 %698  ;;  %8328 = vmatprep.subr.bf16.mxu1 %v8327_v5  ;;  %7576 = vmatprep.mubr.msk.f32.mxu1 %vm111_vm0, %v252_v59 }
 0x239   :  { %v697_v39 = vpop.permute.xlu1 %696  ;;  %v9624_v44 = vrot.slane %v9380_v27, %v10759_v13 }
 0x23a   :  { %3793 = vrot.lane.b32.xlu0 %v9528_v23, %s9058_s17  ;;  %7577 = vmatmul.mubr.msk.f32.gmra.mrb[2].mxu1 %vm111_vm0, %v253_v7  ;;  %v584_v7 = vmul.f32 %v9561_v37, %v575_v58  ;;  %v467_v58 = vld [vmem:[#allocation2 + $0x30] sm:$0xff] }
 0x23b   :  { %2156 = vrot.lane.b32.xlu1 %v9251_v0, %s9070_s11  ;;  %8330 = vmatpush3.bf16.msra.mxu1 %v8327_v5  ;;  %v585_v5 = vmul.f32 %v9561_v37, %v577_v36  ;;  %10777 = vst [vmem:[#allocation10_spill] sm:$0xff] %v9624_v44 }
 0x23c   :  { %v9570_v18 = vpop.permute.xlu0 %820  ;;  %8332 = vmatprep.subr.bf16.mxu1 %v8331_v12  ;;  %7587 = vmatprep.mubr.msk.f32.mxu1 %vm111_vm0, %v230_v10  ;;  %v466_v10 = vld [vmem:[#allocation2 + $0x28] sm:$0xff] }
 0x23d   :  { %v9576_v21 = vpop.permute.xlu1 %818 }
 0x23e   :  { %3911 = vrot.lane.b32.xlu0 %v9528_v23, %s9059_s18  ;;  %7588 = vmatmul.mubr.msk.f32.vlgmr.msra.gmra.mrb[0].mxu1 %vm111_vm0, %v231_v17  ;;  %v704_v17 = vmul.f32 %v9592_v40, %v9420_v45 }
 0x23f   :  { %5439 = vrot.lane.b32.xlu1 %v9394_v33, %s9071_s12  ;;  %8334 = vmatpush3.bf16.msra.mxu1 %v8331_v12 }
 0x240   :  { %v9587_v59 = vpop.permute.xlu0 %942  ;;  %8336 = vmatprep.subr.bf16.mxu1 %v8335_v34  ;;  %7590 = vmatprep.mubr.msk.f32.mxu1 %vm111_vm0, %v232_v24  ;;  %v8343_v24 = vpack.c.bf16 %v585_v5, %v584_v7  ;;  %v588_v5 = vld [vmem:[#allocation2 + $0x48] sm:$0xff] }
 0x241   :  { %v9594_v43 = vpop.permute.xlu1 %940 }
 0x242   :  { %4029 = vrot.lane.b32.xlu0 %v9528_v23, %s9060_s2  ;;  %7591 = vmatmul.mubr.msk.f32.gmra.mrb[2].mxu1 %vm111_vm0, %v233_v35  ;;  %v8347_v35 = vpack.c.bf16 %v705_v16, %v704_v17  ;;  %v826_v16 = vmul.f32 %v9624_v44, %v9428_v47 }
 0x243   :  { %3673 = vrot.lane.b32.xlu1 %v9530_v28, %s9057_s14  ;;  %8338 = vmatpush3.bf16.msra.mxu1 %v8335_v34  ;;  %v587_v34 = vld [vmem:[#allocation2 + $0x40] sm:$0xff]  ;;  %s9075_s14 = smov 113  }
 0x244   :  { %v9603_v12 = vpop.permute.xlu0 %1064  ;;  %8340 = vmatprep.subr.bf16.mxu1 %v8339_v1  ;;  %7601 = vmatprep.mubr.msk.f32.mxu1 %vm111_vm0, %v465_v62  ;;  %v707_v62 = vmul.f32 %v9592_v40, %v9556_v8 }
 0x245   :  { %v9607_v36 = vpop.permute.xlu1 %1062 }
 0x246   :  { %4147 = vrot.lane.b32.xlu0 %v9528_v23, %s9061_s19  ;;  %7602 = vmatmul.mubr.msk.f32.vlgmr.msra.gmra.mrb[0].mxu1 %vm111_vm0, %v466_v10  ;;  %v9640_v10 = vsub.s32 5, %v9366_v22 }
 0x247   :  { %2160 = vrot.lane.b32.xlu1 %v9316_v15, %s9070_s11  ;;  %8342 = vmatpush3.bf16.msra.mxu1 %v8339_v1  ;;  %v706_v1 = vmul.f32 %v9592_v40, %v697_v39  ;;  %v589_v39 = vld [vmem:[#allocation2 + $0x50] sm:$0xff] }
 0x248   :  { %v9618_v29 = vpop.permute.xlu0 %1186  ;;  %8344 = vmatprep.subr.bf16.mxu1 %v8343_v24  ;;  %7604 = vmatprep.mubr.msk.f32.mxu1 %vm111_vm0, %v467_v58  ;;  %10778 = vst [vmem:[#allocation11_spill] sm:$0xff] %v9640_v10  ;;  %v827_v58 = vmul.f32 %v9624_v44, %v9426_v46  ;;  %v9658_v46 = vrot.slane %v9380_v27, %v9640_v10 }
 0x249   :  { %v9626_v45 = vpop.permute.xlu1 %1184  ;;  %v8351_v17 = vpack.c.bf16 %v707_v62, %v706_v1  ;;  %v829_v1 = vmul.f32 %v9624_v44, %v9570_v18  ;;  %v9675_v18 = vsub.s32 6, %v9366_v22 }
 0x24a   :  { %4265 = vrot.lane.b32.xlu0 %v9528_v23, %s9062_s20  ;;  %7605 = vmatmul.mubr.msk.f32.gmra.mrb[2].mxu1 %vm111_vm0, %v468_v25  ;;  %10779 = vst [vmem:[#allocation12_spill] sm:$0xff] %v9658_v46  ;;  %v8355_v62 = vpack.c.bf16 %v827_v58, %v826_v16  ;;  %v949_v16 = vmul.f32 %v9658_v46, %v9434_v48 }
 0x24b   :  { %3791 = vrot.lane.b32.xlu1 %v9530_v28, %s9058_s17  ;;  %8346 = vmatpush3.bf16.msra.mxu1 %v8343_v24  ;;  %v590_v24 = vld [vmem:[#allocation2 + $0x58] sm:$0xff]  ;;  %10780 = vst [vmem:[#allocation13_spill] sm:$0xff] %v9675_v18  ;;  %v9693_v48 = vrot.slane %v9380_v27, %v9675_v18  ;;  %s9076_s17 = smov 112  }
 0x24c   :  { %v9636_v7 = vpop.permute.xlu0 %1308  ;;  %8348 = vmatprep.subr.bf16.mxu1 %v8347_v35  ;;  %7615 = vmatprep.mubr.msk.f32.mxu1 %vm111_vm0, %v587_v34  ;;  %v709_v34 = vld [vmem:[#allocation2 + $0x60] sm:$0xff] }
 0x24d   :  { %v9642_v8 = vpop.permute.xlu1 %1306 }
 0x24e   :  { %4383 = vrot.lane.b32.xlu0 %v9528_v23, %s9053_s24  ;;  %7616 = vmatmul.mubr.msk.f32.vlgmr.msra.gmra.mrb[0].mxu1 %vm111_vm0, %v588_v5  ;;  %v710_v5 = vld [vmem:[#allocation2 + $0x68] sm:$0xff] }
 0x24f   :  { %2278 = vrot.lane.b32.xlu1 %v9251_v0, %s9071_s12  ;;  %8350 = vmatpush3.bf16.msra.mxu1 %v8347_v35  ;;  %v828_v35 = vmul.f32 %v9624_v44, %v9576_v21  ;;  %v711_v21 = vld [vmem:[#allocation2 + $0x70] sm:$0xff] }
 0x250   :  { %v9653_v25 = vpop.permute.xlu0 %1430  ;;  %8352 = vmatprep.subr.bf16.mxu1 %v8351_v17  ;;  %7618 = vmatprep.mubr.msk.f32.mxu1 %vm111_vm0, %v589_v39 }
 0x251   :  { %v9660_v47 = vpop.permute.xlu1 %1428  ;;  %v8359_v13 = vpack.c.bf16 %v829_v1, %v828_v35  ;;  %v831_v1 = vld [vmem:[#allocation2 + $0x80] sm:$0xff] }
 0x252   :  { %4501 = vrot.lane.b32.xlu0 %v9528_v23, %s9063_s21  ;;  %7619 = vmatmul.mubr.msk.f32.gmra.mrb[2].mxu1 %vm111_vm0, %v590_v24  ;;  %v948_v24 = vmul.f32 %v9658_v46, %v9436_v49 }
 0x253   :  { %3909 = vrot.lane.b32.xlu1 %v9530_v28, %s9059_s18  ;;  %8354 = vmatpush3.bf16.msra.mxu1 %v8351_v17  ;;  %v712_v17 = vld [vmem:[#allocation2 + $0x78] sm:$0xff]  ;;  %s9077_s18 = smov 111  }
 0x254   :  { %v9671_v39 = vpop.permute.xlu0 %1552  ;;  %8356 = vmatprep.subr.bf16.mxu1 %v8355_v62  ;;  %7629 = vmatprep.mubr.msk.f32.mxu1 %vm111_vm0, %v709_v34  ;;  %v8363_v35 = vpack.c.bf16 %v949_v16, %v948_v24  ;;  %v1070_v24 = vmul.f32 %v9693_v48, %v9444_v51  ;;  %v953_v51 = vld [vmem:[#allocation2 + $0xa0] sm:$0xff] }
 0x255   :  { %v9677_v58 = vpop.permute.xlu1 %1550 }
 0x256   :  { %4619 = vrot.lane.b32.xlu0 %v9528_v23, %s9064_s22  ;;  %7630 = vmatmul.mubr.msk.f32.vlgmr.msra.gmra.mrb[0].mxu1 %vm111_vm0, %v710_v5  ;;  %v951_v5 = vmul.f32 %v9658_v46, %v9587_v59  ;;  %v833_v59 = vld [vmem:[#allocation2 + $0x90] sm:$0xff] }
 0x257   :  { %5557 = vrot.lane.b32.xlu1 %v9394_v33, %s9072_s13  ;;  %8358 = vmatpush3.bf16.msra.mxu1 %v8355_v62  ;;  %v950_v62 = vmul.f32 %v9658_v46, %v9594_v43  ;;  %v1071_v43 = vmul.f32 %v9693_v48, %v9442_v50 }
 0x258   :  { %v9688_v34 = vpop.permute.xlu0 %1674  ;;  %8360 = vmatprep.subr.bf16.mxu1 %v8359_v13  ;;  %7632 = vmatprep.mubr.msk.f32.mxu1 %vm111_vm0, %v711_v21  ;;  %v832_v21 = vld [vmem:[#allocation2 + $0x88] sm:$0xff] }
 0x259   :  { %v9695_v49 = vpop.permute.xlu1 %1672 }
 0x25a   :  { %4737 = vrot.lane.b32.xlu0 %v9528_v23, %s9065_s23  ;;  %7633 = vmatmul.mubr.msk.f32.gmra.mrb[2].mxu1 %vm111_vm0, %v712_v17  ;;  %v8367_v17 = vpack.c.bf16 %v951_v5, %v950_v62  ;;  %v8371_v5 = vpack.c.bf16 %v1071_v43, %v1070_v24  ;;  %v1073_v62 = vmul.f32 %v9693_v48, %v9603_v12  ;;  %v955_v24 = vld [vmem:[#allocation2 + $0xb0] sm:$0xff] }
 0x25b   :  { %4027 = vrot.lane.b32.xlu1 %v9530_v28, %s9060_s2  ;;  %8362 = vmatpush3.bf16.msra.mxu1 %v8359_v13  ;;  %v9719_v13 = vsub.s32 7, %v9366_v22 }
 0x25c   :  { %v9706_v44 = vpop.permute.xlu0 %1796  ;;  %8364 = vmatprep.subr.bf16.mxu1 %v8363_v35  ;;  %7643 = vmatprep.mubr.msk.f32.mxu1 %vm111_vm0, %v831_v1  ;;  %v834_v1 = vld [vmem:[#allocation2 + $0x98] sm:$0xff] }
 0x25d   :  { %v9709_v16 = vpop.permute.xlu1 %1794  ;;  %10781 = vst [vmem:[#allocation14_spill] sm:$0xff] %v9719_v13 }
 0x25e   :  { %4855 = vrot.lane.b32.xlu0 %v9528_v23, %s9066_s25  ;;  %7644 = vmatmul.mubr.msk.f32.vlgmr.msra.gmra.mrb[0].mxu1 %vm111_vm0, %v832_v21  ;;  %v1072_v21 = vmul.f32 %v9693_v48, %v9607_v36 }
 0x25f   :  { %2282 = vrot.lane.b32.xlu1 %v9316_v15, %s9071_s12  ;;  %8366 = vmatpush3.bf16.msra.mxu1 %v8363_v35  ;;  %v9737_v35 = vrot.slane %v9380_v27, %v9719_v13 }
 0x260   :  { %v9723_v46 = vpop.permute.xlu0 %1918  ;;  %8368 = vmatprep.subr.bf16.mxu1 %v8367_v17  ;;  %7646 = vmatprep.mubr.msk.f32.mxu1 %vm111_vm0, %v833_v59  ;;  %v954_v59 = vld [vmem:[#allocation2 + $0xa8] sm:$0xff]  ;;  %v8375_v22 = vpack.c.bf16 %v1073_v62, %v1072_v21 }
 0x261   :  { %v9726_v50 = vpop.permute.xlu1 %1916  ;;  %v1193_v27 = vmul.f32 %v9737_v35, %v9450_v52 }
 0x262   :  { %4973 = vrot.lane.b32.xlu0 %v9528_v23, %s9067_s26  ;;  %7647 = vmatmul.mubr.msk.f32.gmra.mrb[2].mxu1 %vm111_vm0, %v834_v1 }
 0x263   :  { %4145 = vrot.lane.b32.xlu1 %v9530_v28, %s9061_s19  ;;  %8370 = vmatpush3.bf16.msra.mxu1 %v8367_v17  ;;  %v1192_v17 = vmul.f32 %v9737_v35, %v9452_v53 }
 0x264   :  { %v3461_v43 = vpop.permute.xlu0 %3460  ;;  %8372 = vmatprep.subr.bf16.mxu1 %v8371_v5  ;;  %7657 = vmatprep.mubr.msk.f32.mxu1 %vm111_vm0, %v953_v51  ;;  %v9754_v51 = vld [vmem:[%s10757_s9 + $0x8] sm:$0xff] }
 0x265   :  { %v3467_v12 = vmul.f32 %v3461_v43, %v9386_v30  ;;  %v3459_v36 = vpop.permute.xlu1 %3458  ;;  %v9765_v53 = vrot.slane %v9754_v51, %v9373_v26  ;;  %v1075_v43 = vld [vmem:[#allocation2 + $0xc0] sm:$0xff] }
 0x266   :  { %v3466_v1 = vmul.f32 %v3459_v36, %v9386_v30  ;;  %5091 = vrot.lane.b32.xlu0 %v9528_v23, %s9068_s27  ;;  %7658 = vmatmul.mubr.msk.f32.vlgmr.msra.gmra.mrb[0].mxu1 %vm111_vm0, %v954_v59  ;;  %v956_v59 = vld [vmem:[#allocation2 + $0xb8] sm:$0xff]  ;;  %v8379_v36 = vpack.c.bf16 %v1193_v27, %v1192_v17  ;;  %v1077_v27 = vld [vmem:[#allocation2 + $0xd0] sm:$0xff] }
 0x267   :  { %2400 = vrot.lane.b32.xlu1 %v9251_v0, %s9072_s13  ;;  %8374 = vmatpush3.bf16.msra.mxu1 %v8371_v5  ;;  %v1195_v5 = vmul.f32 %v9737_v35, %v9618_v29  ;;  %v1315_v29 = vmul.f32 %v9765_v53, %v9458_v54  ;;  %v1197_v54 = vld [vmem:[#allocation2 + $0xe0] sm:$0xff] }
 0x268   :  { %v8523_v62 = vpack.c.bf16 %v3467_v12, %v3466_v1  ;;  %v9758_v21 = vpop.permute.xlu0 %3671  ;;  %8376 = vmatprep.subr.bf16.mxu1 %v8375_v22  ;;  %7660 = vmatprep.mubr.msk.f32.mxu1 %vm111_vm0, %v955_v24  ;;  %v1194_v12 = vmul.f32 %v9737_v35, %v9626_v45  ;;  %v1076_v1 = vld [vmem:[#allocation2 + $0xc8] sm:$0xff]  ;;  %v1314_v45 = vmul.f32 %v9765_v53, %v9460_v57 }
 0x269   :  { %v9761_v52 = vpop.permute.xlu1 %3669  ;;  %v9797_v57 = vrot.slane %v9754_v51, %v9520_v20  ;;  %v1319_v20 = vld [vmem:[#allocation2 + $0x100] sm:$0xff] }
 0x26a   :  { %5209 = vrot.lane.b32.xlu0 %v9528_v23, %s9069_s28  ;;  %8524 = vmatprep.subr.bf16.mxu0 %v8523_v62 }
 0x26b   :  { %4263 = vrot.lane.b32.xlu1 %v9530_v28, %s9062_s20  ;;  %7661 = vmatmul.mubr.msk.f32.gmra.mrb[2].mxu1 %vm111_vm0, %v956_v59  ;;  %s9078_s20 = smov 110  }
 0x26c   :  { %8378 = vmatpush3.bf16.msra.mxu1 %v8375_v22  ;;  %8526 = vmatpush3.bf16.msra.mxu0 %v8523_v62  ;;  %v9776_v24 = vpop.permute.xlu0 %3789  ;;  %v8383_v22 = vpack.c.bf16 %v1195_v5, %v1194_v12  ;;  %v1078_v62 = vld [vmem:[#allocation2 + $0xd8] sm:$0xff]  ;;  %v1316_v5 = vmul.f32 %v9765_v53, %v9642_v8  ;;  %v1436_v8 = vmul.f32 %v9797_v57, %v9472_v61 }
 0x26d   :  { %8380 = vmatprep.subr.bf16.mxu1 %v8379_v36  ;;  %v9778_v26 = vpop.permute.xlu1 %3787  ;;  %7671 = vmatprep.mubr.msk.f32.mxu1 %vm111_vm0, %v1075_v43  ;;  %v8387_v43 = vpack.c.bf16 %v1315_v29, %v1314_v45  ;;  %v1199_v29 = vld [vmem:[#allocation2 + $0xf0] sm:$0xff] }
 0x26e   :  { %2040 = vrot.lane.b32.xlu0 %v9314_v14, %s9069_s28 }
 0x26f   :  { %5675 = vrot.lane.b32.xlu1 %v9394_v33, %s9073_s1  ;;  %7672 = vmatmul.mubr.msk.f32.vlgmr.msra.gmra.mrb[0].mxu1 %vm111_vm0, %v1076_v1  ;;  %v1198_v1 = vld [vmem:[#allocation2 + $0xe8] sm:$0xff] }
 0x270   :  { %8382 = vmatpush3.bf16.msra.mxu1 %v8379_v36  ;;  %v9790_v17 = vpop.permute.xlu0 %3907  ;;  %7674 = vmatprep.mubr.msk.f32.mxu1 %vm111_vm0, %v1077_v27  ;;  %v1317_v36 = vmul.f32 %v9765_v53, %v9636_v7  ;;  %v1437_v7 = vmul.f32 %v9797_v57, %v9470_v60  ;;  %v9829_v60 = vrot.slane %v9754_v51, %v9543_v38  ;;  %v1441_v38 = vld [vmem:[#allocation2 + $0x120] sm:$0xff] }
 0x271   :  { %8384 = vmatprep.subr.bf16.mxu1 %v8383_v22  ;;  %v9793_v59 = vpop.permute.xlu1 %3905 }
 0x272   :  { %5327 = vrot.lane.b32.xlu0 %v9528_v23, %s9070_s11  ;;  %v8391_v45 = vpack.c.bf16 %v1317_v36, %v1316_v5  ;;  %v8395_v61 = vpack.c.bf16 %v1437_v7, %v1436_v8  ;;  %v1438_v36 = vmul.f32 %v9797_v57, %v9660_v47  ;;  %v1321_v7 = vld [vmem:[#allocation2 + $0x110] sm:$0xff]  ;;  %v1558_v47 = vmul.f32 %v9829_v60, %v9480_v42 }
 0x273   :  { %4381 = vrot.lane.b32.xlu1 %v9530_v28, %s9053_s24  ;;  %7675 = vmatmul.mubr.msk.f32.gmra.mrb[2].mxu1 %vm111_vm0, %v1078_v62  ;;  %v1200_v62 = vld [vmem:[#allocation2 + $0xf8] sm:$0xff]  ;;  %s9074_s24 = smov 114  }
 0x274   :  { %8386 = vmatpush3.bf16.msra.mxu1 %v8383_v22  ;;  %v9808_v12 = vpop.permute.xlu0 %4025  ;;  %7685 = vmatprep.mubr.msk.f32.mxu1 %vm111_vm0, %v1197_v54 }
 0x275   :  { %8388 = vmatprep.subr.bf16.mxu1 %v8387_v43  ;;  %v9811_v27 = vpop.permute.xlu1 %4023 }
 0x276   :  { %2158 = vrot.lane.b32.xlu0 %v9249_v63, %s9070_s11 }
 0x277   :  { %2404 = vrot.lane.b32.xlu1 %v9316_v15, %s9072_s13  ;;  %7686 = vmatmul.mubr.msk.f32.vlgmr.msra.gmra.mrb[0].mxu1 %vm111_vm0, %v1198_v1  ;;  %v1320_v1 = vld [vmem:[#allocation2 + $0x108] sm:$0xff] }
 0x278   :  { %8390 = vmatpush3.bf16.msra.mxu1 %v8387_v43  ;;  %v9822_v22 = vpop.permute.xlu0 %4143  ;;  %7688 = vmatprep.mubr.msk.f32.mxu1 %vm111_vm0, %v1199_v29  ;;  %v1439_v43 = vmul.f32 %v9797_v57, %v9653_v25  ;;  %v1559_v25 = vmul.f32 %v9829_v60, %v9478_v2  ;;  %v9861_v2 = vrot.slane %v9754_v51, %v9574_v19  ;;  %v1685_v19 = vld [vmem:[#allocation2 + $0x160] sm:$0xff] }
 0x279   :  { %8392 = vmatprep.subr.bf16.mxu1 %v8391_v45  ;;  %v9825_v54 = vpop.permute.xlu1 %4141 }
 0x27a   :  { %5441 = vrot.lane.b32.xlu0 %v9392_v31, %s9071_s12  ;;  %v8399_v8 = vpack.c.bf16 %v1439_v43, %v1438_v36  ;;  %v8403_v42 = vpack.c.bf16 %v1559_v25, %v1558_v47  ;;  %v1560_v43 = vmul.f32 %v9829_v60, %v9677_v58  ;;  %v1443_v25 = vld [vmem:[#allocation2 + $0x130] sm:$0xff]  ;;  %v1680_v58 = vmul.f32 %v9861_v2, %v9488_v55 }
 0x27b   :  { %4499 = vrot.lane.b32.xlu1 %v9530_v28, %s9063_s21  ;;  %7689 = vmatmul.mubr.msk.f32.gmra.mrb[2].mxu1 %vm111_vm0, %v1200_v62  ;;  %v9893_v55 = vrot.slane %v9754_v51, %v9640_v10 }
 0x27c   :  { %8394 = vmatpush3.bf16.msra.mxu1 %v8391_v45  ;;  %v9840_v5 = vpop.permute.xlu0 %4261  ;;  %7699 = vmatprep.mubr.msk.f32.mxu1 %vm111_vm0, %v1319_v20  ;;  %v1322_v45 = vld [vmem:[#allocation2 + $0x118] sm:$0xff] }
 0x27d   :  { %8396 = vmatprep.subr.bf16.mxu1 %v8395_v61  ;;  %v9843_v29 = vpop.permute.xlu1 %4259 }
 0x27e   :  { %2162 = vrot.lane.b32.xlu0 %v9314_v14, %s9070_s11 }
 0x27f   :  { %2522 = vrot.lane.b32.xlu1 %v9251_v0, %s9073_s1  ;;  %7700 = vmatmul.mubr.msk.f32.vlgmr.msra.gmra.mrb[0].mxu1 %vm111_vm0, %v1320_v1  ;;  %v1442_v1 = vld [vmem:[#allocation2 + $0x128] sm:$0xff] }
 0x280   :  { %8398 = vmatpush3.bf16.msra.mxu1 %v8395_v61  ;;  %v9854_v20 = vpop.permute.xlu0 %4379  ;;  %7702 = vmatprep.mubr.msk.f32.mxu1 %vm111_vm0, %v1321_v7  ;;  %v1561_v61 = vmul.f32 %v9829_v60, %v9671_v39  ;;  %v1681_v39 = vmul.f32 %v9861_v2, %v9486_v41  ;;  %v1563_v41 = vld [vmem:[#allocation2 + $0x140] sm:$0xff] }
 0x281   :  { %8400 = vmatprep.subr.bf16.mxu1 %v8399_v8  ;;  %v9857_v62 = vpop.permute.xlu1 %4377 }
 0x282   :  { %5445 = vrot.lane.b32.xlu0 %v9528_v23, %s9071_s12  ;;  %v8407_v47 = vpack.c.bf16 %v1561_v61, %v1560_v43  ;;  %v8411_v61 = vpack.c.bf16 %v1681_v39, %v1680_v58  ;;  %v1682_v43 = vmul.f32 %v9861_v2, %v9695_v49  ;;  %v1565_v39 = vld [vmem:[#allocation2 + $0x150] sm:$0xff]  ;;  %v1802_v49 = vmul.f32 %v9893_v55, %v9496_v3 }
 0x283   :  { %4617 = vrot.lane.b32.xlu1 %v9530_v28, %s9064_s22  ;;  %7703 = vmatmul.mubr.msk.f32.gmra.mrb[2].mxu1 %vm111_vm0, %v1322_v45 }
 0x284   :  { %8402 = vmatpush3.bf16.msra.mxu1 %v8399_v8  ;;  %v9872_v36 = vpop.permute.xlu0 %4497  ;;  %7713 = vmatprep.mubr.msk.f32.mxu1 %vm111_vm0, %v1441_v38  ;;  %v1444_v8 = vld [vmem:[#allocation2 + $0x138] sm:$0xff] }
 0x285   :  { %8404 = vmatprep.subr.bf16.mxu1 %v8403_v42  ;;  %v9875_v7 = vpop.permute.xlu1 %4495 }
 0x286   :  { %2280 = vrot.lane.b32.xlu0 %v9249_v63, %s9071_s12 }
 0x287   :  { %5793 = vrot.lane.b32.xlu1 %v9394_v33, %s9074_s24  ;;  %7714 = vmatmul.mubr.msk.f32.vlgmr.msra.gmra.mrb[0].mxu1 %vm111_vm0, %v1442_v1 }
 0x288   :  { %8406 = vmatpush3.bf16.msra.mxu1 %v8403_v42  ;;  %v9886_v38 = vpop.permute.xlu0 %4615  ;;  %7716 = vmatprep.mubr.msk.f32.mxu1 %vm111_vm0, %v1443_v25  ;;  %v1683_v42 = vmul.f32 %v9861_v2, %v9688_v34  ;;  %v1564_v25 = vld [vmem:[#allocation2 + $0x148] sm:$0xff]  ;;  %v1803_v34 = vmul.f32 %v9893_v55, %v9494_v56  ;;  %v9925_v56 = vrot.slane %v9754_v51, %v9675_v18  ;;  %v1807_v18 = vld [vmem:[#allocation2 + $0x1a0] sm:$0xff] }
 0x289   :  { %8408 = vmatprep.subr.bf16.mxu1 %v8407_v47  ;;  %v9889_v45 = vpop.permute.xlu1 %4613 }
 0x28a   :  { %5559 = vrot.lane.b32.xlu0 %v9392_v31, %s9072_s13  ;;  %v8415_v58 = vpack.c.bf16 %v1683_v42, %v1682_v43  ;;  %v8419_v3 = vpack.c.bf16 %v1803_v34, %v1802_v49  ;;  %v1804_v42 = vmul.f32 %v9893_v55, %v9709_v16  ;;  %v1687_v34 = vld [vmem:[#allocation2 + $0x170] sm:$0xff]  ;;  %v1924_v16 = vmul.f32 %v9925_v56, %v9504_v6 }
 0x28b   :  { %4735 = vrot.lane.b32.xlu1 %v9530_v28, %s9065_s23  ;;  %7717 = vmatmul.mubr.msk.f32.gmra.mrb[2].mxu1 %vm111_vm0, %v1444_v8  ;;  %v1566_v8 = vld [vmem:[#allocation2 + $0x158] sm:$0xff] }
 0x28c   :  { %8410 = vmatpush3.bf16.msra.mxu1 %v8407_v47  ;;  %v9904_v1 = vpop.permute.xlu0 %4733  ;;  %7727 = vmatprep.mubr.msk.f32.mxu1 %vm111_vm0, %v1563_v41 }
 0x28d   :  { %8412 = vmatprep.subr.bf16.mxu1 %v8411_v61  ;;  %v9907_v10 = vpop.permute.xlu1 %4731 }
 0x28e   :  { %2284 = vrot.lane.b32.xlu0 %v9314_v14, %s9071_s12 }
 0x28f   :  { %2526 = vrot.lane.b32.xlu1 %v9316_v15, %s9073_s1  ;;  %7728 = vmatmul.mubr.msk.f32.vlgmr.msra.gmra.mrb[0].mxu1 %vm111_vm0, %v1564_v25  ;;  %v1686_v25 = vld [vmem:[#allocation2 + $0x168] sm:$0xff] }
 0x290   :  { %8414 = vmatpush3.bf16.msra.mxu1 %v8411_v61  ;;  %v9918_v47 = vpop.permute.xlu0 %4851  ;;  %7730 = vmatprep.mubr.msk.f32.mxu1 %vm111_vm0, %v1565_v39  ;;  %v1805_v61 = vmul.f32 %v9893_v55, %v9706_v44  ;;  %v1925_v44 = vmul.f32 %v9925_v56, %v9502_v4  ;;  %v9957_v4 = vrot.slane %v9754_v51, %v9719_v13  ;;  %v1808_v51 = vld [vmem:[#allocation2 + $0x1a8] sm:$0xff]  ;;  %v3456_v13 = vld [vmem:[#allocation2 + $0x4b0] sm:$0xff] }
 0x291   :  { %8416 = vmatprep.subr.bf16.mxu1 %v8415_v58  ;;  %v9921_v41 = vpop.permute.xlu1 %4849 }
 0x292   :  { %5563 = vrot.lane.b32.xlu0 %v9528_v23, %s9072_s13  ;;  %v8423_v49 = vpack.c.bf16 %v1805_v61, %v1804_v42  ;;  %v8427_v6 = vpack.c.bf16 %v1925_v44, %v1924_v16  ;;  %v1926_v61 = vmul.f32 %v9925_v56, %v9726_v50  ;;  %v2046_v50 = vmul.f32 %v9957_v4, %v9512_v11  ;;  %v1810_v16 = vld [vmem:[#allocation2 + $0x1b8] sm:$0xff] }
 0x293   :  { %4853 = vrot.lane.b32.xlu1 %v9530_v28, %s9066_s25  ;;  %7731 = vmatmul.mubr.msk.f32.gmra.mrb[2].mxu1 %vm111_vm0, %v1566_v8 }
 0x294   :  { %8418 = vmatpush3.bf16.msra.mxu1 %v8415_v58  ;;  %v9936_v43 = vpop.permute.xlu0 %4969  ;;  %7741 = vmatprep.mubr.msk.f32.mxu1 %vm111_vm0, %v1685_v19  ;;  %v1688_v58 = vld [vmem:[#allocation2 + $0x178] sm:$0xff] }
 0x295   :  { %8420 = vmatprep.subr.bf16.mxu1 %v8419_v3  ;;  %v9939_v39 = vpop.permute.xlu1 %4967 }
 0x296   :  { %2402 = vrot.lane.b32.xlu0 %v9249_v63, %s9072_s13 }
 0x297   :  { %2644 = vrot.lane.b32.xlu1 %v9251_v0, %s9074_s24  ;;  %7742 = vmatmul.mubr.msk.f32.vlgmr.msra.gmra.mrb[0].mxu1 %vm111_vm0, %v1686_v25 }
 0x298   :  { %8422 = vmatpush3.bf16.msra.mxu1 %v8419_v3  ;;  %v9950_v19 = vpop.permute.xlu0 %5087  ;;  %7744 = vmatprep.mubr.msk.f32.mxu1 %vm111_vm0, %v1687_v34  ;;  %v1927_v3 = vmul.f32 %v9925_v56, %v9723_v46  ;;  %v1809_v34 = vld [vmem:[#allocation2 + $0x1b0] sm:$0xff]  ;;  %v2047_v46 = vmul.f32 %v9957_v4, %v9510_v9  ;;  %v1929_v9 = vld [vmem:[#allocation2 + $0x1c0] sm:$0xff] }
 0x299   :  { %8424 = vmatprep.subr.bf16.mxu1 %v8423_v49  ;;  %v9953_v8 = vpop.permute.xlu1 %5085 }
 0x29a   :  { %5677 = vrot.lane.b32.xlu0 %v9392_v31, %s9073_s1  ;;  %v8431_v44 = vpack.c.bf16 %v1927_v3, %v1926_v61  ;;  %v8435_v11 = vpack.c.bf16 %v2047_v46, %v2046_v50 }
 0x29b   :  { %4971 = vrot.lane.b32.xlu1 %v9530_v28, %s9067_s26  ;;  %7745 = vmatmul.mubr.msk.f32.gmra.mrb[2].mxu1 %vm111_vm0, %v1688_v58 }
 0x29c   :  { %8426 = vmatpush3.bf16.msra.mxu1 %v8423_v49  ;;  %v9968_v42 = vpop.permute.xlu0 %5205  ;;  %7755 = vmatprep.mubr.msk.f32.mxu1 %vm111_vm0, %v1807_v18 }
 0x29d   :  { %8428 = vmatprep.subr.bf16.mxu1 %v8427_v6  ;;  %v9971_v25 = vpop.permute.xlu1 %5203 }
 0x29e   :  { %2406 = vrot.lane.b32.xlu0 %v9314_v14, %s9072_s13 }
 0x29f   :  { %5911 = vrot.lane.b32.xlu1 %v9394_v33, %s9075_s14  ;;  %7756 = vmatmul.mubr.msk.f32.vlgmr.msra.gmra.mrb[0].mxu1 %vm111_vm0, %v1808_v51  ;;  %v1931_v51 = vld [vmem:[#allocation2 + $0x1d0] sm:$0xff] }
 0x2a0   :  { %8430 = vmatpush3.bf16.msra.mxu1 %v8427_v6  ;;  %v9982_v18 = vpop.permute.xlu0 %5323  ;;  %7758 = vmatprep.mubr.msk.f32.mxu1 %vm111_vm0, %v1809_v34  ;;  %v1930_v6 = vld [vmem:[#allocation2 + $0x1c8] sm:$0xff] }
 0x2a1   :  { %8432 = vmatprep.subr.bf16.mxu1 %v8431_v44  ;;  %v9985_v49 = vpop.permute.xlu1 %5321 }
 0x2a2   :  { %5681 = vrot.lane.b32.xlu0 %v9528_v23, %s9073_s1 }
 0x2a3   :  { %5089 = vrot.lane.b32.xlu1 %v9530_v28, %s9068_s27  ;;  %7759 = vmatmul.mubr.msk.f32.gmra.mrb[2].mxu1 %vm111_vm0, %v1810_v16  ;;  %v1932_v16 = vld [vmem:[#allocation2 + $0x1d8] sm:$0xff] }
 0x2a4   :  { %8434 = vmatpush3.bf16.msra.mxu1 %v8431_v44  ;;  %v3465_v58 = vpop.permute.xlu0 %3464  ;;  %7769 = vmatprep.mubr.msk.f32.mxu1 %vm111_vm0, %v1929_v9  ;;  %v2051_v9 = vld [vmem:[#allocation2 + $0x1e0] sm:$0xff] }
 0x2a5   :  { %v3469_v3 = vmul.f32 %v3465_v58, %v9386_v30  ;;  %8436 = vmatprep.subr.bf16.mxu1 %v8435_v11  ;;  %v3463_v61 = vpop.permute.xlu1 %3462  ;;  %v3472_v58 = vld [vmem:[#allocation2 + $0x328] sm:$0xff] }
 0x2a6   :  { %v3468_v34 = vmul.f32 %v3463_v61, %v9386_v30  ;;  %2524 = vrot.lane.b32.xlu0 %v9249_v63, %s9073_s1  ;;  %v8531_v30 = vpack.c.bf16 %v9392_v31, %v9394_v33  ;;  %v3678_v61 = vmul.f32 %v9758_v21, %v9534_v32 }
 0x2a7   :  { %2648 = vrot.lane.b32.xlu1 %v9316_v15, %s9074_s24  ;;  %7770 = vmatmul.mubr.msk.f32.vlgmr.msra.gmra.mrb[0].mxu1 %vm111_vm0, %v1930_v6 }
 0x2a8   :  { %v8527_v46 = vpack.c.bf16 %v3469_v3, %v3468_v34  ;;  %8438 = vmatpush3.bf16.msra.mxu1 %v8435_v11  ;;  %v3676_v50 = vpop.permute.xlu0 %3675  ;;  %7772 = vmatprep.mubr.msk.f32.mxu1 %vm111_vm0, %v1931_v51  ;;  %v3473_v3 = vld [vmem:[#allocation2 + $0x330] sm:$0xff]  ;;  %v3677_v51 = vmul.f32 %v9761_v52, %v9534_v32  ;;  %v8535_v34 = vpack.c.bf16 %v9528_v23, %v9530_v28  ;;  %v3454_v52 = vld [vmem:[#allocation2 + $0x4a0] sm:$0xff] }
 0x2a9   :  { %v10001_v44 = vpop.permute.xlu1 %2038 }
 0x2aa   :  { %5795 = vrot.lane.b32.xlu0 %v9392_v31, %s9074_s24  ;;  %8528 = vmatprep.subr.bf16.mxu0 %v8527_v46 }
 0x2ab   :  { %5207 = vrot.lane.b32.xlu1 %v9530_v28, %s9069_s28  ;;  %8530 = vmatpush3.bf16.msra.mxu0 %v8527_v46  ;;  %v3474_v46 = vld [vmem:[#allocation2 + $0x338] sm:$0xff] }
 0x2ac   :  { %v3794_v11 = vpop.permute.xlu0 %3793  ;;  %8532 = vmatprep.subr.bf16.mxu0 %v8531_v30  ;;  %7773 = vmatmul.mubr.msk.f32.gmra.mrb[2].mxu1 %vm111_vm0, %v1932_v16 }
 0x2ad   :  { %v10010_v6 = vpop.permute.xlu1 %2156  ;;  %7783 = vmatprep.mubr.msk.f32.mxu1 %vm111_vm0, %v2051_v9  ;;  %v8539_v9 = vpack.c.bf16 %v3678_v61, %v3677_v51  ;;  %v3796_v51 = vmul.f32 %v9776_v24, %v9561_v37 }
 0x2ae   :  { %2528 = vrot.lane.b32.xlu0 %v9314_v14, %s9073_s1  ;;  %7938 = vmatmul.mubr.msk.f32.vlgmr.msra.gmra.mrb[8].mxu0 %vm111_vm0, %v3472_v58 }
 0x2af   :  { %2766 = vrot.lane.b32.xlu1 %v9251_v0, %s9075_s14  ;;  %8534 = vmatpush3.bf16.msra.mxu0 %v8531_v30  ;;  %v3455_v30 = vld [vmem:[#allocation2 + $0x4a8] sm:$0xff] }
 0x2b0   :  { %v10024_v16 = vpop.permute.xlu0 %3911  ;;  %8536 = vmatprep.subr.bf16.mxu0 %v8535_v34  ;;  %7940 = vmatprep.mubr.msk.f32.mxu0 %vm111_vm0, %v3473_v3 }
 0x2b1   :  { %v10027_v21 = vpop.permute.xlu1 %5439 }
 0x2b2   :  { %10782 = vst [vmem:[#allocation15_spill] sm:$0xff] %v10027_v21  ;;  %5799 = vrot.lane.b32.xlu0 %v9528_v23, %s9074_s24  ;;  %7941 = vmatmul.mubr.msk.f32.gmra.mrb[10].mxu0 %vm111_vm0, %v3474_v46  ;;  %v3680_v21 = vmul.f32 %v3676_v50, %v9534_v32  ;;  %v3457_v46 = vld [vmem:[#allocation2 + $0x4b8] sm:$0xff] }
 0x2b3   :  { %5325 = vrot.lane.b32.xlu1 %v9530_v28, %s9070_s11  ;;  %8538 = vmatpush3.bf16.msra.mxu0 %v8535_v34  ;;  %v3795_v34 = vmul.f32 %v9778_v26, %v9561_v37 }
 0x2b4   :  { %v10034_v58 = vpop.permute.xlu0 %4029  ;;  %8540 = vmatprep.subr.bf16.mxu0 %v8539_v9  ;;  %7951 = vmatprep.mubr.msk.f32.mxu0 %vm111_vm0, %v3454_v52 }
 0x2b5   :  { %v3674_v3 = vpop.permute.xlu1 %3673  ;;  %v8547_v26 = vpack.c.bf16 %v3796_v51, %v3795_v34  ;;  %v3914_v51 = vmul.f32 %v9790_v17, %v9592_v40  ;;  %v3913_v34 = vmul.f32 %v9793_v59, %v9592_v40 }
 0x2b6   :  { %v3679_v61 = vmul.f32 %v3674_v3, %v9534_v32  ;;  %2646 = vrot.lane.b32.xlu0 %v9249_v63, %s9074_s24  ;;  %7952 = vmatmul.mubr.msk.f32.vlgmr.msra.gmra.mrb[8].mxu0 %vm111_vm0, %v3455_v30  ;;  %v3682_v30 = vld [vmem:[#allocation2 + $0x340] sm:$0xff]  ;;  %v3798_v3 = vmul.f32 %v3794_v11, %v9561_v37 }
 0x2b7   :  { %6029 = vrot.lane.b32.xlu1 %v9394_v33, %s9076_s17  ;;  %8542 = vmatpush3.bf16.msra.mxu0 %v8539_v9  ;;  %v3684_v9 = vld [vmem:[#allocation2 + $0x350] sm:$0xff]  ;;  %v8555_v17 = vpack.c.bf16 %v3914_v51, %v3913_v34 }
 0x2b8   :  { %v8543_v50 = vpack.c.bf16 %v3680_v21, %v3679_v61  ;;  %v10048_v52 = vpop.permute.xlu0 %4147  ;;  %7954 = vmatprep.mubr.msk.f32.mxu0 %vm111_vm0, %v3456_v13  ;;  %v3683_v21 = vld [vmem:[#allocation2 + $0x348] sm:$0xff] }
 0x2b9   :  { %v10051_v32 = vpop.permute.xlu1 %2160 }
 0x2ba   :  { %5913 = vrot.lane.b32.xlu0 %v9392_v31, %s9075_s14  ;;  %7955 = vmatmul.mubr.msk.f32.gmra.mrb[10].mxu0 %vm111_vm0, %v3457_v46 }
 0x2bb   :  { %8544 = vmatprep.subr.bf16.mxu0 %v8543_v50  ;;  %5443 = vrot.lane.b32.xlu1 %v9530_v28, %s9071_s12 }
 0x2bc   :  { %8546 = vmatpush3.bf16.msra.mxu0 %v8543_v50  ;;  %v10058_v24 = vpop.permute.xlu0 %4265  ;;  %7965 = vmatprep.mubr.msk.f32.mxu0 %vm111_vm0, %v3682_v30  ;;  %v3800_v30 = vld [vmem:[#allocation2 + $0x360] sm:$0xff] }
 0x2bd   :  { %8548 = vmatprep.subr.bf16.mxu0 %v8547_v26  ;;  %v3792_v13 = vpop.permute.xlu1 %3791 }
 0x2be   :  { %v3797_v61 = vmul.f32 %v3792_v13, %v9561_v37  ;;  %2650 = vrot.lane.b32.xlu0 %v9314_v14, %s9074_s24  ;;  %v3685_v37 = vld [vmem:[#allocation2 + $0x358] sm:$0xff]  ;;  %v3802_v13 = vld [vmem:[#allocation2 + $0x370] sm:$0xff] }
 0x2bf   :  { %7966 = vmatmul.mubr.msk.f32.vlgmr.msra.gmra.mrb[8].mxu0 %vm111_vm0, %v3683_v21  ;;  %2770 = vrot.lane.b32.xlu1 %v9316_v15, %s9075_s14 }
 0x2c0   :  { %v8551_v46 = vpack.c.bf16 %v3798_v3, %v3797_v61  ;;  %8550 = vmatpush3.bf16.msra.mxu0 %v8547_v26  ;;  %v10072_v50 = vpop.permute.xlu0 %4383  ;;  %7968 = vmatprep.mubr.msk.f32.mxu0 %vm111_vm0, %v3684_v9  ;;  %v3801_v26 = vld [vmem:[#allocation2 + $0x368] sm:$0xff]  ;;  %v3916_v9 = vmul.f32 %v10024_v16, %v9592_v40 }
 0x2c1   :  { %v10075_v11 = vpop.permute.xlu1 %2278  ;;  %v10783_v61 = vld [vmem:[#allocation10_spill] sm:$0xff] }
 0x2c2   :  { %5917 = vrot.lane.b32.xlu0 %v9528_v23, %s9075_s14  ;;  %8552 = vmatprep.subr.bf16.mxu0 %v8551_v46  ;;  %v4032_v51 = vmul.f32 %v9808_v12, %v10783_v61  ;;  %v4031_v34 = vmul.f32 %v9811_v27, %v10783_v61 }
 0x2c3   :  { %7969 = vmatmul.mubr.msk.f32.gmra.mrb[10].mxu0 %vm111_vm0, %v3685_v37  ;;  %5561 = vrot.lane.b32.xlu1 %v9530_v28, %s9072_s13 }
 0x2c4   :  { %8554 = vmatpush3.bf16.msra.mxu0 %v8551_v46  ;;  %v10082_v59 = vpop.permute.xlu0 %4501  ;;  %7979 = vmatprep.mubr.msk.f32.mxu0 %vm111_vm0, %v3800_v30  ;;  %v3918_v30 = vld [vmem:[#allocation2 + $0x380] sm:$0xff]  ;;  %v8563_v12 = vpack.c.bf16 %v4032_v51, %v4031_v34 }
 0x2c5   :  { %8556 = vmatprep.subr.bf16.mxu0 %v8555_v17  ;;  %v3910_v21 = vpop.permute.xlu1 %3909 }
 0x2c6   :  { %v3915_v3 = vmul.f32 %v3910_v21, %v9592_v40  ;;  %2768 = vrot.lane.b32.xlu0 %v9249_v63, %s9075_s14  ;;  %v3803_v40 = vld [vmem:[#allocation2 + $0x378] sm:$0xff]  ;;  %v3920_v21 = vld [vmem:[#allocation2 + $0x390] sm:$0xff] }
 0x2c7   :  { %7980 = vmatmul.mubr.msk.f32.vlgmr.msra.gmra.mrb[8].mxu0 %vm111_vm0, %v3801_v26  ;;  %2888 = vrot.lane.b32.xlu1 %v9251_v0, %s9076_s17 }
 0x2c8   :  { %v8559_v46 = vpack.c.bf16 %v3916_v9, %v3915_v3  ;;  %8558 = vmatpush3.bf16.msra.mxu0 %v8555_v17  ;;  %v10097_v37 = vpop.permute.xlu0 %4619  ;;  %7982 = vmatprep.mubr.msk.f32.mxu0 %vm111_vm0, %v3802_v13  ;;  %v3919_v17 = vld [vmem:[#allocation2 + $0x388] sm:$0xff]  ;;  %v4034_v13 = vmul.f32 %v10034_v58, %v10783_v61  ;;  %v10784_v3 = vld [vmem:[#allocation12_spill] sm:$0xff] }
 0x2c9   :  { %v10100_v16 = vpop.permute.xlu1 %5557  ;;  %v4150_v51 = vmul.f32 %v9822_v22, %v10784_v3  ;;  %v4149_v34 = vmul.f32 %v9825_v54, %v10784_v3 }
 0x2ca   :  { %6031 = vrot.lane.b32.xlu0 %v9392_v31, %s9076_s17  ;;  %8560 = vmatprep.subr.bf16.mxu0 %v8559_v46 }
 0x2cb   :  { %7983 = vmatmul.mubr.msk.f32.gmra.mrb[10].mxu0 %vm111_vm0, %v3803_v40  ;;  %5679 = vrot.lane.b32.xlu1 %v9530_v28, %s9073_s1  ;;  %v8571_v22 = vpack.c.bf16 %v4150_v51, %v4149_v34  ;;  %v4267_v51 = vmul.f32 %v9843_v29, %v9693_v48 }
 0x2cc   :  { %8562 = vmatpush3.bf16.msra.mxu0 %v8559_v46  ;;  %v10107_v27 = vpop.permute.xlu0 %4737  ;;  %7993 = vmatprep.mubr.msk.f32.mxu0 %vm111_vm0, %v3918_v30  ;;  %v4036_v30 = vld [vmem:[#allocation2 + $0x3a0] sm:$0xff] }
 0x2cd   :  { %8564 = vmatprep.subr.bf16.mxu0 %v8563_v12  ;;  %v4028_v26 = vpop.permute.xlu1 %4027 }
 0x2ce   :  { %v4033_v9 = vmul.f32 %v4028_v26, %v10783_v61  ;;  %2772 = vrot.lane.b32.xlu0 %v9314_v14, %s9075_s14  ;;  %v3921_v61 = vld [vmem:[#allocation2 + $0x398] sm:$0xff]  ;;  %v4038_v26 = vld [vmem:[#allocation2 + $0x3b0] sm:$0xff] }
 0x2cf   :  { %7994 = vmatmul.mubr.msk.f32.vlgmr.msra.gmra.mrb[8].mxu0 %vm111_vm0, %v3919_v17  ;;  %6147 = vrot.lane.b32.xlu1 %v9394_v33, %s9077_s18 }
 0x2d0   :  { %v8567_v46 = vpack.c.bf16 %v4034_v13, %v4033_v9  ;;  %8566 = vmatpush3.bf16.msra.mxu0 %v8563_v12  ;;  %v10122_v58 = vpop.permute.xlu0 %4855  ;;  %7996 = vmatprep.mubr.msk.f32.mxu0 %vm111_vm0, %v3920_v21  ;;  %v4037_v12 = vld [vmem:[#allocation2 + $0x3a8] sm:$0xff]  ;;  %v4152_v21 = vmul.f32 %v10048_v52, %v10784_v3  ;;  %v4268_v9 = vmul.f32 %v9840_v5, %v9693_v48  ;;  %v4039_v52 = vld [vmem:[#allocation2 + $0x3b8] sm:$0xff] }
 0x2d1   :  { %v10125_v40 = vpop.permute.xlu1 %2282 }
 0x2d2   :  { %6035 = vrot.lane.b32.xlu0 %v9528_v23, %s9076_s17  ;;  %8568 = vmatprep.subr.bf16.mxu0 %v8567_v46  ;;  %v8579_v5 = vpack.c.bf16 %v4268_v9, %v4267_v51 }
 0x2d3   :  { %7997 = vmatmul.mubr.msk.f32.gmra.mrb[10].mxu0 %vm111_vm0, %v3921_v61  ;;  %5797 = vrot.lane.b32.xlu1 %v9530_v28, %s9074_s24  ;;  %v4154_v61 = vld [vmem:[#allocation2 + $0x3c0] sm:$0xff] }
 0x2d4   :  { %8570 = vmatpush3.bf16.msra.mxu0 %v8567_v46  ;;  %v10132_v54 = vpop.permute.xlu0 %4973  ;;  %8007 = vmatprep.mubr.msk.f32.mxu0 %vm111_vm0, %v4036_v30  ;;  %v4155_v30 = vld [vmem:[#allocation2 + $0x3c8] sm:$0xff] }
 0x2d5   :  { %8572 = vmatprep.subr.bf16.mxu0 %v8571_v22  ;;  %v4146_v17 = vpop.permute.xlu1 %4145 }
 0x2d6   :  { %v4151_v13 = vmul.f32 %v4146_v17, %v10784_v3  ;;  %2890 = vrot.lane.b32.xlu0 %v9249_v63, %s9076_s17  ;;  %v4270_v17 = vmul.f32 %v10058_v24, %v9693_v48  ;;  %v2048_v24 = vmul.f32 %v9957_v4, %v10001_v44  ;;  %v10186_v44 = vld [vmem:[%s10757_s9 + $0x10] sm:$0xff] }
 0x2d7   :  { %8008 = vmatmul.mubr.msk.f32.vlgmr.msra.gmra.mrb[8].mxu0 %vm111_vm0, %v4037_v12  ;;  %2892 = vrot.lane.b32.xlu1 %v9316_v15, %s9076_s17  ;;  %v4156_v12 = vld [vmem:[#allocation2 + $0x3d0] sm:$0xff] }
 0x2d8   :  { %v8575_v34 = vpack.c.bf16 %v4152_v21, %v4151_v13  ;;  %8574 = vmatpush3.bf16.msra.mxu0 %v8571_v22  ;;  %v10147_v46 = vpop.permute.xlu0 %5091  ;;  %8010 = vmatprep.mubr.msk.f32.mxu0 %vm111_vm0, %v4038_v26  ;;  %v4386_v21 = vmul.f32 %v9854_v20, %v9737_v35  ;;  %v4385_v13 = vmul.f32 %v9857_v62, %v9737_v35 }
 0x2d9   :  { %v10150_v3 = vpop.permute.xlu1 %2400 }
 0x2da   :  { %6149 = vrot.lane.b32.xlu0 %v9392_v31, %s9077_s18  ;;  %8576 = vmatprep.subr.bf16.mxu0 %v8575_v34  ;;  %v8587_v62 = vpack.c.bf16 %v4386_v21, %v4385_v13  ;;  %v2052_v21 = vld [vmem:[#allocation2 + $0x1e8] sm:$0xff]  ;;  %v4504_v13 = vmul.f32 %v9872_v36, %v9765_v53 }
 0x2db   :  { %8011 = vmatmul.mubr.msk.f32.gmra.mrb[10].mxu0 %vm111_vm0, %v4039_v52  ;;  %5915 = vrot.lane.b32.xlu1 %v9530_v28, %s9075_s14  ;;  %v4272_v52 = vld [vmem:[#allocation2 + $0x3e0] sm:$0xff] }
 0x2dc   :  { %8578 = vmatpush3.bf16.msra.mxu0 %v8575_v34  ;;  %v10157_v29 = vpop.permute.xlu0 %5209  ;;  %8021 = vmatprep.mubr.msk.f32.mxu0 %vm111_vm0, %v4154_v61 }
 0x2dd   :  { %8580 = vmatprep.subr.bf16.mxu0 %v8579_v5  ;;  %v4264_v22 = vpop.permute.xlu1 %4263 }
 0x2de   :  { %v4269_v26 = vmul.f32 %v4264_v22, %v9693_v48  ;;  %2894 = vrot.lane.b32.xlu0 %v9314_v14, %s9076_s17  ;;  %v4157_v48 = vld [vmem:[#allocation2 + $0x3d8] sm:$0xff] }
 0x2df   :  { %8022 = vmatmul.mubr.msk.f32.vlgmr.msra.gmra.mrb[8].mxu0 %vm111_vm0, %v4155_v30  ;;  %3010 = vrot.lane.b32.xlu1 %v9251_v0, %s9077_s18  ;;  %v4273_v30 = vld [vmem:[#allocation2 + $0x3e8] sm:$0xff] }
 0x2e0   :  { %v8583_v9 = vpack.c.bf16 %v4270_v17, %v4269_v26  ;;  %8582 = vmatpush3.bf16.msra.mxu0 %v8579_v5  ;;  %v2041_v51 = vpop.permute.xlu0 %2040  ;;  %8024 = vmatprep.mubr.msk.f32.mxu0 %vm111_vm0, %v4156_v12  ;;  %v4274_v12 = vld [vmem:[#allocation2 + $0x3f0] sm:$0xff]  ;;  %v4388_v17 = vmul.f32 %v10072_v50, %v9737_v35 }
 0x2e1   :  { %v2049_v34 = vmul.f32 %v9957_v4, %v2041_v51  ;;  %v10176_v20 = vpop.permute.xlu1 %5675  ;;  %v10785_v51 = vld [vmem:[#allocation6_spill] sm:$0xff] }
 0x2e2   :  { %6153 = vrot.lane.b32.xlu0 %v9528_v23, %s9077_s18  ;;  %8584 = vmatprep.subr.bf16.mxu0 %v8583_v9 }
 0x2e3   :  { %v8439_v61 = vpack.c.bf16 %v2049_v34, %v2048_v24  ;;  %8025 = vmatmul.mubr.msk.f32.gmra.mrb[10].mxu0 %vm111_vm0, %v4157_v48  ;;  %6033 = vrot.lane.b32.xlu1 %v9530_v28, %s9076_s17  ;;  %v10202_v48 = vrot.slane %v10186_v44, %v10785_v51  ;;  %v4275_v24 = vld [vmem:[#allocation2 + $0x3f8] sm:$0xff] }
 0x2e4   :  { %8586 = vmatpush3.bf16.msra.mxu0 %v8583_v9  ;;  %v10188_v5 = vpop.permute.xlu0 %5327  ;;  %8035 = vmatprep.mubr.msk.f32.mxu0 %vm111_vm0, %v4272_v52  ;;  %v4503_v9 = vmul.f32 %v9875_v7, %v9765_v53  ;;  %v4390_v52 = vld [vmem:[#allocation2 + $0x400] sm:$0xff] }
 0x2e5   :  { %8588 = vmatprep.subr.bf16.mxu0 %v8587_v62  ;;  %v4382_v22 = vpop.permute.xlu1 %4381  ;;  %8440 = vmatprep.subr.bf16.mxu1 %v8439_v61  ;;  %v2168_v36 = vmul.f32 %v10202_v48, %v10010_v6 }
 0x2e6   :  { %v4387_v26 = vmul.f32 %v4382_v22, %v9737_v35  ;;  %3012 = vrot.lane.b32.xlu0 %v9249_v63, %s9077_s18  ;;  %8442 = vmatpush3.bf16.msra.mxu1 %v8439_v61 }
 0x2e7   :  { %8036 = vmatmul.mubr.msk.f32.vlgmr.msra.gmra.mrb[8].mxu0 %vm111_vm0, %v4273_v30  ;;  %6151 = vrot.lane.b32.xlu1 %v9530_v28, %s9077_s18  ;;  %v4391_v30 = vld [vmem:[#allocation2 + $0x408] sm:$0xff] }
 0x2e8   :  { %v8591_v35 = vpack.c.bf16 %v4388_v17, %v4387_v26  ;;  %8590 = vmatpush3.bf16.msra.mxu0 %v8587_v62  ;;  %v2159_v50 = vpop.permute.xlu0 %2158  ;;  %8038 = vmatprep.mubr.msk.f32.mxu0 %vm111_vm0, %v4274_v12  ;;  %v8595_v62 = vpack.c.bf16 %v4504_v13, %v4503_v9  ;;  %v4392_v12 = vld [vmem:[#allocation2 + $0x410] sm:$0xff]  ;;  %v4622_v26 = vmul.f32 %v9886_v38, %v9797_v57 }
 0x2e9   :  { %v2169_v7 = vmul.f32 %v10202_v48, %v2159_v50  ;;  %v10211_v34 = vpop.permute.xlu1 %2404  ;;  %7784 = vmatmul.mubr.msk.f32.vlgmr.msra.gmra.mrb[0].mxu1 %vm111_vm0, %v2052_v21  ;;  %v4621_v21 = vmul.f32 %v9889_v45, %v9797_v57  ;;  %v2170_v9 = vmul.f32 %v10202_v48, %v10051_v32 }
 0x2ea   :  { %6267 = vrot.lane.b32.xlu0 %v9392_v31, %s9078_s20  ;;  %8592 = vmatprep.subr.bf16.mxu0 %v8591_v35  ;;  %v4506_v31 = vmul.f32 %v10082_v59, %v9765_v53 }
 0x2eb   :  { %v8443_v61 = vpack.c.bf16 %v2169_v7, %v2168_v36  ;;  %8039 = vmatmul.mubr.msk.f32.gmra.mrb[10].mxu0 %vm111_vm0, %v4275_v24  ;;  %6265 = vrot.lane.b32.xlu1 %v9394_v33, %s9078_s20  ;;  %v2053_v33 = vld [vmem:[#allocation2 + $0x1f0] sm:$0xff]  ;;  %v8603_v45 = vpack.c.bf16 %v4622_v26, %v4621_v21  ;;  %v4509_v24 = vld [vmem:[#allocation2 + $0x428] sm:$0xff] }
 0x2ec   :  { %8594 = vmatpush3.bf16.msra.mxu0 %v8591_v35  ;;  %v10219_v6 = vpop.permute.xlu0 %5441  ;;  %8049 = vmatprep.mubr.msk.f32.mxu0 %vm111_vm0, %v4390_v52  ;;  %v4508_v35 = vld [vmem:[#allocation2 + $0x420] sm:$0xff]  ;;  %v4510_v7 = vld [vmem:[#allocation2 + $0x430] sm:$0xff]  ;;  %v2174_v21 = vld [vmem:[#allocation2 + $0x208] sm:$0xff] }
 0x2ed   :  { %8596 = vmatprep.subr.bf16.mxu0 %v8595_v62  ;;  %v4500_v22 = vpop.permute.xlu1 %4499  ;;  %8444 = vmatprep.subr.bf16.mxu1 %v8443_v61 }
 0x2ee   :  { %v4505_v17 = vmul.f32 %v4500_v22, %v9765_v53  ;;  %3016 = vrot.lane.b32.xlu0 %v9314_v14, %s9077_s18  ;;  %8446 = vmatpush3.bf16.msra.mxu1 %v8443_v61  ;;  %v4393_v53 = vld [vmem:[#allocation2 + $0x418] sm:$0xff]  ;;  %v4739_v61 = vmul.f32 %v9907_v10, %v9829_v60 }
 0x2ef   :  { %8050 = vmatmul.mubr.msk.f32.vlgmr.msra.gmra.mrb[8].mxu0 %vm111_vm0, %v4391_v30  ;;  %3014 = vrot.lane.b32.xlu1 %v9316_v15, %s9077_s18  ;;  %v10786_v30 = vld [vmem:[#allocation7_spill] sm:$0xff] }
 0x2f0   :  { %v8599_v13 = vpack.c.bf16 %v4506_v31, %v4505_v17  ;;  %8598 = vmatpush3.bf16.msra.mxu0 %v8595_v62  ;;  %v2163_v59 = vpop.permute.xlu0 %2162  ;;  %8052 = vmatprep.mubr.msk.f32.mxu0 %vm111_vm0, %v4392_v12  ;;  %v4740_v62 = vmul.f32 %v9904_v1, %v9829_v60  ;;  %v10260_v22 = vrot.slane %v10186_v44, %v10786_v30  ;;  %v4626_v31 = vld [vmem:[#allocation2 + $0x440] sm:$0xff]  ;;  %v4745_v30 = vld [vmem:[#allocation2 + $0x468] sm:$0xff] }
 0x2f1   :  { %v2171_v51 = vmul.f32 %v10202_v48, %v2163_v59  ;;  %v10238_v38 = vpop.permute.xlu1 %2522  ;;  %7786 = vmatprep.mubr.msk.f32.mxu1 %vm111_vm0, %v2053_v33  ;;  %v7095_v59 = vld [vmem:[%s10752_s4 + $0x20] sm:$0xff] }
 0x2f2   :  { %6271 = vrot.lane.b32.xlu0 %v9528_v23, %s9078_s20  ;;  %8600 = vmatprep.subr.bf16.mxu0 %v8599_v13  ;;  %v4624_v23 = vmul.f32 %v10097_v37, %v9797_v57  ;;  %v4511_v37 = vld [vmem:[#allocation2 + $0x438] sm:$0xff]  ;;  %v2290_v1 = vmul.f32 %v10260_v22, %v10075_v11  ;;  %v8611_v17 = vpack.c.bf16 %v4740_v62, %v4739_v61  ;;  %v7096_v11 = vld [vmem:[%s10752_s4 + $0x28] sm:$0xff] }
 0x2f3   :  { %v8447_v50 = vpack.c.bf16 %v2171_v51, %v2170_v9  ;;  %8053 = vmatmul.mubr.msk.f32.gmra.mrb[10].mxu0 %vm111_vm0, %v4393_v53  ;;  %6269 = vrot.lane.b32.xlu1 %v9530_v28, %s9078_s20  ;;  %v2054_v28 = vld [vmem:[#allocation2 + $0x1f8] sm:$0xff]  ;;  %v4628_v9 = vld [vmem:[#allocation2 + $0x450] sm:$0xff] }
 0x2f4   :  { %8602 = vmatpush3.bf16.msra.mxu0 %v8599_v13  ;;  %v10246_v32 = vpop.permute.xlu0 %5445  ;;  %8063 = vmatprep.mubr.msk.f32.mxu0 %vm111_vm0, %v4508_v35  ;;  %v7098_v51 = vld [vmem:[%s10752_s4 + $0x38] sm:$0xff]  ;;  %v4858_v35 = vmul.f32 %v9918_v47, %v9861_v2  ;;  %v7097_v47 = vld [vmem:[%s10752_s4 + $0x30] sm:$0xff] }
 0x2f5   :  { %8604 = vmatprep.subr.bf16.mxu0 %v8603_v45  ;;  %v4618_v36 = vpop.permute.xlu1 %4617  ;;  %8448 = vmatprep.subr.bf16.mxu1 %v8447_v50 }
 0x2f6   :  { %v4623_v52 = vmul.f32 %v4618_v36, %v9797_v57  ;;  %3134 = vrot.lane.b32.xlu0 %v9249_v63, %s9078_s20  ;;  %8450 = vmatpush3.bf16.msra.mxu1 %v8447_v50  ;;  %v4629_v50 = vld [vmem:[#allocation2 + $0x458] sm:$0xff]  ;;  %v2292_v36 = vmul.f32 %v10260_v22, %v10125_v40  ;;  %v3255_v40 = vld [vmem:[%s10752_s4 + $0x8] sm:$0xff] }
 0x2f7   :  { %8064 = vmatmul.mubr.msk.f32.vlgmr.msra.gmra.mrb[8].mxu0 %vm111_vm0, %v4509_v24  ;;  %3132 = vrot.lane.b32.xlu1 %v9251_v0, %s9078_s20  ;;  %v2173_v0 = vld [vmem:[#allocation2 + $0x200] sm:$0xff]  ;;  %v2175_v24 = vld [vmem:[#allocation2 + $0x210] sm:$0xff] }
 0x2f8   :  { %v8607_v57 = vpack.c.bf16 %v4624_v23, %v4623_v52  ;;  %8606 = vmatpush3.bf16.msra.mxu0 %v8603_v45  ;;  %v2281_v63 = vpop.permute.xlu0 %2280  ;;  %8066 = vmatprep.mubr.msk.f32.mxu0 %vm111_vm0, %v4510_v7  ;;  %v4857_v45 = vmul.f32 %v9921_v41, %v9861_v2  ;;  %v4744_v41 = vld [vmem:[#allocation2 + $0x460] sm:$0xff] }
 0x2f9   :  { %v2291_v10 = vmul.f32 %v10260_v22, %v2281_v63  ;;  %v10269_v12 = vpop.permute.xlu1 %5793  ;;  %7787 = vmatmul.mubr.msk.f32.gmra.mrb[2].mxu1 %vm111_vm0, %v2054_v28  ;;  %v4860_v63 = vmul.f32 %v10122_v58, %v9861_v2  ;;  %v4975_v58 = vmul.f32 %v9939_v39, %v9893_v55  ;;  %v3256_v39 = vld [vmem:[%s10752_s4 + $0x10] sm:$0xff] }
 0x2fa   :  { %3138 = vrot.lane.b32.xlu0 %v9314_v14, %s9078_s20  ;;  %8608 = vmatprep.subr.bf16.mxu0 %v8607_v57  ;;  %v4627_v14 = vld [vmem:[#allocation2 + $0x448] sm:$0xff]  ;;  %v8619_v28 = vpack.c.bf16 %v4858_v35, %v4857_v45 }
 0x2fb   :  { %v8451_v33 = vpack.c.bf16 %v2291_v10, %v2290_v1  ;;  %8067 = vmatmul.mubr.msk.f32.gmra.mrb[10].mxu0 %vm111_vm0, %v4511_v37  ;;  %3136 = vrot.lane.b32.xlu1 %v9316_v15, %s9078_s20  ;;  %v4742_v15 = vmul.f32 %v10107_v27, %v9829_v60  ;;  %v4746_v1 = vld [vmem:[#allocation2 + $0x470] sm:$0xff]  ;;  %v10787_v10 = vld [vmem:[#allocation8_spill] sm:$0xff]  ;;  %v2296_v35 = vld [vmem:[#allocation2 + $0x228] sm:$0xff] }
 0x2fc   :  { %8610 = vmatpush3.bf16.msra.mxu0 %v8607_v57  ;;  %v10280_v26 = vpop.permute.xlu0 %5559  ;;  %8077 = vmatprep.mubr.msk.f32.mxu0 %vm111_vm0, %v4626_v31  ;;  %v3254_v57 = vld [vmem:[%s10752_s4] sm:$0xff]  ;;  %v10324_v31 = vrot.slane %v10186_v44, %v10787_v10 }
 0x2fd   :  { %8612 = vmatprep.subr.bf16.mxu0 %v8611_v17  ;;  %v4736_v13 = vpop.permute.xlu1 %4735  ;;  %7797 = vmatprep.mubr.msk.f32.mxu1 %vm111_vm0, %v2173_v0  ;;  %v3257_v0 = vld [vmem:[%s10752_s4 + $0x18] sm:$0xff] }
 0x2fe   :  { %v4741_v53 = vmul.f32 %v4736_v13, %v9829_v60  ;;  %8452 = vmatprep.subr.bf16.mxu1 %v8451_v33  ;;  %6395 = vperm.xlu0 %8974, %v7096_v11  }
 0x2ff   :  { %7798 = vmatmul.mubr.msk.f32.vlgmr.msra.gmra.mrb[0].mxu1 %vm111_vm0, %v2174_v21  ;;  %8078 = vmatmul.mubr.msk.f32.vlgmr.msra.gmra.mrb[8].mxu0 %vm111_vm0, %v4627_v14  ;;  %v2295_v21 = vld [vmem:[#allocation2 + $0x220] sm:$0xff]  ;;  %v2412_v14 = vmul.f32 %v10324_v31, %v10150_v3 }
 0x300   :  { %v8615_v27 = vpack.c.bf16 %v4742_v15, %v4741_v53  ;;  %8454 = vmatpush3.bf16.msra.mxu1 %v8451_v33  ;;  %6390 = vperm.xlu1 %8973, %v7095_v59   ;;  %v2285_v60 = vpop.permute.xlu0 %2284  ;;  %v4976_v33 = vmul.f32 %v9936_v43, %v9893_v55  ;;  %v4747_v43 = vld [vmem:[#allocation2 + $0x478] sm:$0xff]  ;;  %v4862_v15 = vld [vmem:[#allocation2 + $0x480] sm:$0xff] }
 0x301   :  { %8614 = vmatpush3.bf16.msra.mxu0 %v8611_v17  ;;  %v2293_v7 = vmul.f32 %v10260_v22, %v2285_v60  ;;  %8080 = vmatprep.mubr.msk.f32.mxu0 %vm111_vm0, %v4628_v9  ;;  %v10303_v23 = vpop.permute.xlu1 %2526  ;;  %v2176_v17 = vld [vmem:[#allocation2 + $0x218] sm:$0xff]  ;;  %v4978_v60 = vmul.f32 %v10132_v54, %v9893_v55 }
 0x302   :  { %6405 = vperm.xlu0 %8974, %v7098_v51   ;;  %8616 = vmatprep.subr.bf16.mxu0 %v8615_v27  ;;  %v8627_v3 = vpack.c.bf16 %v4976_v33, %v4975_v58  ;;  %v6632_v51 = vld [vmem:[%s10754_s6 + $0x8] sm:$0xff]  ;;  %v6634_v54 = vld [vmem:[%s10754_s6 + $0x18] sm:$0xff]  ;;  %v4982_v58 = vld [vmem:[#allocation2 + $0x4d0] sm:$0xff] }
 0x303   :  { %v8455_v52 = vpack.c.bf16 %v2293_v7, %v2292_v36  ;;  %8081 = vmatmul.mubr.msk.f32.gmra.mrb[10].mxu0 %vm111_vm0, %v4629_v50  ;;  %7800 = vmatprep.mubr.msk.f32.mxu1 %vm111_vm0, %v2175_v24  ;;  %v6631_v24 = vld [vmem:[%s10754_s6] sm:$0xff]  ;;  %v4864_v36 = vld [vmem:[#allocation2 + $0x490] sm:$0xff]  ;;  %v5094_v7 = vmul.f32 %v9950_v19, %v9925_v56 }
 0x304   :  { %6400 = vperm.xlu1 %8973, %v7097_v47   ;;  %v10313_v62 = vpop.permute.xlu0 %5563  ;;  %8091 = vmatprep.mubr.msk.f32.mxu0 %vm111_vm0, %v4744_v41  ;;  %v5093_v47 = vmul.f32 %v9953_v8, %v9925_v56  ;;  %v4865_v8 = vld [vmem:[#allocation2 + $0x498] sm:$0xff] }
 0x305   :  { %8618 = vmatpush3.bf16.msra.mxu0 %v8615_v27  ;;  %v4854_v61 = vpop.permute.xlu1 %4853  ;;  %8456 = vmatprep.subr.bf16.mxu1 %v8455_v52  ;;  %v4863_v27 = vld [vmem:[#allocation2 + $0x488] sm:$0xff] }
 0x306   :  { %8620 = vmatprep.subr.bf16.mxu0 %v8619_v28  ;;  %v4859_v37 = vmul.f32 %v4854_v61, %v9861_v2  ;;  %3265 = vperm.xlu0 %8974, %v3255_v40   ;;  %v2414_v40 = vmul.f32 %v10324_v31, %v10211_v34  ;;  %v2298_v61 = vld [vmem:[#allocation2 + $0x238] sm:$0xff]  ;;  %v8635_v34 = vpack.c.bf16 %v5094_v7, %v5093_v47 }
 0x307   :  { %8458 = vmatpush3.bf16.msra.mxu1 %v8455_v52  ;;  %v2297_v52 = vld [vmem:[#allocation2 + $0x230] sm:$0xff]  ;;  %v5330_v7 = vmul.f32 %v9982_v18, %v10202_v48  ;;  %v5329_v47 = vmul.f32 %v9985_v49, %v10202_v48  ;;  %v5101_v18 = vld [vmem:[#allocation2 + $0x4f8] sm:$0xff] }
 0x308   :  { %v8623_v11 = vpack.c.bf16 %v4860_v63, %v4859_v37  ;;  %8092 = vmatmul.mubr.msk.f32.vlgmr.msra.gmra.mrb[8].mxu0 %vm111_vm0, %v4745_v30  ;;  %3260 = vperm.xlu1 %8973, %v3254_v57   ;;  %v2403_v2 = vpop.permute.xlu0 %2402  ;;  %v6633_v30 = vld [vmem:[%s10754_s6 + $0x10] sm:$0xff]  ;;  %v4980_v63 = vld [vmem:[#allocation2 + $0x4c0] sm:$0xff] }
 0x309   :  { %8622 = vmatpush3.bf16.msra.mxu0 %v8619_v28  ;;  %v2413_v13 = vmul.f32 %v10324_v31, %v2403_v2  ;;  %8094 = vmatprep.mubr.msk.f32.mxu0 %vm111_vm0, %v4746_v1  ;;  %v10338_v59 = vpop.permute.xlu1 %2644  ;;  %v2417_v1 = vld [vmem:[#allocation2 + $0x240] sm:$0xff] }
 0x30a   :  { %3275 = vperm.xlu0 %8974, %v3257_v0   ;;  %7801 = vmatmul.mubr.msk.f32.gmra.mrb[2].mxu1 %vm111_vm0, %v2176_v17  ;;  %v4981_v0 = vld [vmem:[#allocation2 + $0x4c8] sm:$0xff]  ;;  %v5096_v17 = vmul.f32 %v10147_v46, %v9925_v56 }
 0x30b   :  { %v8459_v53 = vpack.c.bf16 %v2413_v13, %v2412_v14  ;;  %8624 = vmatprep.subr.bf16.mxu0 %v8623_v11  ;;  %7811 = vmatprep.mubr.msk.f32.mxu1 %vm111_vm0, %v2295_v21  ;;  %v5212_v21 = vmul.f32 %v9968_v42, %v9957_v4  ;;  %v5211_v14 = vmul.f32 %v9971_v25, %v9957_v4  ;;  %v4983_v42 = vld [vmem:[#allocation2 + $0x4d8] sm:$0xff]  ;;  %v5098_v25 = vld [vmem:[#allocation2 + $0x4e0] sm:$0xff] }
 0x30c   :  { %8095 = vmatmul.mubr.msk.f32.gmra.mrb[10].mxu0 %vm111_vm0, %v4747_v43  ;;  %3270 = vperm.xlu1 %8973, %v3256_v39   ;;  %v10346_v9 = vpop.permute.xlu0 %5677 }
 0x30d   :  { %8626 = vmatpush3.bf16.msra.mxu0 %v8623_v11  ;;  %8105 = vmatprep.mubr.msk.f32.mxu0 %vm111_vm0, %v4862_v15  ;;  %v4972_v45 = vpop.permute.xlu1 %4971  ;;  %v10788_v11 = vld [vmem:[#allocation9_spill] sm:$0xff] }
 0x30e   :  { %8628 = vmatprep.subr.bf16.mxu0 %v8627_v3  ;;  %v4977_v50 = vmul.f32 %v4972_v45, %v9893_v55  ;;  %8460 = vmatprep.subr.bf16.mxu1 %v8459_v53  ;;  %v10387_v2 = vrot.slane %v10186_v44, %v10788_v11  ;;  %v5099_v45 = vld [vmem:[#allocation2 + $0x4e8] sm:$0xff] }
 0x30f   :  { %6642 = vperm.xlu0 %8974, %v6632_v51   ;;  %7812 = vmatmul.mubr.msk.f32.vlgmr.msra.gmra.mrb[0].mxu1 %vm111_vm0, %v2296_v35  ;;  %v8643_v51 = vpack.c.bf16 %v5212_v21, %v5211_v14  ;;  %v5219_v21 = vld [vmem:[#allocation2 + $0x518] sm:$0xff]  ;;  %v10791_v14 = vld [vmem:[#allocation15_spill] sm:$0xff] }
 0x310   :  { %v8631_v41 = vpack.c.bf16 %v4978_v60, %v4977_v50  ;;  %8462 = vmatpush3.bf16.msra.mxu1 %v8459_v53  ;;  %8106 = vmatmul.mubr.msk.f32.vlgmr.msra.gmra.mrb[8].mxu0 %vm111_vm0, %v4863_v27  ;;  %v2407_v55 = vpop.permute.xlu0 %2406  ;;  %v2534_v43 = vmul.f32 %v10387_v2, %v10238_v38  ;;  %v2419_v53 = vld [vmem:[#allocation2 + $0x250] sm:$0xff]  ;;  %v2420_v27 = vld [vmem:[#allocation2 + $0x258] sm:$0xff]  ;;  %v5214_v60 = vmul.f32 %v10157_v29, %v9957_v4 }
 0x311   :  { %6637 = vperm.xlu1 %8973, %v6631_v24   ;;  %8630 = vmatpush3.bf16.msra.mxu0 %v8627_v3  ;;  %v2415_v19 = vmul.f32 %v10324_v31, %v2407_v55  ;;  %v10370_v28 = vpop.permute.xlu1 %5911  ;;  %v5100_v24 = vld [vmem:[#allocation2 + $0x4f0] sm:$0xff]  ;;  %v2536_v29 = vmul.f32 %v10387_v2, %v10303_v23 }
 0x312   :  { %8108 = vmatprep.mubr.msk.f32.mxu0 %vm111_vm0, %v4864_v36  ;;  %8632 = vmatprep.subr.bf16.mxu0 %v8631_v41  ;;  %v2539_v36 = vld [vmem:[#allocation2 + $0x260] sm:$0xff] }
 0x313   :  { %v8463_v57 = vpack.c.bf16 %v2415_v19, %v2414_v40  ;;  %6652 = vperm.xlu0 %8974, %v6634_v54   ;;  %7814 = vmatprep.mubr.msk.f32.mxu1 %vm111_vm0, %v2297_v52  ;;  %v5216_v52 = vld [vmem:[#allocation2 + $0x500] sm:$0xff]  ;;  %v8651_v40 = vpack.c.bf16 %v5330_v7, %v5329_v47 }
 0x314   :  { %8109 = vmatmul.mubr.msk.f32.gmra.mrb[10].mxu0 %vm111_vm0, %v4865_v8  ;;  %v10378_v37 = vpop.permute.xlu0 %5681  ;;  %7815 = vmatmul.mubr.msk.f32.gmra.mrb[2].mxu1 %vm111_vm0, %v2298_v61  ;;  %v5217_v8 = vld [vmem:[#allocation2 + $0x508] sm:$0xff]  ;;  %v5332_v61 = vmul.f32 %v10188_v5, %v10202_v48  ;;  %v2541_v5 = vld [vmem:[#allocation2 + $0x270] sm:$0xff] }
 0x315   :  { %6647 = vperm.xlu1 %8973, %v6633_v30   ;;  %8634 = vmatpush3.bf16.msra.mxu0 %v8631_v41  ;;  %v5090_v10 = vpop.permute.xlu1 %5089 }
 0x316   :  { %8636 = vmatprep.subr.bf16.mxu0 %v8635_v34  ;;  %8119 = vmatprep.mubr.msk.f32.mxu0 %vm111_vm0, %v4980_v63  ;;  %v5095_v33 = vmul.f32 %v5090_v10, %v9925_v56  ;;  %v2418_v56 = vld [vmem:[#allocation2 + $0x248] sm:$0xff]  ;;  %v10789_v63 = vld [vmem:[#allocation5_spill] sm:$0xff] }
 0x317   :  { %8464 = vmatprep.subr.bf16.mxu1 %v8463_v57  ;;  %7825 = vmatprep.mubr.msk.f32.mxu1 %vm111_vm0, %v2417_v1  ;;  %v2540_v10 = vld [vmem:[#allocation2 + $0x268] sm:$0xff] }
 0x318   :  { %v8639_v46 = vpack.c.bf16 %v5096_v17, %v5095_v33  ;;  %8466 = vmatpush3.bf16.msra.mxu1 %v8463_v57  ;;  %8120 = vmatmul.mubr.msk.f32.vlgmr.msra.gmra.mrb[8].mxu0 %vm111_vm0, %v4981_v0  ;;  %v2525_v13 = vpop.permute.xlu0 %2524  ;;  %v5218_v57 = vld [vmem:[#allocation2 + $0x510] sm:$0xff]  ;;  %v5448_v0 = vmul.f32 %v10219_v6, %v10260_v22  ;;  %v5334_v6 = vld [vmem:[#allocation2 + $0x520] sm:$0xff] }
 0x319   :  { %8638 = vmatpush3.bf16.msra.mxu0 %v8635_v34  ;;  %v2535_v39 = vmul.f32 %v10387_v2, %v2525_v13  ;;  %8122 = vmatprep.mubr.msk.f32.mxu0 %vm111_vm0, %v4982_v58  ;;  %v10399_v15 = vpop.permute.xlu1 %2648  ;;  %v10790_v34 = vsub.s32 4, %v10789_v63 }
 0x31a   :  { %8640 = vmatprep.subr.bf16.mxu0 %v8639_v46 }
 0x31b   :  { %v8467_v3 = vpack.c.bf16 %v2535_v39, %v2534_v43  ;;  %7826 = vmatmul.mubr.msk.f32.vlgmr.msra.gmra.mrb[0].mxu1 %vm111_vm0, %v2418_v56  ;;  %v10433_v1 = vrot.slane %v10186_v44, %v10790_v34  ;;  %v5335_v39 = vld [vmem:[#allocation2 + $0x528] sm:$0xff] }
 0x31c   :  { %8123 = vmatmul.mubr.msk.f32.gmra.mrb[10].mxu0 %vm111_vm0, %v4983_v42  ;;  %v10403_v35 = vpop.permute.xlu0 %5795  ;;  %7828 = vmatprep.mubr.msk.f32.mxu1 %vm111_vm0, %v2419_v53  ;;  %v2542_v42 = vld [vmem:[#allocation2 + $0x278] sm:$0xff]  ;;  %v5450_v53 = vmul.f32 %v10246_v32, %v10260_v22 }
 0x31d   :  { %8642 = vmatpush3.bf16.msra.mxu0 %v8639_v46  ;;  %8133 = vmatprep.mubr.msk.f32.mxu0 %vm111_vm0, %v5098_v25  ;;  %v5208_v38 = vpop.permute.xlu1 %5207  ;;  %v5447_v46 = vmul.f32 %v10791_v14, %v10260_v22 }
 0x31e   :  { %8644 = vmatprep.subr.bf16.mxu0 %v8643_v51  ;;  %v5213_v50 = vmul.f32 %v5208_v38, %v9957_v4  ;;  %8468 = vmatprep.subr.bf16.mxu1 %v8467_v3  ;;  %v5566_v38 = vmul.f32 %v10280_v26, %v10324_v31  ;;  %v5452_v26 = vld [vmem:[#allocation2 + $0x540] sm:$0xff] }
 0x31f   :  { %8470 = vmatpush3.bf16.msra.mxu1 %v8467_v3  ;;  %v8659_v56 = vpack.c.bf16 %v5448_v0, %v5447_v46  ;;  %v5336_v3 = vld [vmem:[#allocation2 + $0x530] sm:$0xff]  ;;  %v5571_v0 = vld [vmem:[#allocation2 + $0x568] sm:$0xff] }
 0x320   :  { %v8647_v41 = vpack.c.bf16 %v5214_v60, %v5213_v50  ;;  %8134 = vmatmul.mubr.msk.f32.vlgmr.msra.gmra.mrb[8].mxu0 %vm111_vm0, %v5099_v45  ;;  %v2529_v55 = vpop.permute.xlu0 %2528  ;;  %7829 = vmatmul.mubr.msk.f32.gmra.mrb[2].mxu1 %vm111_vm0, %v2420_v27  ;;  %v2658_v60 = vmul.f32 %v10433_v1, %v10399_v15  ;;  %v5337_v50 = vld [vmem:[#allocation2 + $0x538] sm:$0xff] }
 0x321   :  { %8646 = vmatpush3.bf16.msra.mxu0 %v8643_v51  ;;  %v2537_v4 = vmul.f32 %v10387_v2, %v2529_v55  ;;  %8136 = vmatprep.mubr.msk.f32.mxu0 %vm111_vm0, %v5100_v24  ;;  %v10420_v54 = vpop.permute.xlu1 %2766  ;;  %v2661_v51 = vld [vmem:[#allocation2 + $0x280] sm:$0xff]  ;;  %v5565_v24 = vmul.f32 %v10100_v16, %v10324_v31  ;;  %v5568_v55 = vmul.f32 %v10313_v62, %v10324_v31 }
 0x322   :  { %8648 = vmatprep.subr.bf16.mxu0 %v8647_v41  ;;  %7839 = vmatprep.mubr.msk.f32.mxu1 %vm111_vm0, %v2539_v36 }
 0x323   :  { %v8471_v49 = vpack.c.bf16 %v2537_v4, %v2536_v29  ;;  %v8667_v7 = vpack.c.bf16 %v5566_v38, %v5565_v24  ;;  %v5454_v29 = vld [vmem:[#allocation2 + $0x550] sm:$0xff]  ;;  %v5691_v24 = vld [vmem:[#allocation2 + $0x598] sm:$0xff] }
 0x324   :  { %8137 = vmatmul.mubr.msk.f32.gmra.mrb[10].mxu0 %vm111_vm0, %v5101_v18  ;;  %v10424_v19 = vpop.permute.xlu0 %5799  ;;  %v10792_v4 = vld [vmem:[#allocation11_spill] sm:$0xff] }
 0x325   :  { %8650 = vmatpush3.bf16.msra.mxu0 %v8647_v41  ;;  %8147 = vmatprep.mubr.msk.f32.mxu0 %vm111_vm0, %v5216_v52  ;;  %v5326_v23 = vpop.permute.xlu1 %5325  ;;  %v5453_v41 = vld [vmem:[#allocation2 + $0x548] sm:$0xff]  ;;  %v10475_v18 = vrot.slane %v10186_v44, %v10792_v4  ;;  %v5808_v4 = vld [vmem:[#allocation2 + $0x5b0] sm:$0xff] }
 0x326   :  { %8652 = vmatprep.subr.bf16.mxu0 %v8651_v40  ;;  %v5331_v30 = vmul.f32 %v5326_v23, %v10202_v48  ;;  %8472 = vmatprep.subr.bf16.mxu1 %v8471_v49  ;;  %v2656_v48 = vmul.f32 %v10433_v1, %v10338_v59  ;;  %v2662_v52 = vld [vmem:[#allocation2 + $0x288] sm:$0xff] }
 0x327   :  { %8474 = vmatpush3.bf16.msra.mxu1 %v8471_v49  ;;  %v5684_v49 = vmul.f32 %v10346_v9, %v10387_v2  ;;  %v2778_v62 = vmul.f32 %v10475_v18, %v10420_v54  ;;  %v5570_v9 = vld [vmem:[#allocation2 + $0x560] sm:$0xff] }
 0x328   :  { %v8655_v17 = vpack.c.bf16 %v5332_v61, %v5331_v30  ;;  %8148 = vmatmul.mubr.msk.f32.vlgmr.msra.gmra.mrb[8].mxu0 %vm111_vm0, %v5217_v8  ;;  %v2647_v33 = vpop.permute.xlu0 %2646  ;;  %v2663_v8 = vld [vmem:[#allocation2 + $0x290] sm:$0xff]  ;;  %v5455_v30 = vld [vmem:[#allocation2 + $0x558] sm:$0xff] }
 0x329   :  { %8654 = vmatpush3.bf16.msra.mxu0 %v8651_v40  ;;  %v2657_v58 = vmul.f32 %v10433_v1, %v2647_v33  ;;  %8150 = vmatprep.mubr.msk.f32.mxu0 %vm111_vm0, %v5218_v57  ;;  %v10442_v11 = vpop.permute.xlu1 %6029  ;;  %v5683_v57 = vmul.f32 %v10176_v20, %v10387_v2  ;;  %v5686_v20 = vmul.f32 %v10378_v37, %v10387_v2 }
 0x32a   :  { %8656 = vmatprep.subr.bf16.mxu0 %v8655_v17  ;;  %7840 = vmatmul.mubr.msk.f32.vlgmr.msra.gmra.mrb[0].mxu1 %vm111_vm0, %v2540_v10 }
 0x32b   :  { %v8475_v13 = vpack.c.bf16 %v2657_v58, %v2656_v48  ;;  %7842 = vmatprep.mubr.msk.f32.mxu1 %vm111_vm0, %v2541_v5  ;;  %v8675_v34 = vpack.c.bf16 %v5684_v49, %v5683_v57  ;;  %v5572_v5 = vld [vmem:[#allocation2 + $0x570] sm:$0xff]  ;;  %v2783_v48 = vld [vmem:[#allocation2 + $0x2a0] sm:$0xff]  ;;  %v5802_v58 = vmul.f32 %v10403_v35, %v10433_v1 }
 0x32c   :  { %8151 = vmatmul.mubr.msk.f32.gmra.mrb[10].mxu0 %vm111_vm0, %v5219_v21  ;;  %v10449_v59 = vpop.permute.xlu0 %5913  ;;  %v5688_v35 = vld [vmem:[#allocation2 + $0x580] sm:$0xff] }
 0x32d   :  { %8658 = vmatpush3.bf16.msra.mxu0 %v8655_v17  ;;  %8161 = vmatprep.mubr.msk.f32.mxu0 %vm111_vm0, %v5334_v6  ;;  %v5444_v43 = vpop.permute.xlu1 %5443  ;;  %v2664_v17 = vld [vmem:[#allocation2 + $0x298] sm:$0xff] }
 0x32e   :  { %8660 = vmatprep.subr.bf16.mxu0 %v8659_v56  ;;  %v5449_v25 = vmul.f32 %v5444_v43, %v10260_v22  ;;  %8476 = vmatprep.subr.bf16.mxu1 %v8475_v13  ;;  %v5573_v6 = vld [vmem:[#allocation2 + $0x578] sm:$0xff] }
 0x32f   :  { %8478 = vmatpush3.bf16.msra.mxu1 %v8475_v13  ;;  %v5801_v13 = vmul.f32 %v10269_v12, %v10433_v1 }
 0x330   :  { %v8663_v45 = vpack.c.bf16 %v5450_v53, %v5449_v25  ;;  %8162 = vmatmul.mubr.msk.f32.vlgmr.msra.gmra.mrb[8].mxu0 %vm111_vm0, %v5335_v39  ;;  %v2651_v27 = vpop.permute.xlu0 %2650  ;;  %7843 = vmatmul.mubr.msk.f32.gmra.mrb[2].mxu1 %vm111_vm0, %v2542_v42  ;;  %v5689_v53 = vld [vmem:[#allocation2 + $0x588] sm:$0xff]  ;;  %v5804_v25 = vmul.f32 %v10424_v19, %v10433_v1 }
 0x331   :  { %8662 = vmatpush3.bf16.msra.mxu0 %v8659_v56  ;;  %v2659_v32 = vmul.f32 %v10433_v1, %v2651_v27  ;;  %8164 = vmatprep.mubr.msk.f32.mxu0 %vm111_vm0, %v5336_v3  ;;  %v2771_v22 = vpop.permute.xlu1 %2770  ;;  %v8683_v43 = vpack.c.bf16 %v5802_v58, %v5801_v13  ;;  %v5690_v3 = vld [vmem:[#allocation2 + $0x590] sm:$0xff]  ;;  %v5920_v27 = vmul.f32 %v10449_v59, %v10475_v18 }
 0x332   :  { %8664 = vmatprep.subr.bf16.mxu0 %v8663_v45  ;;  %7853 = vmatprep.mubr.msk.f32.mxu1 %vm111_vm0, %v2661_v51  ;;  %v2780_v46 = vmul.f32 %v10475_v18, %v2771_v22  ;;  %v10793_v51 = vld [vmem:[#allocation13_spill] sm:$0xff]  ;;  %v2785_v22 = vld [vmem:[#allocation2 + $0x2b0] sm:$0xff] }
 0x333   :  { %v8479_v36 = vpack.c.bf16 %v2659_v32, %v2658_v60  ;;  %v2899_v38 = vrot.slane %v10186_v44, %v10793_v51  ;;  %v2907_v58 = vld [vmem:[#allocation2 + $0x2d0] sm:$0xff] }
 0x334   :  { %8165 = vmatmul.mubr.msk.f32.gmra.mrb[10].mxu0 %vm111_vm0, %v5337_v50  ;;  %v10467_v47 = vpop.permute.xlu0 %5917 }
 0x335   :  { %8666 = vmatpush3.bf16.msra.mxu0 %v8663_v45  ;;  %8175 = vmatprep.mubr.msk.f32.mxu0 %vm111_vm0, %v5452_v26  ;;  %v5562_v15 = vpop.permute.xlu1 %5561  ;;  %v2784_v45 = vld [vmem:[#allocation2 + $0x2a8] sm:$0xff]  ;;  %v5919_v26 = vmul.f32 %v10370_v28, %v10475_v18  ;;  %v5922_v28 = vmul.f32 %v10467_v47, %v10475_v18 }
 0x336   :  { %8668 = vmatprep.subr.bf16.mxu0 %v8667_v7  ;;  %v5567_v16 = vmul.f32 %v5562_v15, %v10324_v31  ;;  %8480 = vmatprep.subr.bf16.mxu1 %v8479_v36 }
 0x337   :  { %8482 = vmatpush3.bf16.msra.mxu1 %v8479_v36  ;;  %v5806_v36 = vld [vmem:[#allocation2 + $0x5a0] sm:$0xff] }
 0x338   :  { %v8671_v40 = vpack.c.bf16 %v5568_v55, %v5567_v16  ;;  %8176 = vmatmul.mubr.msk.f32.vlgmr.msra.gmra.mrb[8].mxu0 %vm111_vm0, %v5453_v41  ;;  %v2769_v23 = vpop.permute.xlu0 %2768  ;;  %v5807_v55 = vld [vmem:[#allocation2 + $0x5a8] sm:$0xff]  ;;  %v2786_v16 = vld [vmem:[#allocation2 + $0x2b8] sm:$0xff] }
 0x339   :  { %8670 = vmatpush3.bf16.msra.mxu0 %v8667_v7  ;;  %v2779_v31 = vmul.f32 %v10475_v18, %v2769_v23  ;;  %8178 = vmatprep.mubr.msk.f32.mxu0 %vm111_vm0, %v5454_v29  ;;  %v2889_v61 = vpop.permute.xlu1 %2888  ;;  %v8691_v7 = vpack.c.bf16 %v5920_v27, %v5919_v26 }
 0x33a   :  { %8672 = vmatprep.subr.bf16.mxu0 %v8671_v40  ;;  %7854 = vmatmul.mubr.msk.f32.vlgmr.msra.gmra.mrb[0].mxu1 %vm111_vm0, %v2662_v52  ;;  %v2900_v50 = vmul.f32 %v2899_v38, %v2889_v61  ;;  %v2905_v52 = vld [vmem:[#allocation2 + $0x2c0] sm:$0xff] }
 0x33b   :  { %v8483_v63 = vpack.c.bf16 %v2779_v31, %v2778_v62  ;;  %7856 = vmatprep.mubr.msk.f32.mxu1 %vm111_vm0, %v2663_v8  ;;  %v5809_v31 = vld [vmem:[#allocation2 + $0x5b8] sm:$0xff]  ;;  %v5924_v61 = vld [vmem:[#allocation2 + $0x5c0] sm:$0xff] }
 0x33c   :  { %8179 = vmatmul.mubr.msk.f32.gmra.mrb[10].mxu0 %vm111_vm0, %v5455_v30  ;;  %v10489_v54 = vpop.permute.xlu0 %6031 }
 0x33d   :  { %8674 = vmatpush3.bf16.msra.mxu0 %v8671_v40  ;;  %8189 = vmatprep.mubr.msk.f32.mxu0 %vm111_vm0, %v5570_v9  ;;  %v5680_v10 = vpop.permute.xlu1 %5679  ;;  %v6038_v49 = vmul.f32 %v10489_v54, %v2899_v38  ;;  %v10794_v54 = vld [vmem:[#allocation14_spill] sm:$0xff] }
 0x33e   :  { %8676 = vmatprep.subr.bf16.mxu0 %v8675_v34  ;;  %v5685_v33 = vmul.f32 %v5680_v10, %v10387_v2  ;;  %8484 = vmatprep.subr.bf16.mxu1 %v8483_v63  ;;  %v3021_v10 = vrot.slane %v10186_v44, %v10794_v54  ;;  %v3150_v54 = vld [vmem:[#allocation2 + $0x308] sm:$0xff] }
 0x33f   :  { %8486 = vmatpush3.bf16.msra.mxu1 %v8483_v63 }
 0x340   :  { %v8679_v21 = vpack.c.bf16 %v5686_v20, %v5685_v33  ;;  %8190 = vmatmul.mubr.msk.f32.vlgmr.msra.gmra.mrb[8].mxu0 %vm111_vm0, %v5571_v0  ;;  %v2773_v14 = vpop.permute.xlu0 %2772  ;;  %7857 = vmatmul.mubr.msk.f32.gmra.mrb[2].mxu1 %vm111_vm0, %v2664_v17  ;;  %v5926_v17 = vld [vmem:[#allocation2 + $0x5d0] sm:$0xff]  ;;  %v2906_v20 = vld [vmem:[#allocation2 + $0x2c8] sm:$0xff] }
 0x341   :  { %8678 = vmatpush3.bf16.msra.mxu0 %v8675_v34  ;;  %v2781_v37 = vmul.f32 %v10475_v18, %v2773_v14  ;;  %8192 = vmatprep.mubr.msk.f32.mxu0 %vm111_vm0, %v5572_v5  ;;  %v10502_v2 = vpop.permute.xlu1 %6147  ;;  %v5925_v34 = vld [vmem:[#allocation2 + $0x5c8] sm:$0xff] }
 0x342   :  { %8680 = vmatprep.subr.bf16.mxu0 %v8679_v21  ;;  %7867 = vmatprep.mubr.msk.f32.mxu1 %vm111_vm0, %v2783_v48 }
 0x343   :  { %v8487_v56 = vpack.c.bf16 %v2781_v37, %v2780_v46  ;;  %v5927_v46 = vld [vmem:[#allocation2 + $0x5d8] sm:$0xff]  ;;  %v6155_v37 = vmul.f32 %v10502_v2, %v3021_v10 }
 0x344   :  { %8193 = vmatmul.mubr.msk.f32.gmra.mrb[10].mxu0 %vm111_vm0, %v5573_v6  ;;  %v10508_v39 = vpop.permute.xlu0 %6035  ;;  %v6042_v6 = vld [vmem:[#allocation2 + $0x5e0] sm:$0xff] }
 0x345   :  { %8682 = vmatpush3.bf16.msra.mxu0 %v8679_v21  ;;  %8203 = vmatprep.mubr.msk.f32.mxu0 %vm111_vm0, %v5688_v35  ;;  %v5798_v42 = vpop.permute.xlu1 %5797  ;;  %v6040_v0 = vmul.f32 %v10508_v39, %v2899_v38  ;;  %v10549_v39 = vld [vmem:[%s10757_s9 + $0x18] ss:$0 sm:$0xff] }
 0x346   :  { %8684 = vmatprep.subr.bf16.mxu0 %v8683_v43  ;;  %v5803_v12 = vmul.f32 %v5798_v42, %v10433_v1  ;;  %8488 = vmatprep.subr.bf16.mxu1 %v8487_v56  ;;  %v6043_v42 = vld [vmem:[#allocation2 + $0x5e8] sm:$0xff] }
 0x347   :  { %8490 = vmatpush3.bf16.msra.mxu1 %v8487_v56 }
 0x348   :  { %v8687_v60 = vpack.c.bf16 %v5804_v25, %v5803_v12  ;;  %8204 = vmatmul.mubr.msk.f32.vlgmr.msra.gmra.mrb[8].mxu0 %vm111_vm0, %v5689_v53  ;;  %v2891_v32 = vpop.permute.xlu0 %2890  ;;  %v2908_v53 = vld [vmem:[#allocation2 + $0x2d8] sm:$0xff]  ;;  %v6044_v12 = vld [vmem:[#allocation2 + $0x5f0] sm:$0xff] }
 0x349   :  { %8686 = vmatpush3.bf16.msra.mxu0 %v8683_v43  ;;  %v2901_v19 = vmul.f32 %v2899_v38, %v2891_v32  ;;  %8206 = vmatprep.mubr.msk.f32.mxu0 %vm111_vm0, %v5690_v3  ;;  %v2893_v1 = vpop.permute.xlu1 %2892  ;;  %v3027_v3 = vld [vmem:[#allocation2 + $0x2e0] sm:$0xff] }
 0x34a   :  { %8688 = vmatprep.subr.bf16.mxu0 %v8687_v60  ;;  %7868 = vmatmul.mubr.msk.f32.vlgmr.msra.gmra.mrb[0].mxu1 %vm111_vm0, %v2784_v45  ;;  %v2902_v8 = vmul.f32 %v2899_v38, %v2893_v1 }
 0x34b   :  { %v8491_v59 = vpack.c.bf16 %v2901_v19, %v2900_v50  ;;  %7870 = vmatprep.mubr.msk.f32.mxu1 %vm111_vm0, %v2785_v22  ;;  %v6045_v22 = vld [vmem:[#allocation2 + $0x5f8] sm:$0xff]  ;;  %v6160_v19 = vld [vmem:[#allocation2 + $0x600] sm:$0xff] }
 0x34c   :  { %8207 = vmatmul.mubr.msk.f32.gmra.mrb[10].mxu0 %vm111_vm0, %v5691_v24  ;;  %v6150_v15 = vpop.permute.xlu0 %6149 }
 0x34d   :  { %8690 = vmatpush3.bf16.msra.mxu0 %v8687_v60  ;;  %8217 = vmatprep.mubr.msk.f32.mxu0 %vm111_vm0, %v5806_v36  ;;  %v5916_v41 = vpop.permute.xlu1 %5915  ;;  %v6156_v33 = vmul.f32 %v6150_v15, %v3021_v10 }
 0x34e   :  { %8692 = vmatprep.subr.bf16.mxu0 %v8691_v7  ;;  %v5921_v29 = vmul.f32 %v5916_v41, %v10475_v18  ;;  %8492 = vmatprep.subr.bf16.mxu1 %v8491_v59  ;;  %v6037_v18 = vmul.f32 %v10442_v11, %v2899_v38  ;;  %v6162_v41 = vld [vmem:[#allocation2 + $0x610] sm:$0xff] }
 0x34f   :  { %8494 = vmatpush3.bf16.msra.mxu1 %v8491_v59  ;;  %v8707_v35 = vpack.c.bf16 %v6156_v33, %v6155_v37 }
 0x350   :  { %v8695_v40 = vpack.c.bf16 %v5922_v28, %v5921_v29  ;;  %8218 = vmatmul.mubr.msk.f32.vlgmr.msra.gmra.mrb[8].mxu0 %vm111_vm0, %v5807_v55  ;;  %v2895_v23 = vpop.permute.xlu0 %2894  ;;  %7871 = vmatmul.mubr.msk.f32.gmra.mrb[2].mxu1 %vm111_vm0, %v2786_v16  ;;  %v8699_v57 = vpack.c.bf16 %v6038_v49, %v6037_v18  ;;  %v3028_v55 = vld [vmem:[#allocation2 + $0x2e8] sm:$0xff]  ;;  %v3029_v29 = vld [vmem:[#allocation2 + $0x2f0] sm:$0xff]  ;;  %v6163_v49 = vld [vmem:[#allocation2 + $0x618] sm:$0xff] }
 0x351   :  { %8694 = vmatpush3.bf16.msra.mxu0 %v8691_v7  ;;  %v2903_v62 = vmul.f32 %v2899_v38, %v2895_v23  ;;  %8220 = vmatprep.mubr.msk.f32.mxu0 %vm111_vm0, %v5808_v4  ;;  %v3011_v47 = vpop.permute.xlu1 %3010  ;;  %v6161_v7 = vld [vmem:[#allocation2 + $0x608] sm:$0xff]  ;;  %v6278_v23 = vld [vmem:[#allocation2 + $0x620] sm:$0xff] }
 0x352   :  { %8696 = vmatprep.subr.bf16.mxu0 %v8695_v40  ;;  %7881 = vmatprep.mubr.msk.f32.mxu1 %vm111_vm0, %v2905_v52  ;;  %v3022_v21 = vmul.f32 %v3021_v10, %v3011_v47 }
 0x353   :  { %v8495_v30 = vpack.c.bf16 %v2903_v62, %v2902_v8  ;;  %v3030_v8 = vld [vmem:[#allocation2 + $0x2f8] sm:$0xff] }
 0x354   :  { %8221 = vmatmul.mubr.msk.f32.gmra.mrb[10].mxu0 %vm111_vm0, %v5809_v31  ;;  %v6154_v9 = vpop.permute.xlu0 %6153  ;;  %v3149_v31 = vld [vmem:[#allocation2 + $0x300] sm:$0xff] }
 0x355   :  { %8698 = vmatpush3.bf16.msra.mxu0 %v8695_v40  ;;  %8231 = vmatprep.mubr.msk.f32.mxu0 %vm111_vm0, %v5924_v61  ;;  %v6034_v63 = vpop.permute.xlu1 %6033  ;;  %v6158_v25 = vmul.f32 %v6154_v9, %v3021_v10  ;;  %v6280_v9 = vld [vmem:[#allocation2 + $0x630] sm:$0xff] }
 0x356   :  { %8700 = vmatprep.subr.bf16.mxu0 %v8699_v57  ;;  %v6039_v11 = vmul.f32 %v6034_v63, %v2899_v38  ;;  %8496 = vmatprep.subr.bf16.mxu1 %v8495_v30 }
 0x357   :  { %8498 = vmatpush3.bf16.msra.mxu1 %v8495_v30  ;;  %v6279_v30 = vld [vmem:[#allocation2 + $0x628] sm:$0xff] }
 0x358   :  { %v8703_v5 = vpack.c.bf16 %v6040_v0, %v6039_v11  ;;  %8232 = vmatmul.mubr.msk.f32.vlgmr.msra.gmra.mrb[8].mxu0 %vm111_vm0, %v5925_v34  ;;  %v3013_v48 = vpop.permute.xlu0 %3012  ;;  %v6281_v34 = vld [vmem:[#allocation2 + $0x638] sm:$0xff]  ;;  %v7099_v11 = vld [vmem:[%s10753_s5 + $0x20] sm:$0xff] }
 0x359   :  { %8702 = vmatpush3.bf16.msra.mxu0 %v8699_v57  ;;  %v3023_v14 = vmul.f32 %v3021_v10, %v3013_v48  ;;  %8234 = vmatprep.mubr.msk.f32.mxu0 %vm111_vm0, %v5926_v17  ;;  %v6152_v44 = vpop.permute.xlu1 %6151  ;;  %v3152_v0 = vld [vmem:[#allocation2 + $0x318] sm:$0xff] }
 0x35a   :  { %8704 = vmatprep.subr.bf16.mxu0 %v8703_v5  ;;  %7882 = vmatmul.mubr.msk.f32.vlgmr.msra.gmra.mrb[0].mxu1 %vm111_vm0, %v2906_v20  ;;  %v6157_v56 = vmul.f32 %v6152_v44, %v3021_v10 }
 0x35b   :  { %v8499_v13 = vpack.c.bf16 %v3023_v14, %v3022_v21  ;;  %7884 = vmatprep.mubr.msk.f32.mxu1 %vm111_vm0, %v2907_v58 }
 0x35c   :  { %8235 = vmatmul.mubr.msk.f32.gmra.mrb[10].mxu0 %vm111_vm0, %v5927_v46  ;;  %v6268_v43 = vpop.permute.xlu0 %6267  ;;  %v8711_v51 = vpack.c.bf16 %v6158_v25, %v6157_v56 }
 0x35d   :  { %8706 = vmatpush3.bf16.msra.mxu0 %v8703_v5  ;;  %8245 = vmatprep.mubr.msk.f32.mxu0 %vm111_vm0, %v6042_v6  ;;  %v6266_v2 = vpop.permute.xlu1 %6265  ;;  %v6274_v38 = vmul.f32 %v10549_v39, %v6268_v43 }
 0x35e   :  { %8708 = vmatprep.subr.bf16.mxu0 %v8707_v35  ;;  %8500 = vmatprep.subr.bf16.mxu1 %v8499_v13  ;;  %v6273_v45 = vmul.f32 %v10549_v39, %v6266_v2 }
 0x35f   :  { %8502 = vmatpush3.bf16.msra.mxu1 %v8499_v13 }
 0x360   :  { %8246 = vmatmul.mubr.msk.f32.vlgmr.msra.gmra.mrb[8].mxu0 %vm111_vm0, %v6043_v42  ;;  %v3017_v27 = vpop.permute.xlu0 %3016  ;;  %7885 = vmatmul.mubr.msk.f32.gmra.mrb[2].mxu1 %vm111_vm0, %v2908_v53  ;;  %v8715_v1 = vpack.c.bf16 %v6274_v38, %v6273_v45 }
 0x361   :  { %8710 = vmatpush3.bf16.msra.mxu0 %v8707_v35  ;;  %v3025_v60 = vmul.f32 %v3021_v10, %v3017_v27  ;;  %8248 = vmatprep.mubr.msk.f32.mxu0 %vm111_vm0, %v6044_v12  ;;  %v3015_v32 = vpop.permute.xlu1 %3014 }
 0x362   :  { %8712 = vmatprep.subr.bf16.mxu0 %v8711_v51  ;;  %v3024_v50 = vmul.f32 %v3021_v10, %v3015_v32  ;;  %7895 = vmatprep.mubr.msk.f32.mxu1 %vm111_vm0, %v3027_v3  ;;  %v3151_v10 = vld [vmem:[#allocation2 + $0x310] sm:$0xff] }
 0x364   :  { %v8503_v24 = vpack.c.bf16 %v3025_v60, %v3024_v50  ;;  %8249 = vmatmul.mubr.msk.f32.gmra.mrb[10].mxu0 %vm111_vm0, %v6045_v22  ;;  %v6272_v26 = vpop.permute.xlu0 %6271 }
 0x365   :  { %8714 = vmatpush3.bf16.msra.mxu0 %v8711_v51  ;;  %v6276_v36 = vmul.f32 %v10549_v39, %v6272_v26  ;;  %8259 = vmatprep.mubr.msk.f32.mxu0 %vm111_vm0, %v6160_v19  ;;  %v6270_v59 = vpop.permute.xlu1 %6269 }
 0x366   :  { %8716 = vmatprep.subr.bf16.mxu0 %v8715_v1  ;;  %v6275_v15 = vmul.f32 %v10549_v39, %v6270_v59  ;;  %8504 = vmatprep.subr.bf16.mxu1 %v8503_v24 }
 0x367   :  { %8506 = vmatpush3.bf16.msra.mxu1 %v8503_v24 }
 0x368   :  { %v8719_v16 = vpack.c.bf16 %v6276_v36, %v6275_v15  ;;  %8260 = vmatmul.mubr.msk.f32.vlgmr.msra.gmra.mrb[8].mxu0 %vm111_vm0, %v6161_v7  ;;  %v3135_v28 = vpop.permute.xlu0 %3134 }
 0x369   :  { %8718 = vmatpush3.bf16.msra.mxu0 %v8715_v1  ;;  %v3145_v4 = vmul.f32 %v10549_v39, %v3135_v28  ;;  %8262 = vmatprep.mubr.msk.f32.mxu0 %vm111_vm0, %v6162_v41  ;;  %v3133_v52 = vpop.permute.xlu1 %3132 }
 0x36a   :  { %v3144_v40 = vmul.f32 %v10549_v39, %v3133_v52  ;;  %8720 = vmatprep.subr.bf16.mxu0 %v8719_v16  ;;  %7896 = vmatmul.mubr.msk.f32.vlgmr.msra.gmra.mrb[0].mxu1 %vm111_vm0, %v3028_v55 }
 0x36b   :  { %7898 = vmatprep.mubr.msk.f32.mxu1 %vm111_vm0, %v3029_v29 }
 0x36c   :  { %v8507_v62 = vpack.c.bf16 %v3145_v4, %v3144_v40  ;;  %8263 = vmatmul.mubr.msk.f32.gmra.mrb[10].mxu0 %vm111_vm0, %v6163_v49  ;;  %v3139_v47 = vpop.permute.xlu0 %3138 }
 0x36d   :  { %8722 = vmatpush3.bf16.msra.mxu0 %v8719_v16  ;;  %v3147_v18 = vmul.f32 %v10549_v39, %v3139_v47  ;;  %8273 = vmatprep.mubr.msk.f32.mxu0 %vm111_vm0, %v6278_v23  ;;  %v3137_v61 = vpop.permute.xlu1 %3136 }
 0x36e   :  { %v3146_v57 = vmul.f32 %v10549_v39, %v3137_v61  ;;  %8508 = vmatprep.subr.bf16.mxu1 %v8507_v62  ;;  %7899 = vmatmul.mubr.msk.f32.gmra.mrb[2].mxu1 %vm111_vm0, %v3030_v8 }
 0x36f   :  { %8510 = vmatpush3.bf16.msra.mxu1 %v8507_v62  ;;  %7909 = vmatprep.mubr.msk.f32.mxu1 %vm111_vm0, %v3149_v31 }
 0x370   :  { %v8511_v63 = vpack.c.bf16 %v3147_v18, %v3146_v57  ;;  %8274 = vmatmul.mubr.msk.f32.vlgmr.msra.gmra.mrb[8].mxu0 %vm111_vm0, %v6279_v30 }
 0x371   :  { %8276 = vmatprep.mubr.msk.f32.mxu0 %vm111_vm0, %v6280_v9 }
 0x372   :  { %8512 = vmatprep.subr.bf16.mxu1 %v8511_v63 }
 0x373   :  { %8514 = vmatpush3.bf16.msra.mxu1 %v8511_v63 }
 0x374   :  { %8277 = vmatmul.mubr.msk.f32.gmra.mrb[10].mxu0 %vm111_vm0, %v6281_v34 }
 0x376   :  { %7910 = vmatmul.mubr.msk.f32.vlgmr.msra.gmra.mrb[0].mxu1 %vm111_vm0, %v3150_v54 }
 0x377   :  { %7912 = vmatprep.mubr.msk.f32.mxu1 %vm111_vm0, %v3151_v10 }
 0x37a   :  { %7913 = vmatmul.mubr.msk.f32.gmra.mrb[2].mxu1 %vm111_vm0, %v3152_v0 }
 0x37b   :  { %8287 = vmatprep.mubr.msk.f32.mxu1 %vm111_vm0, %v7099_v11 }
 0x37d   :  { %v6396_v17 = vpop.permute.xlu0 %6395 }
 0x37f   :  { %v6391_v20 = vpop.permute.xlu1 %6390 }
 0x381   :  { %v6406_v33 = vpop.permute.xlu0 %6405 }
 0x383   :  { %v6401_v5 = vpop.permute.xlu1 %6400 }
 0x385   :  { %v3266_v46 = vpop.permute.xlu0 %3265 }
 0x387   :  { %v3261_v13 = vpop.permute.xlu1 %3260 }
 0x389   :  { %v3276_v51 = vpop.permute.xlu0 %3275 }
 0x38b   :  { %v3271_v27 = vpop.permute.xlu1 %3270 }
 0x443   :  { %v8275_v48 = vpop.f32.mrb[8].mxu0 }
 0x444   :  { %v6409_v58 = vadd.f32 %v8275_v48, %v6396_v17  ;;  %v6360_v21 = vpop.f32.mrb[9].mxu0  ;;  %v7101_v48 = vld [vmem:[%s10753_s5 + $0x30] sm:$0xff] }
 0x445   :  { %v6408_v14 = vadd.f32 %v6391_v20, %v6360_v21  ;;  %v7102_v21 = vld [vmem:[%s10753_s5 + $0x38] sm:$0xff] }
 0x446   :  { %v6413_v44 = vmul.f32 0.5, %v6409_v58 }
 0x447   :  { %v6412_v37 = vmul.f32 0.5, %v6408_v14  ;;  %v8278_v6 = vpop.f32.mrb[10].mxu0 }
 0x448   :  { %8991 = vtanh.f32 %v6413_v44  ;;  %v6411_v35 = vadd.f32 %v8278_v6, %v6406_v33  ;;  %v6370_v56 = vpop.f32.mrb[11].mxu0  ;;  %v7100_v33 = vld [vmem:[%s10753_s5 + $0x28] sm:$0xff]  ;;  %v6643_v6 = vpop.permute.xlu0 %6642 }
 0x449   :  { %8993 = vtanh.f32 %v6412_v37  ;;  %v6410_v43 = vadd.f32 %v6401_v5, %v6370_v56  ;;  %v7911_v39 = vpop.f32.mrb[0].mxu1  ;;  %v3303_v44 = vld [vmem:[%s10753_s5 + $0x8] sm:$0xff]  ;;  %v3305_v37 = vld [vmem:[%s10753_s5 + $0x18] sm:$0xff] }
 0x44a   :  { %v6415_v2 = vmul.f32 0.5, %v6411_v35  ;;  %v3279_v42 = vadd.f32 %v7911_v39, %v3266_v46  ;;  %v3231_v53 = vpop.f32.mrb[1].mxu1  ;;  %v3304_v46 = vld [vmem:[%s10753_s5 + $0x10] sm:$0xff] }
 0x44b   :  { %v6414_v25 = vmul.f32 0.5, %v6410_v43  ;;  %v3278_v12 = vadd.f32 %v3261_v13, %v3231_v53  ;;  %v6638_v13 = vpop.permute.xlu1 %6637 }
 0x44c   :  { %8995 = vtanh.f32 %v6415_v2  ;;  %v3283_v3 = vmul.f32 0.5, %v3279_v42  ;;  %v6653_v2 = vpop.permute.xlu0 %6652 }
 0x44d   :  { %8997 = vtanh.f32 %v6414_v25  ;;  %v3282_v38 = vmul.f32 0.5, %v3278_v12  ;;  %v7914_v45 = vpop.f32.mrb[2].mxu1 }
 0x44e   :  { %8999 = vtanh.f32 %v3283_v3  ;;  %v3281_v60 = vadd.f32 %v7914_v45, %v3276_v51  ;;  %v3241_v32 = vpop.f32.mrb[3].mxu1 }
 0x44f   :  { %9001 = vtanh.f32 %v3282_v38  ;;  %v3280_v22 = vadd.f32 %v3271_v27, %v3241_v32  ;;  %v6648_v53 = vpop.permute.xlu1 %6647 }
 0x450   :  { %v3285_v50 = vmul.f32 0.5, %v3281_v60 }
 0x451   :  { %v3284_v19 = vmul.f32 0.5, %v3280_v22 }
 0x452   :  { %v8992_v1 = vpop.eup %8991  ;;  %9003 = vtanh.f32 %v3285_v50 }
 0x453   :  { %v8994_v24 = vpop.eup %8993  ;;  %v6421_v26 = vadd.f32 1.0, %v8992_v1  ;;  %9005 = vtanh.f32 %v3284_v19 }
 0x454   :  { %v6420_v36 = vadd.f32 1.0, %v8994_v24 }
 0x455   :  { %v6425_v59 = vmul.f32 0.5, %v6421_v26 }
 0x456   :  { %v8996_v7 = vpop.eup %8995  ;;  %v6424_v15 = vmul.f32 0.5, %v6420_v36  ;;  %v6779_v36 = vld [vmem:[%s10755_s7 + $0x8] sm:$0xff] }
 0x457   :  { %v8998_v41 = vpop.eup %8997  ;;  %v6429_v55 = vmul.f32 %v6425_v59, %v6409_v58  ;;  %v6423_v16 = vadd.f32 1.0, %v8996_v7 }
 0x458   :  { %v9000_v28 = vpop.eup %8999  ;;  %v6428_v29 = vmul.f32 %v6424_v15, %v6408_v14  ;;  %v6422_v4 = vadd.f32 1.0, %v8998_v41  ;;  %v3302_v14 = vld [vmem:[%s10753_s5] sm:$0xff] }
 0x459   :  { %v9002_v52 = vpop.eup %9001  ;;  %v6427_v49 = vmul.f32 0.5, %v6423_v16  ;;  %v3291_v40 = vadd.f32 1.0, %v9000_v28  ;;  %v6778_v15 = vld [vmem:[%s10755_s7] sm:$0xff] }
 0x45a   :  { %v6426_v23 = vmul.f32 0.5, %v6422_v4  ;;  %v3290_v8 = vadd.f32 1.0, %v9002_v52  ;;  %v8723_v62 = vpack.c.bf16 %v6429_v55, %v6428_v29  ;;  %v6780_v29 = vld [vmem:[%s10755_s7 + $0x10] sm:$0xff]  ;;  %v6781_v52 = vld [vmem:[%s10755_s7 + $0x18] sm:$0xff] }
 0x45b   :  { %v6431_v47 = vmul.f32 %v6427_v49, %v6411_v35  ;;  %v3295_v31 = vmul.f32 0.5, %v3291_v40 }
 0x45c   :  { %v9004_v18 = vpop.eup %9003  ;;  %v6430_v61 = vmul.f32 %v6426_v23, %v6410_v43  ;;  %v3294_v30 = vmul.f32 0.5, %v3290_v8  ;;  %8724 = vmatprep.subr.bf16.mxu1 %v8723_v62 }
 0x45d   :  { %v9006_v57 = vpop.eup %9005  ;;  %v3299_v9 = vmul.f32 %v3295_v31, %v3279_v42  ;;  %v3293_v63 = vadd.f32 1.0, %v9004_v18  ;;  %8726 = vmatpush3.bf16.msra.mxu1 %v8723_v62 }
 0x45e   :  { %v3298_v34 = vmul.f32 %v3294_v30, %v3278_v12  ;;  %v3292_v54 = vadd.f32 1.0, %v9006_v57  ;;  %v8727_v10 = vpack.c.bf16 %v6431_v47, %v6430_v61 }
 0x45f   :  { %v3297_v0 = vmul.f32 0.5, %v3293_v63 }
 0x460   :  { %v3296_v11 = vmul.f32 0.5, %v3292_v54  ;;  %8728 = vmatprep.subr.bf16.mxu1 %v8727_v10  ;;  %v8731_v17 = vpack.c.bf16 %v3299_v9, %v3298_v34 }
 0x461   :  { %v3301_v20 = vmul.f32 %v3297_v0, %v3281_v60  ;;  %8730 = vmatpush3.bf16.msra.mxu1 %v8727_v10 }
 0x462   :  { %v3300_v5 = vmul.f32 %v3296_v11, %v3280_v22  ;;  %8732 = vmatprep.subr.bf16.mxu1 %v8731_v17 }
 0x464   :  { %8288 = vmatmul.mubr.msk.f32.vlgmr.msra.gmra.mrb[4].mxu1 %vm111_vm0, %v7100_v33  ;;  %v8735_v58 = vpack.c.bf16 %v3301_v20, %v3300_v5 }
 0x465   :  { %8734 = vmatpush3.bf16.msra.mxu1 %v8731_v17  ;;  %8290 = vmatprep.mubr.msk.f32.mxu1 %vm111_vm0, %v7101_v48 }
 0x466   :  { %8736 = vmatprep.subr.bf16.mxu1 %v8735_v58 }
 0x468   :  { %8291 = vmatmul.mubr.msk.f32.gmra.mrb[6].mxu1 %vm111_vm0, %v7102_v21 }
 0x469   :  { %8738 = vmatpush3.bf16.msra.mxu1 %v8735_v58  ;;  %8301 = vmatprep.mubr.msk.f32.mxu1 %vm111_vm0, %v3302_v14 }
 0x46c   :  { %8302 = vmatmul.mubr.msk.f32.vlgmr.msra.gmra.mrb[4].mxu1 %vm111_vm0, %v3303_v44 }
 0x46d   :  { %8304 = vmatprep.mubr.msk.f32.mxu1 %vm111_vm0, %v3304_v46 }
 0x470   :  { %8305 = vmatmul.mubr.msk.f32.gmra.mrb[6].mxu1 %vm111_vm0, %v3305_v37 }
 0x53f   :  { %v8303_v35 = vpop.f32.mrb[4].mxu1 }
 0x540   :  { %v10612_v56 = vadd.f32 %v8303_v35, %v6643_v6  ;;  %v6612_v43 = vpop.f32.mrb[5].mxu1 }
 0x541   :  { %v10614_v39 = vadd.f32 %v6638_v13, %v6612_v43 }
 0x542   :  { %6752 = vrot.lane.b32.xlu0 %v10612_v56, %s9054_s16  ;;  %v6662_v19 = vsel %vm74_vm1, %v10612_v56, 0.0 }
 0x543   :  { %6750 = vrot.lane.b32.xlu1 %v10614_v39, %s9054_s16  ;;  %v8306_v42 = vpop.f32.mrb[6].mxu1  ;;  %v6659_v1 = vsel %vm74_vm1, %v10614_v39, 0.0 }
 0x544   :  { %v10620_v25 = vadd.f32 %v8306_v42, %v6653_v2  ;;  %v6622_v12 = vpop.f32.mrb[7].mxu1 }
 0x545   :  { %v10622_v3 = vadd.f32 %v6648_v53, %v6622_v12 }
 0x546   :  { %6756 = vrot.lane.b32.xlu0 %v10620_v25, %s9054_s16  ;;  %v6668_v24 = vsel %vm74_vm1, %v10620_v25, 0.0 }
 0x547   :  { %6754 = vrot.lane.b32.xlu1 %v10622_v3, %s9054_s16  ;;  %v6665_v26 = vsel %vm74_vm1, %v10622_v3, 0.0 }
 0x5b4   :  { %v6753_v51 = vpop.permute.xlu0 %6752 }
 0x5b5   :  { %v6765_v38 = vsel %vm74_vm1, %v6753_v51, 0.0  ;;  %v6751_v45 = vpop.permute.xlu1 %6750 }
 0x5b6   :  { %v6762_v27 = vsel %vm74_vm1, %v6751_v45, 0.0  ;;  %6766 = vadd.xlane.f32.xlu0 %v6765_v38  ;;  %v6801_v45 = vld [vmem:[%s10756_s8 + $0x8] sm:$0xff] }
 0x5b7   :  { %6763 = vadd.xlane.f32.xlu1 %v6762_v27  ;;  %v6800_v27 = vld [vmem:[%s10756_s8] sm:$0xff] }
 0x5b8   :  { %v6757_v60 = vpop.permute.xlu0 %6756 }
 0x5b9   :  { %v6771_v32 = vsel %vm74_vm1, %v6757_v60, 0.0  ;;  %v6755_v22 = vpop.permute.xlu1 %6754 }
 0x5ba   :  { %v6768_v50 = vsel %vm74_vm1, %v6755_v22, 0.0  ;;  %v6803_v22 = vld [vmem:[%s10756_s8 + $0x18] sm:$0xff] }
 0x5bb   :  { %6772 = vadd.xlane.f32.xlu1 %v6771_v32  ;;  %6769 = vadd.xlane.f32.xlu0 %v6768_v50  ;;  %v6802_v50 = vld [vmem:[%s10756_s8 + $0x10] sm:$0xff] }
 0x5bf   :  { %6663 = vadd.xlane.f32.xlu1 %v6662_v19  ;;  %6660 = vadd.xlane.f32.xlu0 %v6659_v1 }
 0x5c3   :  { %6669 = vadd.xlane.f32.xlu1 %v6668_v24  ;;  %6666 = vadd.xlane.f32.xlu0 %v6665_v26 }
 0x643   :  { %v6767_v59 = vpop.xlane.xlu0 %6766 }
 0x644   :  { %v6775_v7 = vmul.f32 0.015625, %v6767_v59  ;;  %v6764_v41 = vpop.xlane.xlu1 %6763 }
 0x645   :  { %v6774_v55 = vmul.f32 0.015625, %v6764_v41 }
 0x646   :  { %v6783_v16 = vmul.f32 %v6779_v36, %v6775_v7 }
 0x647   :  { %v6782_v28 = vmul.f32 %v6778_v15, %v6774_v55 }
 0x648   :  { %v6770_v4 = vpop.xlane.xlu0 %6769  ;;  %v6773_v49 = vpop.xlane.xlu1 %6772  ;;  %v6787_v40 = vsel %vm6683_vm2, %v6783_v16, 0.0 }
 0x649   :  { %v6786_v23 = vsel %vm6683_vm2, %v6782_v28, 0.0  ;;  %v6776_v8 = vmul.f32 0.015625, %v6770_v4  ;;  %v6777_v62 = vmul.f32 0.015625, %v6773_v49 }
 0x64a   :  { %v6788_v18 = vadd.f32 %v6787_v40, %v6786_v23 }
 0x64b   :  { %v6784_v47 = vmul.f32 %v6780_v29, %v6776_v8  ;;  %v6785_v31 = vmul.f32 %v6781_v52, %v6777_v62 }
 0x64c   :  { %v6661_v61 = vpop.xlane.xlu0 %6660  ;;  %v6664_v30 = vpop.xlane.xlu1 %6663 }
 0x64d   :  { %v6789_v57 = vsel %vm6683_vm2, %v6784_v47, 0.0  ;;  %v6671_v9 = vmul.f32 0.015625, %v6661_v61  ;;  %v6672_v63 = vmul.f32 0.015625, %v6664_v30  ;;  %v6791_v54 = vsel %vm6683_vm2, %v6785_v31, 0.0 }
 0x64e   :  { %v6790_v34 = vadd.f32 %v6789_v57, %v6788_v18 }
 0x64f   :  { %v6679_v10 = vmul.f32 %v6778_v15, %v6671_v9  ;;  %v6680_v0 = vmul.f32 %v6779_v36, %v6672_v63 }
 0x650   :  { %v6792_v11 = vadd.f32 %v6791_v54, %v6790_v34  ;;  %v6670_v17 = vpop.xlane.xlu1 %6669  ;;  %v6667_v20 = vpop.xlane.xlu0 %6666 }
 0x651   :  { %v6684_v33 = vsel %vm6683_vm2, %v6679_v10, 0.0  ;;  %v6685_v5 = vsel %vm6683_vm2, %v6680_v0, 0.0  ;;  %v6674_v48 = vmul.f32 0.015625, %v6670_v17  ;;  %v6673_v58 = vmul.f32 0.015625, %v6667_v20 }
 0x652   :  { %v6793_v21 = vrot.slane %v6792_v11, 4  ;;  %v6686_v37 = vadd.f32 %v6685_v5, %v6684_v33 }
 0x653   :  { %v6682_v14 = vmul.f32 %v6781_v52, %v6674_v48  ;;  %v6681_v44 = vmul.f32 %v6780_v29, %v6673_v58 }
 0x654   :  { %v6794_v46 = vadd.f32 %v6793_v21, %v6792_v11 }
 0x655   :  { %v6687_v6 = vsel %vm6683_vm2, %v6681_v44, 0.0  ;;  %v6689_v43 = vsel %vm6683_vm2, %v6682_v14, 0.0 }
 0x656   :  { %v6795_v13 = vrot.slane %v6794_v46, 2  ;;  %v6688_v35 = vadd.f32 %v6687_v6, %v6686_v37 }
 0x658   :  { %v6796_v2 = vadd.f32 %v6795_v13, %v6794_v46  ;;  %v6690_v42 = vadd.f32 %v6689_v43, %v6688_v35 }
 0x65a   :  { %v6797_v53 = vrot.slane %v6796_v2, 1  ;;  %v6691_v12 = vrot.slane %v6690_v42, 4 }
 0x65c   :  { %v6798_v51 = vadd.f32 %v6797_v53, %v6796_v2  ;;  %v6692_v38 = vadd.f32 %v6691_v12, %v6690_v42 }
 0x65e   :  { %v6693_v60 = vrot.slane %v6692_v38, 2  ;;  %v6799_v32 = vmax.f32 %v6798_v51, 0.0 }
 0x660   :  { %v6694_v19 = vadd.f32 %v6693_v60, %v6692_v38  ;;  %v6805_v1 = vmul.f32 %v6801_v45, %v6799_v32  ;;  %v6804_v24 = vmul.f32 %v6800_v27, %v6799_v32  ;;  %v6807_v26 = vmul.f32 %v6803_v22, %v6799_v32 }
 0x661   :  { %v6806_v15 = vmul.f32 %v6802_v50, %v6799_v32 }
 0x662   :  { %v6695_v36 = vrot.slane %v6694_v19, 1  ;;  %v6811_v59 = vsel %vm6683_vm2, %v6805_v1, 0.0  ;;  %v6808_v7 = vsel %vm6683_vm2, %v6804_v24, 0.0  ;;  %v6817_v55 = vsel %vm6683_vm2, %v6807_v26, 0.0 }
 0x663   :  { %6812 = vadd.xlane.f32.xlu1 %v6811_v59  ;;  %6809 = vadd.xlane.f32.xlu0 %v6808_v7  ;;  %v6814_v16 = vsel %vm6683_vm2, %v6806_v15, 0.0  ;;  %v9024_v15 = vld [vmem:[%s10748_s0] sm:$0xff] }
 0x664   :  { %v6696_v41 = vadd.f32 %v6695_v36, %v6694_v19  ;;  %v9023_v36 = vld [vmem:[%s10748_s0 + $0x8] sm:$0xff] }
 0x666   :  { %v6697_v28 = vmax.f32 %v6696_v41, 0.0 }
 0x667   :  { %6818 = vadd.xlane.f32.xlu1 %v6817_v55  ;;  %6815 = vadd.xlane.f32.xlu0 %v6814_v16  ;;  %v9025_v16 = vld [vmem:[%s10748_s0 + $0x18] sm:$0xff] }
 0x668   :  { %v6703_v29 = vmul.f32 %v6801_v45, %v6697_v28  ;;  %v6702_v4 = vmul.f32 %v6800_v27, %v6697_v28  ;;  %v6705_v40 = vmul.f32 %v6803_v22, %v6697_v28  ;;  %v6704_v23 = vmul.f32 %v6802_v50, %v6697_v28 }
 0x66a   :  { %v6709_v52 = vsel %vm6683_vm2, %v6703_v29, 0.0  ;;  %v6706_v49 = vsel %vm6683_vm2, %v6702_v4, 0.0  ;;  %v6715_v8 = vsel %vm6683_vm2, %v6705_v40, 0.0  ;;  %v6712_v62 = vsel %vm6683_vm2, %v6704_v23, 0.0  ;;  %v9026_v29 = vld [vmem:[%s10748_s0 + $0x10] sm:$0xff] }
 0x66b   :  { %6710 = vadd.xlane.f32.xlu1 %v6709_v52  ;;  %6707 = vadd.xlane.f32.xlu0 %v6706_v49 }
 0x66f   :  { %6716 = vadd.xlane.f32.xlu1 %v6715_v8  ;;  %6713 = vadd.xlane.f32.xlu0 %v6712_v62  ;;  %v7113_v8 = vld [vmem:[%s10748_s0 + $0x30] sm:$0xff]  ;;  %v7114_v62 = vld [vmem:[%s10748_s0 + $0x38] sm:$0xff] }
 0x6f0   :  { %v6813_v47 = vpop.xlane.xlu1 %6812  ;;  %v6810_v31 = vpop.xlane.xlu0 %6809 }
 0x6f1   :  { %v6821_v18 = vmul.f32 0.5, %v6813_v47  ;;  %v6820_v61 = vmul.f32 0.5, %v6810_v31 }
 0x6f3   :  { %9007 = vtanh.f32 %v6821_v18 }
 0x6f4   :  { %9009 = vtanh.f32 %v6820_v61  ;;  %v6819_v30 = vpop.xlane.xlu1 %6818  ;;  %v6816_v57 = vpop.xlane.xlu0 %6815 }
 0x6f5   :  { %v6823_v9 = vmul.f32 0.5, %v6819_v30  ;;  %v6822_v63 = vmul.f32 0.5, %v6816_v57 }
 0x6f7   :  { %9011 = vtanh.f32 %v6823_v9 }
 0x6f8   :  { %9013 = vtanh.f32 %v6822_v63  ;;  %v6711_v34 = vpop.xlane.xlu1 %6710  ;;  %v6708_v54 = vpop.xlane.xlu0 %6707 }
 0x6f9   :  { %v6719_v10 = vmul.f32 0.5, %v6711_v34  ;;  %v6718_v0 = vmul.f32 0.5, %v6708_v54 }
 0x6fb   :  { %9015 = vtanh.f32 %v6719_v10 }
 0x6fc   :  { %9017 = vtanh.f32 %v6718_v0  ;;  %v6717_v11 = vpop.xlane.xlu1 %6716  ;;  %v6714_v17 = vpop.xlane.xlu0 %6713 }
 0x6fd   :  { %v9008_v20 = vpop.eup %9007  ;;  %v6721_v33 = vmul.f32 0.5, %v6717_v11  ;;  %v6720_v5 = vmul.f32 0.5, %v6714_v17 }
 0x6fe   :  { %v9010_v48 = vpop.eup %9009  ;;  %v6829_v58 = vadd.f32 1.0, %v9008_v20 }
 0x6ff   :  { %v6828_v21 = vadd.f32 1.0, %v9010_v48  ;;  %9019 = vtanh.f32 %v6721_v33 }
 0x700   :  { %v6833_v14 = vmul.f32 0.5, %v6829_v58  ;;  %9021 = vtanh.f32 %v6720_v5 }
 0x701   :  { %v9012_v44 = vpop.eup %9011  ;;  %v6832_v46 = vmul.f32 0.5, %v6828_v21 }
 0x702   :  { %v9014_v37 = vpop.eup %9013  ;;  %v6841_v6 = vmul.f32 %v6833_v14, %v10612_v56  ;;  %v6831_v13 = vadd.f32 1.0, %v9012_v44 }
 0x703   :  { %v6840_v35 = vmul.f32 %v6832_v46, %v10614_v39  ;;  %v6830_v43 = vadd.f32 1.0, %v9014_v37 }
 0x704   :  { %v6835_v2 = vmul.f32 0.5, %v6831_v13  ;;  %6850 = vrot.lane.b32.xlu1 %v6841_v6, %s9054_s16 }
 0x705   :  { %v9016_v42 = vpop.eup %9015  ;;  %v6834_v53 = vmul.f32 0.5, %v6830_v43  ;;  %6848 = vrot.lane.b32.xlu0 %v6840_v35, %s9054_s16 }
 0x706   :  { %v9018_v12 = vpop.eup %9017  ;;  %v6843_v51 = vmul.f32 %v6835_v2, %v10620_v25  ;;  %v6727_v38 = vadd.f32 1.0, %v9016_v42 }
 0x707   :  { %v6842_v45 = vmul.f32 %v6834_v53, %v10622_v3  ;;  %v6726_v27 = vadd.f32 1.0, %v9018_v12 }
 0x708   :  { %v6731_v60 = vmul.f32 0.5, %v6727_v38 }
 0x709   :  { %v9020_v32 = vpop.eup %9019  ;;  %v6730_v22 = vmul.f32 0.5, %v6726_v27  ;;  %6854 = vrot.lane.b32.xlu0 %v6843_v51, %s9054_s16  ;;  %6852 = vrot.lane.b32.xlu1 %v6842_v45, %s9054_s16 }
 0x70a   :  { %v9022_v50 = vpop.eup %9021  ;;  %v6735_v19 = vmul.f32 %v6731_v60, %v10612_v56  ;;  %v6729_v1 = vadd.f32 1.0, %v9020_v32 }
 0x70b   :  { %v6734_v24 = vmul.f32 %v6730_v22, %v10614_v39  ;;  %v6728_v26 = vadd.f32 1.0, %v9022_v50 }
 0x70c   :  { %v6739_v59 = vadd.f32 %v9023_v36, %v6735_v19  ;;  %v6733_v7 = vmul.f32 0.5, %v6729_v1 }
 0x70d   :  { %v6738_v41 = vadd.f32 %v9024_v15, %v6734_v24  ;;  %v6732_v55 = vmul.f32 0.5, %v6728_v26 }
 0x70e   :  { %6743 = vst.msk [vmem:[%s10758_s10 + $0x8] sm:$0xff] %vm74_vm1, %v6739_v59  ;;  %v6737_v56 = vmul.f32 %v6733_v7, %v10620_v25  ;;  %v7112_v25 = vld [vmem:[%s10748_s0 + $0x28] sm:$0xff] }
 0x70f   :  { %6742 = vst.msk [vmem:[%s10758_s10] sm:$0xff] %vm74_vm1, %v6738_v41  ;;  %v6736_v39 = vmul.f32 %v6732_v55, %v10622_v3  ;;  %v7111_v3 = vld [vmem:[%s10748_s0 + $0x20] sm:$0xff] }
 0x710   :  { %v6741_v28 = vadd.f32 %v9025_v16, %v6737_v56 }
 0x711   :  { %v6740_v4 = vadd.f32 %v9026_v29, %v6736_v39 }
 0x712   :  { %6745 = vst.msk [vmem:[%s10758_s10 + $0x18] sm:$0xff] %vm74_vm1, %v6741_v28 }
 0x713   :  { %6744 = vst.msk [vmem:[%s10758_s10 + $0x10] sm:$0xff] %vm74_vm1, %v6740_v4 }
 0x776   :  { %v6851_v52 = vpop.permute.xlu1 %6850 }
 0x777   :  { %v6861_v49 = vadd.f32 %v7112_v25, %v6851_v52  ;;  %v6849_v40 = vpop.permute.xlu0 %6848 }
 0x778   :  { %v6860_v23 = vadd.f32 %v7111_v3, %v6849_v40 }
 0x779   :  { %7116 = vst.msk [vmem:[%s10758_s10 + $0x28] sm:$0xff] %vm74_vm1, %v6861_v49 }
 0x77a   :  { %7115 = vst.msk [vmem:[%s10758_s10 + $0x20] sm:$0xff] %vm74_vm1, %v6860_v23 }
 0x77b   :  { %v6853_v47 = vpop.permute.xlu1 %6852  ;;  %v6855_v31 = vpop.permute.xlu0 %6854 }
 0x77c   :  { %v6862_v18 = vadd.f32 %v7113_v8, %v6853_v47  ;;  %v6863_v61 = vadd.f32 %v7114_v62, %v6855_v31 }
 0x77e   :  { %7117 = vst.msk [vmem:[%s10758_s10 + $0x30] sm:$0xff] %vm74_vm1, %v6862_v18  ;;  %7118 = vst.msk [vmem:[%s10758_s10 + $0x38] sm:$0xff] %vm74_vm1, %v6863_v61 }
 0x77f   :  { %6873 = vsyncpa [#allocation3], 1 }

</bundles_post_ra>
